<compile_context>
chip_gen: v5e
topology: v5e:2x2
jax: 0.10.0
libtpu: 0.0.40
codegen_flags: <defaults>
</compile_context>

<pallas_src>
import functools
import math

import numpy as np
import jax
import jax.numpy as jnp
from jax import lax
from jax.experimental import pallas as pl
from jax.experimental.pallas import tpu as pltpu

LANE = 128
SUBLANE = 8


def _rup(n, m):
    return ((n + m - 1) // m) * m


# ---------------------------------------------------------------------------
# Packed weight layouts (shared by the host packer and the kernel)
# ---------------------------------------------------------------------------
def _layout(entries):
    offs, o = {}, 0
    for name, w in entries:
        offs[name] = (o, w)
        o += w
    return offs, o


def _mat_layout(Dp, Fp):
    # Dp-row matrices, concatenated along columns (all lane-aligned).
    return _layout([("f1_w1", Fp), ("a_qkv_w", 3 * Dp), ("a_out_w", Dp),
                    ("c_pw1_w", 2 * Dp), ("c_pw2_w", Dp), ("f2_w1", Fp)])


def _mat2_layout(Dp):
    # Fp-row matrices (FFN output projections).
    return _layout([("f1_w2", Dp), ("f2_w2", Dp)])


def _vec_layout(Dp, Fp, K):
    # All per-layer (1, width) rows, concatenated along lanes.
    return _layout([
        ("f1_ln_g", Dp), ("f1_ln_b", Dp), ("f1_b1", Fp), ("f1_b2", Dp),
        ("a_ln_g", Dp), ("a_ln_b", Dp), ("a_qkv_b", 3 * Dp), ("a_out_b", Dp),
        ("c_ln_g", Dp), ("c_ln_b", Dp), ("c_pw1_b", 2 * Dp), ("c_dw_b", Dp),
        ("c_bn_g", Dp), ("c_bn_b", Dp), ("c_pw2_b", Dp),
        ("f2_ln_g", Dp), ("f2_ln_b", Dp), ("f2_b1", Fp), ("f2_b2", Dp),
        ("fin_ln_g", Dp), ("fin_ln_b", Dp),
        ("dw_w", K * Dp),
    ])


# ---------------------------------------------------------------------------
# The fused kernel: frontend at l==0, Conformer layer l every step.
# grid = (B, L); activation carried in the revisited output block c_ref.
# ---------------------------------------------------------------------------
def _wav2vec_kernel(x_ref, keep_ref, tmask_ref, kbias_ref, hmask_ref,
                    fe_mat_ref, fe_vec_ref, lmat_ref, lmat2_ref, lvec_ref,
                    c_ref, xt_ref, *,
                    T, D, Dp, Cp, Fp, H, K, pad, scale,
                    mat_off, mat2_off, vec_off):
    l = pl.program_id(1)

    lane = lax.broadcasted_iota(jnp.int32, (1, Dp), 1)
    lane_valid = (lane < D).astype(jnp.float32)
    inv_d = 1.0 / D

    def shift_rows(v, off):
        # v'[t] = v[t + off].  T >= T_valid + pad, and the alignment-padding
        # rows of v are zero, so wrapped rows reproduce 'same' zero padding
        # exactly.  XLU sublane rotate - no (T,T) matmul.
        if off == 0:
            return v
        return pltpu.roll(v, shift=(-off) % T, axis=0)

    def mat(name):
        o, w = mat_off[name]
        return lmat_ref[:, o:o + w]

    def mat2(name):
        o, w = mat2_off[name]
        return lmat2_ref[:, o:o + w]

    def vec(name):
        o, w = vec_off[name]
        return lvec_ref[:, o:o + w]

    def dot(a, b):
        return jnp.dot(a, b, preferred_element_type=jnp.float32)

    def layernorm(v, g, b):
        # statistics over the true D lanes only (padded lanes of v are zero)
        mu = jnp.sum(v, axis=-1, keepdims=True) * inv_d
        d = (v - mu) * lane_valid
        var = jnp.sum(d * d, axis=-1, keepdims=True) * inv_d
        return d * lax.rsqrt(var + 1e-5) * g + b

    def silu(v):
        return v * jax.nn.sigmoid(v)

    # -------- frontend: subsample conv -> mask -> linear / target ----------
    @pl.when(l == 0)
    def _():
        x_in = x_ref[...]                                   # (T, Cp), zero pad
        acc = jnp.zeros((T, Dp), jnp.float32)
        for kk in range(K):
            acc = acc + dot(shift_rows(x_in, kk - pad),
                            fe_mat_ref[kk * Cp:(kk + 1) * Cp, :])
        xconv = acc + fe_vec_ref[:, 0:Dp]
        # target encoder on the UNmasked conv output
        xt_ref[...] = dot(xconv, fe_mat_ref[K * Cp + Dp:K * Cp + 2 * Dp, :]) \
            + fe_vec_ref[:, 2 * Dp:3 * Dp]
        # random time-step masking (shared 0/1 keep vector), then linear_layer
        c_ref[...] = dot(xconv * keep_ref[...],
                         fe_mat_ref[K * Cp:K * Cp + Dp, :]) \
            + fe_vec_ref[:, Dp:2 * Dp]

    # ------------------------ Conformer layer l ----------------------------
    x = c_ref[...]                                          # carried activation

    def ffn(v, pre):
        h = layernorm(v, vec(pre + "_ln_g"), vec(pre + "_ln_b"))
        h = silu(dot(h, mat(pre + "_w1")) + vec(pre + "_b1"))
        return dot(h, mat2(pre + "_w2")) + vec(pre + "_b2")

    # FFN 1 (half-step residual)
    x = x + 0.5 * ffn(x, "f1")

    # MHSA: all heads in ONE score matmul / ONE softmax / ONE value matmul.
    y = layernorm(x, vec("a_ln_g"), vec("a_ln_b"))
    qkv = dot(y, mat("a_qkv_w")) + vec("a_qkv_b")           # (T, 3*Dp)
    q = qkv[:, 0:Dp] * scale
    k = qkv[:, Dp:2 * Dp]
    v = qkv[:, 2 * Dp:3 * Dp]
    hmask = hmask_ref[...]                                  # (H*T, Dp) head lanes
    qs = jnp.concatenate([q] * H, axis=0) * hmask           # head-masked q rows
    s = lax.dot_general(qs, k, (((1,), (1,)), ((), ())),
                        preferred_element_type=jnp.float32)  # (H*T, T)
    s = s + kbias_ref[...]                                  # key padding bias
    m = jnp.max(s, axis=-1, keepdims=True)
    p = jnp.exp(s - m)
    p = p / jnp.sum(p, axis=-1, keepdims=True)              # exact softmax
    pv = dot(p, v) * hmask                                  # (H*T, Dp)
    o = pv[0:T, :]
    for h in range(1, H):
        o = o + pv[h * T:(h + 1) * T, :]                    # lane-disjoint heads
    x = x + dot(o, mat("a_out_w")) + vec("a_out_b")

    # Convolution module
    y = layernorm(x, vec("c_ln_g"), vec("c_ln_b"))
    ag = dot(y, mat("c_pw1_w")) + vec("c_pw1_b")            # (T, 2*Dp)
    y = ag[:, 0:Dp] * jax.nn.sigmoid(ag[:, Dp:2 * Dp])      # GLU (lane-aligned)
    y = y * tmask_ref[...]                                  # zero alignment rows
    dw_o, _ = vec_off["dw_w"]
    acc = jnp.zeros((T, Dp), jnp.float32)
    for kk in range(K):                                     # depthwise conv
        acc = acc + shift_rows(y, kk - pad) * \
            lvec_ref[:, dw_o + kk * Dp:dw_o + (kk + 1) * Dp]
    y = acc + vec("c_dw_b")
    # BatchNorm1d (eval, fresh-module running stats mean=0 / var=1) + SiLU
    y = y * (1.0 / math.sqrt(1.0 + 1e-5)) * vec("c_bn_g") + vec("c_bn_b")
    y = silu(y)
    y = dot(y, mat("c_pw2_w")) + vec("c_pw2_b")
    x = x + y

    # FFN 2 (half-step residual) + final LayerNorm
    x = x + 0.5 * ffn(x, "f2")
    x = layernorm(x, vec("fin_ln_g"), vec("fin_ln_b"))
    c_ref[...] = x


def _fused_pallas_call(cfg, x_p, keep, tmask, kbias, hmask,
                       fe_mat, fe_vec, lmat, lmat2, lvec):
    (B, T_pad, D, Dp, Cp, Fp, H, K, L) = cfg
    mat_off, _ = _mat_layout(Dp, Fp)
    mat2_off, _ = _mat2_layout(Dp)
    vec_off, _ = _vec_layout(Dp, Fp, K)

    def bspec(shape):                 # batch-indexed, leading dim squeezed
        nd = len(shape)
        return pl.BlockSpec((None,) + tuple(int(s) for s in shape[1:]),
                            lambda b, l, _nd=nd: (b,) + (0,) * (_nd - 1))

    def lspec(shape):                 # layer-indexed, leading dim squeezed
        nd = len(shape)
        return pl.BlockSpec((None,) + tuple(int(s) for s in shape[1:]),
                            lambda b, l, _nd=nd: (l,) + (0,) * (_nd - 1))

    def cspec(shape):                 # constant (whole array every step)
        nd = len(shape)
        return pl.BlockSpec(tuple(int(s) for s in shape),
                            lambda b, l, _nd=nd: (0,) * _nd)

    kernel = functools.partial(
        _wav2vec_kernel, T=T_pad, D=D, Dp=Dp, Cp=Cp, Fp=Fp, H=H, K=K,
        pad=K // 2, scale=1.0 / math.sqrt(D // H),
        mat_off=mat_off, mat2_off=mat2_off, vec_off=vec_off)

    return pl.pallas_call(
        kernel,
        grid=(B, L),
        in_specs=[bspec(x_p.shape), cspec(keep.shape), cspec(tmask.shape),
                  bspec(kbias.shape), cspec(hmask.shape),
                  cspec(fe_mat.shape), cspec(fe_vec.shape),
                  lspec(lmat.shape), lspec(lmat2.shape), lspec(lvec.shape)],
        out_specs=(bspec((B, T_pad, Dp)), bspec((B, T_pad, Dp))),
        out_shape=(jax.ShapeDtypeStruct((B, T_pad, Dp), jnp.float32),
                   jax.ShapeDtypeStruct((B, T_pad, Dp), jnp.float32)),
        compiler_params=pltpu.CompilerParams(
            dimension_semantics=("parallel", "arbitrary"),
            vmem_limit_bytes=32 * 1024 * 1024),
    )(x_p, keep, tmask, kbias, hmask, fe_mat, fe_vec, lmat, lmat2, lvec)


@functools.partial(jax.jit, static_argnums=0)
def _forward_impl(cfg, fe_mat, fe_vec, lmat, lmat2, lvec,
                  x, keep, tmask, kbias, hmask, midx, didx):
    (B, T_pad, D, Dp, Cp, Fp, H, K, L) = cfg
    T_max, Cin = x.shape[1], x.shape[2]
    x_p = jnp.pad(x.astype(jnp.float32),
                  ((0, 0), (0, T_pad - T_max), (0, Cp - Cin)))
    c, xt = _fused_pallas_call(cfg, x_p, keep, tmask, kbias, hmask,
                               fe_mat, fe_vec, lmat, lmat2, lvec)
    c_sel = jnp.take(c, midx, axis=1)[:, :, :D]
    y_t = jnp.take(xt, midx, axis=1)[:, :, :D]
    y_d = jnp.take(xt, didx, axis=1)[:, :, :D]
    return c_sel, y_t, y_d


# ---------------------------------------------------------------------------
# Synthetic parameter init (true sizes) + one-time host-side packing.
# ---------------------------------------------------------------------------
def init_wav2vec_params(key, input_dim, embed_dim, ffn_dim, K, num_heads,
                        num_layers):
    keys = iter(jax.random.split(key, 512))

    def w(shape, scale=0.05):
        return scale * jax.random.normal(next(keys), shape, dtype=jnp.float32)

    def zeros(shape):
        return jnp.zeros(shape, jnp.float32)

    def ones(shape):
        return jnp.ones(shape, jnp.float32)

    D = embed_dim

    def ffn_params():
        return dict(ln_g=ones((D,)), ln_b=zeros((D,)),
                    w1=w((D, ffn_dim)), b1=w((ffn_dim,)),
                    w2=w((ffn_dim, D)), b2=w((D,)))

    params = {
        "sub_w": w((K, input_dim, D)), "sub_b": w((D,)),
        "lin_w": w((D, D)), "lin_b": w((D,)),
        "tgt_w": w((D, D)), "tgt_b": w((D,)),
        "layers": [],
    }
    for _ in range(num_layers):
        params["layers"].append(dict(
            ffn1=ffn_params(),
            attn_ln_g=ones((D,)), attn_ln_b=zeros((D,)),
            attn_in_w=w((D, 3 * D)), attn_in_b=w((3 * D,)),
            attn_out_w=w((D, D)), attn_out_b=w((D,)),
            conv=dict(ln_g=ones((D,)), ln_b=zeros((D,)),
                      pw1_w=w((D, 2 * D)), pw1_b=w((2 * D,)),
                      dw_w=w((K, D)), dw_b=w((D,)),
                      bn_g=ones((D,)), bn_b=zeros((D,)),
                      pw2_w=w((D, D)), pw2_b=w((D,))),
            ffn2=ffn_params(),
            final_ln_g=ones((D,)), final_ln_b=zeros((D,)),
        ))
    return params


def pack_wav2vec_params(params, input_dim, K, num_heads):
    """One-time host-side (numpy) padding/packing of all weights."""
    D = int(params["sub_b"].shape[0])
    F = int(params["layers"][0]["ffn1"]["b1"].shape[0])
    L = len(params["layers"])
    Cp, Dp, Fp = _rup(input_dim, LANE), _rup(D, LANE), _rup(F, LANE)

    mat_off, MC = _mat_layout(Dp, Fp)
    mat2_off, MC2 = _mat2_layout(Dp)
    vec_off, VC = _vec_layout(Dp, Fp, K)

    # frontend slab: [sub_w[0..K-1] ; lin_w ; tgt_w] stacked along rows
    fe_mat = np.zeros((K * Cp + 2 * Dp, Dp), np.float32)
    sub_w = np.asarray(params["sub_w"])                     # (K, Cin, D)
    for kk in range(K):
        fe_mat[kk * Cp:kk * Cp + input_dim, :D] = sub_w[kk]
    fe_mat[K * Cp:K * Cp + D, :D] = np.asarray(params["lin_w"])
    fe_mat[K * Cp + Dp:K * Cp + Dp + D, :D] = np.asarray(params["tgt_w"])
    fe_vec = np.zeros((1, 3 * Dp), np.float32)
    fe_vec[0, :D] = np.asarray(params["sub_b"])
    fe_vec[0, Dp:Dp + D] = np.asarray(params["lin_b"])
    fe_vec[0, 2 * Dp:2 * Dp + D] = np.asarray(params["tgt_b"])

    lmat = np.zeros((L, Dp, MC), np.float32)
    lmat2 = np.zeros((L, Fp, MC2), np.float32)
    lvec = np.zeros((L, 1, VC), np.float32)

    def put(arr, li, offmap, name, w):
        o, _ = offmap[name]
        w = np.asarray(w)
        arr[li, :w.shape[0], o:o + w.shape[1]] = w

    def put_seg(arr, li, offmap, name, w, seg_true, seg_pad, nseg):
        o, _ = offmap[name]
        w = np.asarray(w)
        for s in range(nseg):
            arr[li, :w.shape[0], o + s * seg_pad:o + s * seg_pad + seg_true] = \
                w[:, s * seg_true:(s + 1) * seg_true]

    def put_vec(li, name, v):
        o, _ = vec_off[name]
        v = np.asarray(v)
        lvec[li, 0, o:o + v.shape[0]] = v

    def put_seg_vec(li, name, v, seg_true, seg_pad, nseg):
        o, _ = vec_off[name]
        v = np.asarray(v)
        for s in range(nseg):
            lvec[li, 0, o + s * seg_pad:o + s * seg_pad + seg_true] = \
                v[s * seg_true:(s + 1) * seg_true]

    for li, lp in enumerate(params["layers"]):
        f1, f2, cv = lp["ffn1"], lp["ffn2"], lp["conv"]
        put(lmat, li, mat_off, "f1_w1", f1["w1"])
        put_seg(lmat, li, mat_off, "a_qkv_w", lp["attn_in_w"], D, Dp, 3)
        put(lmat, li, mat_off, "a_out_w", lp["attn_out_w"])
        put_seg(lmat, li, mat_off, "c_pw1_w", cv["pw1_w"], D, Dp, 2)
        put(lmat, li, mat_off, "c_pw2_w", cv["pw2_w"])
        put(lmat, li, mat_off, "f2_w1", f2["w1"])
        put(lmat2, li, mat2_off, "f1_w2", f1["w2"])
        put(lmat2, li, mat2_off, "f2_w2", f2["w2"])

        put_vec(li, "f1_ln_g", f1["ln_g"]); put_vec(li, "f1_ln_b", f1["ln_b"])
        put_vec(li, "f1_b1", f1["b1"]);     put_vec(li, "f1_b2", f1["b2"])
        put_vec(li, "a_ln_g", lp["attn_ln_g"])
        put_vec(li, "a_ln_b", lp["attn_ln_b"])
        put_seg_vec(li, "a_qkv_b", lp["attn_in_b"], D, Dp, 3)
        put_vec(li, "a_out_b", lp["attn_out_b"])
        put_vec(li, "c_ln_g", cv["ln_g"]); put_vec(li, "c_ln_b", cv["ln_b"])
        put_seg_vec(li, "c_pw1_b", cv["pw1_b"], D, Dp, 2)
        put_vec(li, "c_dw_b", cv["dw_b"])
        put_vec(li, "c_bn_g", cv["bn_g"]); put_vec(li, "c_bn_b", cv["bn_b"])
        put_vec(li, "c_pw2_b", cv["pw2_b"])
        put_vec(li, "f2_ln_g", f2["ln_g"]); put_vec(li, "f2_ln_b", f2["ln_b"])
        put_vec(li, "f2_b1", f2["b1"]);     put_vec(li, "f2_b2", f2["b2"])
        put_vec(li, "fin_ln_g", lp["final_ln_g"])
        put_vec(li, "fin_ln_b", lp["final_ln_b"])
        o_dw, _ = vec_off["dw_w"]
        dw = np.asarray(cv["dw_w"])                         # (K, D)
        for kk in range(K):
            lvec[li, 0, o_dw + kk * Dp:o_dw + kk * Dp + D] = dw[kk]

    return dict(
        fe_mat=jnp.asarray(fe_mat), fe_vec=jnp.asarray(fe_vec),
        lmat=jnp.asarray(lmat), lmat2=jnp.asarray(lmat2),
        lvec=jnp.asarray(lvec),
        dims=dict(Cin=input_dim, D=D, F=F, Cp=Cp, Dp=Dp, Fp=Fp, K=K, L=L,
                  H=num_heads))


# ---------------------------------------------------------------------------
# Wav2Vec forward (host glue + jitted fused kernel)
# ---------------------------------------------------------------------------
def wav2vec_forward(packed, x, lengths, *, mask_ratio=0.2,
                    distraction_ratio=0.2, seed=0):
    d = packed["dims"]
    D, Dp, Cp, Fp = d["D"], d["Dp"], d["Cp"], d["Fp"]
    K, L, H = d["K"], d["L"], d["H"]
    pad = K // 2
    hd = D // H

    lengths_np = np.asarray(lengths)
    T_max = int(lengths_np.max())
    B = x.shape[0]
    x = x[:, :T_max, :]                        # x[:, :max(key_padding_masks), :]
    # >= pad zero alignment rows after T_max so 'roll'-based convs see exact
    # zero 'same' padding; also a multiple of 8 sublanes.
    T_pad = _rup(T_max + pad, SUBLANE)

    # TODO(synk): torch.randperm has no in-kernel equivalent; mask/distraction
    # indices are reproduced deterministically host-side with numpy.
    rng = np.random.RandomState(seed)
    num_masked = int(mask_ratio * T_max)
    masked_indices = rng.permutation(T_max)[:num_masked].astype(np.int32)
    keep = np.ones((T_pad, 1), np.float32)
    keep[masked_indices, 0] = 0.0

    # valid-time rows (alignment padding excluded)
    tmask = (np.arange(T_pad) < T_max).astype(np.float32).reshape(T_pad, 1)

    # additive key-padding bias (finite large-negative avoids -inf NaN risk)
    kbias = np.where(np.arange(T_pad)[None, :] >= lengths_np[:, None],
                     -1e9, 0.0).astype(np.float32).reshape(B, 1, T_pad)

    # per-head lane mask for the stacked-head attention
    hmask = np.zeros((H * T_pad, Dp), np.float32)
    for h in range(H):
        hmask[h * T_pad:(h + 1) * T_pad, h * hd:(h + 1) * hd] = 1.0

    num_d = int(distraction_ratio * T_max)
    dmask = np.ones(T_max, dtype=bool)
    dmask[rng.permutation(T_max)[:num_d]] = False
    dmask[masked_indices] = True
    distract_idx = np.nonzero(~dmask)[0].astype(np.int32)

    cfg = (B, T_pad, D, Dp, Cp, Fp, H, K, L)
    return _forward_impl(cfg, packed["fe_mat"], packed["fe_vec"],
                         packed["lmat"], packed["lmat2"], packed["lvec"],
                         jnp.asarray(x, jnp.float32),
                         jnp.asarray(keep), jnp.asarray(tmask),
                         jnp.asarray(kbias), jnp.asarray(hmask),
                         jnp.asarray(masked_indices),
                         jnp.asarray(distract_idx))


# ---------------------------------------------------------------------------
if __name__ == "__main__":
    input_dim, embed_dim, ffn_dim = 8, 32, 64
    depthwise_conv_kernel_size, num_heads, num_conformers = 3, 4, 2
    B, T_in = 2, 20

    key = jax.random.PRNGKey(0)
    pkey, xkey = jax.random.split(key)
    params = init_wav2vec_params(pkey, input_dim, embed_dim, ffn_dim,
                                 depthwise_conv_kernel_size, num_heads,
                                 num_conformers)
    packed = pack_wav2vec_params(params, input_dim,
                                 depthwise_conv_kernel_size, num_heads)

    x = jax.random.normal(xkey, (B, T_in, input_dim), dtype=jnp.float32)
    key_padding_masks = jnp.array([16, 12], dtype=jnp.int32)  # sequence lengths

    c, y_t, y_d = wav2vec_forward(packed, x, key_padding_masks,
                                  mask_ratio=0.2, distraction_ratio=0.2,
                                  seed=0)
    jax.block_until_ready((c, y_t, y_d))
    print("KERNEL_OK")
</pallas_src>

<mosaic_0001>
module attributes {stable_mosaic.version = 11 : i64} {
  func.func @_wav2vec_kernel(%arg0: i32, %arg1: i32, %arg2: memref<1x24x128xf32, #tpu.memory_space<vmem>>, %arg3: memref<24x1xf32, #tpu.memory_space<vmem>>, %arg4: memref<24x1xf32, #tpu.memory_space<vmem>>, %arg5: memref<1x1x24xf32, #tpu.memory_space<vmem>>, %arg6: memref<96x128xf32, #tpu.memory_space<vmem>>, %arg7: memref<640x128xf32, #tpu.memory_space<vmem>>, %arg8: memref<1x384xf32, #tpu.memory_space<vmem>>, %arg9: memref<1x128x1152xf32, #tpu.memory_space<vmem>>, %arg10: memref<1x128x256xf32, #tpu.memory_space<vmem>>, %arg11: memref<1x1x3456xf32, #tpu.memory_space<vmem>>, %arg12: memref<1x24x128xf32, #tpu.memory_space<vmem>>, %arg13: memref<1x24x128xf32, #tpu.memory_space<vmem>>) attributes {dimension_semantics = [#tpu.dimension_semantics<parallel>, #tpu.dimension_semantics<arbitrary>], iteration_bounds = array<i64: 2, 2>, scalar_prefetch = 0 : i64, scratch_operands = 0 : i64, tpu.core_type = #tpu.core_type<tc>, window_params = [{transform_indices = @transform_0, window_bounds = array<i64: 1, 24, 128>}, {pipeline_mode = #tpu.pipeline_mode<synchronous>, transform_indices = @transform_1, window_bounds = array<i64: 24, 1>}, {pipeline_mode = #tpu.pipeline_mode<synchronous>, transform_indices = @transform_2, window_bounds = array<i64: 24, 1>}, {transform_indices = @transform_3, window_bounds = array<i64: 1, 1, 24>}, {pipeline_mode = #tpu.pipeline_mode<synchronous>, transform_indices = @transform_4, window_bounds = array<i64: 96, 128>}, {pipeline_mode = #tpu.pipeline_mode<synchronous>, transform_indices = @transform_5, window_bounds = array<i64: 640, 128>}, {pipeline_mode = #tpu.pipeline_mode<synchronous>, transform_indices = @transform_6, window_bounds = array<i64: 1, 384>}, {transform_indices = @transform_7, window_bounds = array<i64: 1, 128, 1152>}, {transform_indices = @transform_8, window_bounds = array<i64: 1, 128, 256>}, {transform_indices = @transform_9, window_bounds = array<i64: 1, 1, 3456>}, {transform_indices = @transform_10, window_bounds = array<i64: 1, 24, 128>}, {transform_indices = @transform_11, window_bounds = array<i64: 1, 24, 128>}]} {
    %0 = tpu.iota {dimensions = array<i32: 1>} : vector<1x128xi32>
    %c32_i32 = arith.constant 32 : i32
    %1 = vector.broadcast %c32_i32 : i32 to vector<1x128xi32>
    %2 = arith.cmpi slt, %0, %1 : vector<1x128xi32>
    %3 = arith.extui %2 : vector<1x128xi1> to vector<1x128xi32>
    %4 = arith.sitofp %3 : vector<1x128xi32> to vector<1x128xf32>
    %c0_i32 = arith.constant 0 : i32
    %5 = arith.cmpi eq, %arg1, %c0_i32 : i32
    %6 = arith.extui %5 : i1 to i32
    %c0_i32_0 = arith.constant 0 : i32
    %7 = arith.cmpi ne, %6, %c0_i32_0 : i32
    scf.if %7 {
      %c0_129 = arith.constant 0 : index
      %c0_130 = arith.constant 0 : index
      %c0_131 = arith.constant 0 : index
      %299 = vector.load %arg2[%c0_129, %c0_130, %c0_131] : memref<1x24x128xf32, #tpu.memory_space<vmem>>, vector<1x24x128xf32>
      %300 = vector.shape_cast %299 : vector<1x24x128xf32> to vector<24x128xf32>
      %cst_132 = arith.constant 0.000000e+00 : f32
      %301 = vector.broadcast %cst_132 : f32 to vector<24x128xf32>
      %c1_i32_133 = arith.constant 1 : i32
      %302 = tpu.dynamic_rotate %300 by %c1_i32_133 dim 0 : vector<24x128xf32>, i32 -> vector<24x128xf32>
      %c0_134 = arith.constant 0 : index
      %c0_135 = arith.constant 0 : index
      %303 = vector.load %arg7[%c0_134, %c0_135] : memref<640x128xf32, #tpu.memory_space<vmem>>, vector<128x128xf32>
      %cst_136 = arith.constant dense<0.000000e+00> : vector<24x128xf32>
      %304 = tpu.matmul %302, %303, %cst_136 {dimension_numbers = #tpu.dot_dimension_numbers<[1], [0], [0], [1], [0, 0, 1, 1], [], []>} : vector<24x128xf32>, vector<128x128xf32>, vector<24x128xf32> -> vector<24x128xf32>
      %305 = arith.addf %301, %304 : vector<24x128xf32>
      %c128_137 = arith.constant 128 : index
      %c0_138 = arith.constant 0 : index
      %306 = vector.load %arg7[%c128_137, %c0_138] : memref<640x128xf32, #tpu.memory_space<vmem>>, vector<128x128xf32>
      %cst_139 = arith.constant dense<0.000000e+00> : vector<24x128xf32>
      %307 = tpu.matmul %300, %306, %cst_139 {dimension_numbers = #tpu.dot_dimension_numbers<[1], [0], [0], [1], [0, 0, 1, 1], [], []>} : vector<24x128xf32>, vector<128x128xf32>, vector<24x128xf32> -> vector<24x128xf32>
      %308 = arith.addf %305, %307 : vector<24x128xf32>
      %c23_i32_140 = arith.constant 23 : i32
      %309 = tpu.dynamic_rotate %300 by %c23_i32_140 dim 0 : vector<24x128xf32>, i32 -> vector<24x128xf32>
      %c256_141 = arith.constant 256 : index
      %c0_142 = arith.constant 0 : index
      %310 = vector.load %arg7[%c256_141, %c0_142] : memref<640x128xf32, #tpu.memory_space<vmem>>, vector<128x128xf32>
      %cst_143 = arith.constant dense<0.000000e+00> : vector<24x128xf32>
      %311 = tpu.matmul %309, %310, %cst_143 {dimension_numbers = #tpu.dot_dimension_numbers<[1], [0], [0], [1], [0, 0, 1, 1], [], []>} : vector<24x128xf32>, vector<128x128xf32>, vector<24x128xf32> -> vector<24x128xf32>
      %312 = arith.addf %308, %311 : vector<24x128xf32>
      %c0_144 = arith.constant 0 : index
      %c0_145 = arith.constant 0 : index
      %313 = vector.load %arg8[%c0_144, %c0_145] : memref<1x384xf32, #tpu.memory_space<vmem>>, vector<1x128xf32>
      %314 = vector.broadcast %313 : vector<1x128xf32> to vector<24x128xf32>
      %315 = arith.addf %312, %314 : vector<24x128xf32>
      %c512_146 = arith.constant 512 : index
      %c0_147 = arith.constant 0 : index
      %316 = vector.load %arg7[%c512_146, %c0_147] : memref<640x128xf32, #tpu.memory_space<vmem>>, vector<128x128xf32>
      %cst_148 = arith.constant dense<0.000000e+00> : vector<24x128xf32>
      %317 = tpu.matmul %315, %316, %cst_148 {dimension_numbers = #tpu.dot_dimension_numbers<[1], [0], [0], [1], [0, 0, 1, 1], [], []>} : vector<24x128xf32>, vector<128x128xf32>, vector<24x128xf32> -> vector<24x128xf32>
      %c0_149 = arith.constant 0 : index
      %c256_150 = arith.constant 256 : index
      %318 = vector.load %arg8[%c0_149, %c256_150] : memref<1x384xf32, #tpu.memory_space<vmem>>, vector<1x128xf32>
      %319 = vector.broadcast %318 : vector<1x128xf32> to vector<24x128xf32>
      %320 = arith.addf %317, %319 : vector<24x128xf32>
      %c0_151 = arith.constant 0 : index
      %c0_152 = arith.constant 0 : index
      %c0_153 = arith.constant 0 : index
      %321 = vector.load %arg13[%c0_151, %c0_152, %c0_153] : memref<1x24x128xf32, #tpu.memory_space<vmem>>, vector<1x24x128xf32>
      %322 = vector.shape_cast %321 : vector<1x24x128xf32> to vector<24x128xf32>
      %323 = vector.shape_cast %320 : vector<24x128xf32> to vector<1x24x128xf32>
      tpu.vector_store %arg13[%c0_151, %c0_152, %c0_153], %323 {strides = array<i32>} : memref<1x24x128xf32, #tpu.memory_space<vmem>>, vector<1x24x128xf32>,
      %c0_154 = arith.constant 0 : index
      %c0_155 = arith.constant 0 : index
      %324 = vector.load %arg3[%c0_154, %c0_155] : memref<24x1xf32, #tpu.memory_space<vmem>>, vector<24x1xf32>
      %325 = vector.broadcast %324 : vector<24x1xf32> to vector<24x128xf32>
      %326 = arith.mulf %315, %325 : vector<24x128xf32>
      %c384_156 = arith.constant 384 : index
      %c0_157 = arith.constant 0 : index
      %327 = vector.load %arg7[%c384_156, %c0_157] : memref<640x128xf32, #tpu.memory_space<vmem>>, vector<128x128xf32>
      %cst_158 = arith.constant dense<0.000000e+00> : vector<24x128xf32>
      %328 = tpu.matmul %326, %327, %cst_158 {dimension_numbers = #tpu.dot_dimension_numbers<[1], [0], [0], [1], [0, 0, 1, 1], [], []>} : vector<24x128xf32>, vector<128x128xf32>, vector<24x128xf32> -> vector<24x128xf32>
      %c0_159 = arith.constant 0 : index
      %c128_160 = arith.constant 128 : index
      %329 = vector.load %arg8[%c0_159, %c128_160] : memref<1x384xf32, #tpu.memory_space<vmem>>, vector<1x128xf32>
      %330 = vector.broadcast %329 : vector<1x128xf32> to vector<24x128xf32>
      %331 = arith.addf %328, %330 : vector<24x128xf32>
      %c0_161 = arith.constant 0 : index
      %c0_162 = arith.constant 0 : index
      %c0_163 = arith.constant 0 : index
      %332 = vector.load %arg12[%c0_161, %c0_162, %c0_163] : memref<1x24x128xf32, #tpu.memory_space<vmem>>, vector<1x24x128xf32>
      %333 = vector.shape_cast %332 : vector<1x24x128xf32> to vector<24x128xf32>
      %334 = vector.shape_cast %331 : vector<24x128xf32> to vector<1x24x128xf32>
      tpu.vector_store %arg12[%c0_161, %c0_162, %c0_163], %334 {strides = array<i32>} : memref<1x24x128xf32, #tpu.memory_space<vmem>>, vector<1x24x128xf32>,
    } else {
    }
    %c0 = arith.constant 0 : index
    %c0_1 = arith.constant 0 : index
    %c0_2 = arith.constant 0 : index
    %8 = vector.load %arg12[%c0, %c0_1, %c0_2] : memref<1x24x128xf32, #tpu.memory_space<vmem>>, vector<1x24x128xf32>
    %9 = vector.shape_cast %8 : vector<1x24x128xf32> to vector<24x128xf32>
    %c0_3 = arith.constant 0 : index
    %c0_4 = arith.constant 0 : index
    %c0_5 = arith.constant 0 : index
    %10 = vector.load %arg11[%c0_3, %c0_4, %c0_5] : memref<1x1x3456xf32, #tpu.memory_space<vmem>>, vector<1x1x128xf32>
    %11 = vector.shape_cast %10 : vector<1x1x128xf32> to vector<1x128xf32>
    %c0_6 = arith.constant 0 : index
    %c0_7 = arith.constant 0 : index
    %c128 = arith.constant 128 : index
    %12 = vector.load %arg11[%c0_6, %c0_7, %c128] : memref<1x1x3456xf32, #tpu.memory_space<vmem>>, vector<1x1x128xf32>
    %13 = vector.shape_cast %12 : vector<1x1x128xf32> to vector<1x128xf32>
    %cst = arith.constant dense<0.000000e+00> : vector<24xf32>
    %14 = vector.multi_reduction <add>, %9, %cst [1] : vector<24x128xf32> to vector<24xf32>
    %15 = vector.shape_cast %14 : vector<24xf32> to vector<24x1xf32>
    %cst_8 = arith.constant 3.125000e-02 : f32
    %16 = vector.broadcast %cst_8 : f32 to vector<24x1xf32>
    %17 = arith.mulf %15, %16 : vector<24x1xf32>
    %18 = vector.broadcast %17 : vector<24x1xf32> to vector<24x128xf32>
    %19 = arith.subf %9, %18 : vector<24x128xf32>
    %20 = vector.broadcast %4 : vector<1x128xf32> to vector<24x128xf32>
    %21 = arith.mulf %19, %20 : vector<24x128xf32>
    %22 = arith.mulf %21, %21 : vector<24x128xf32>
    %cst_9 = arith.constant dense<0.000000e+00> : vector<24xf32>
    %23 = vector.multi_reduction <add>, %22, %cst_9 [1] : vector<24x128xf32> to vector<24xf32>
    %24 = vector.shape_cast %23 : vector<24xf32> to vector<24x1xf32>
    %cst_10 = arith.constant 3.125000e-02 : f32
    %25 = vector.broadcast %cst_10 : f32 to vector<24x1xf32>
    %26 = arith.mulf %24, %25 : vector<24x1xf32>
    %cst_11 = arith.constant 9.99999974E-6 : f32
    %27 = vector.broadcast %cst_11 : f32 to vector<24x1xf32>
    %28 = arith.addf %26, %27 : vector<24x1xf32>
    %29 = math.rsqrt %28 : vector<24x1xf32>
    %30 = vector.broadcast %29 : vector<24x1xf32> to vector<24x128xf32>
    %31 = arith.mulf %21, %30 : vector<24x128xf32>
    %32 = vector.broadcast %11 : vector<1x128xf32> to vector<24x128xf32>
    %33 = arith.mulf %31, %32 : vector<24x128xf32>
    %34 = vector.broadcast %13 : vector<1x128xf32> to vector<24x128xf32>
    %35 = arith.addf %33, %34 : vector<24x128xf32>
    %c0_12 = arith.constant 0 : index
    %c0_13 = arith.constant 0 : index
    %c0_14 = arith.constant 0 : index
    %36 = vector.load %arg9[%c0_12, %c0_13, %c0_14] : memref<1x128x1152xf32, #tpu.memory_space<vmem>>, vector<1x128x128xf32>
    %37 = vector.shape_cast %36 : vector<1x128x128xf32> to vector<128x128xf32>
    %cst_15 = arith.constant dense<0.000000e+00> : vector<24x128xf32>
    %38 = tpu.matmul %35, %37, %cst_15 {dimension_numbers = #tpu.dot_dimension_numbers<[1], [0], [0], [1], [0, 0, 1, 1], [], []>} : vector<24x128xf32>, vector<128x128xf32>, vector<24x128xf32> -> vector<24x128xf32>
    %c0_16 = arith.constant 0 : index
    %c0_17 = arith.constant 0 : index
    %c256 = arith.constant 256 : index
    %39 = vector.load %arg11[%c0_16, %c0_17, %c256] : memref<1x1x3456xf32, #tpu.memory_space<vmem>>, vector<1x1x128xf32>
    %40 = vector.shape_cast %39 : vector<1x1x128xf32> to vector<1x128xf32>
    %41 = vector.broadcast %40 : vector<1x128xf32> to vector<24x128xf32>
    %42 = arith.addf %38, %41 : vector<24x128xf32>
    %43 = arith.negf %42 : vector<24x128xf32>
    %44 = math.exp %43 : vector<24x128xf32>
    %cst_18 = arith.constant 1.000000e+00 : f32
    %45 = vector.broadcast %cst_18 : f32 to vector<24x128xf32>
    %46 = arith.addf %45, %44 : vector<24x128xf32>
    %47 = arith.divf %45, %46 : vector<24x128xf32>
    %48 = arith.mulf %42, %47 : vector<24x128xf32>
    %c0_19 = arith.constant 0 : index
    %c0_20 = arith.constant 0 : index
    %c0_21 = arith.constant 0 : index
    %49 = vector.load %arg10[%c0_19, %c0_20, %c0_21] : memref<1x128x256xf32, #tpu.memory_space<vmem>>, vector<1x128x128xf32>
    %50 = vector.shape_cast %49 : vector<1x128x128xf32> to vector<128x128xf32>
    %cst_22 = arith.constant dense<0.000000e+00> : vector<24x128xf32>
    %51 = tpu.matmul %48, %50, %cst_22 {dimension_numbers = #tpu.dot_dimension_numbers<[1], [0], [0], [1], [0, 0, 1, 1], [], []>} : vector<24x128xf32>, vector<128x128xf32>, vector<24x128xf32> -> vector<24x128xf32>
    %c0_23 = arith.constant 0 : index
    %c0_24 = arith.constant 0 : index
    %c384 = arith.constant 384 : index
    %52 = vector.load %arg11[%c0_23, %c0_24, %c384] : memref<1x1x3456xf32, #tpu.memory_space<vmem>>, vector<1x1x128xf32>
    %53 = vector.shape_cast %52 : vector<1x1x128xf32> to vector<1x128xf32>
    %54 = vector.broadcast %53 : vector<1x128xf32> to vector<24x128xf32>
    %55 = arith.addf %51, %54 : vector<24x128xf32>
    %cst_25 = arith.constant 5.000000e-01 : f32
    %56 = vector.broadcast %cst_25 : f32 to vector<24x128xf32>
    %57 = arith.mulf %56, %55 : vector<24x128xf32>
    %58 = arith.addf %9, %57 : vector<24x128xf32>
    %c0_26 = arith.constant 0 : index
    %c0_27 = arith.constant 0 : index
    %c512 = arith.constant 512 : index
    %59 = vector.load %arg11[%c0_26, %c0_27, %c512] : memref<1x1x3456xf32, #tpu.memory_space<vmem>>, vector<1x1x128xf32>
    %60 = vector.shape_cast %59 : vector<1x1x128xf32> to vector<1x128xf32>
    %c0_28 = arith.constant 0 : index
    %c0_29 = arith.constant 0 : index
    %c640 = arith.constant 640 : index
    %61 = vector.load %arg11[%c0_28, %c0_29, %c640] : memref<1x1x3456xf32, #tpu.memory_space<vmem>>, vector<1x1x128xf32>
    %62 = vector.shape_cast %61 : vector<1x1x128xf32> to vector<1x128xf32>
    %cst_30 = arith.constant dense<0.000000e+00> : vector<24xf32>
    %63 = vector.multi_reduction <add>, %58, %cst_30 [1] : vector<24x128xf32> to vector<24xf32>
    %64 = vector.shape_cast %63 : vector<24xf32> to vector<24x1xf32>
    %cst_31 = arith.constant 3.125000e-02 : f32
    %65 = vector.broadcast %cst_31 : f32 to vector<24x1xf32>
    %66 = arith.mulf %64, %65 : vector<24x1xf32>
    %67 = vector.broadcast %66 : vector<24x1xf32> to vector<24x128xf32>
    %68 = arith.subf %58, %67 : vector<24x128xf32>
    %69 = vector.broadcast %4 : vector<1x128xf32> to vector<24x128xf32>
    %70 = arith.mulf %68, %69 : vector<24x128xf32>
    %71 = arith.mulf %70, %70 : vector<24x128xf32>
    %cst_32 = arith.constant dense<0.000000e+00> : vector<24xf32>
    %72 = vector.multi_reduction <add>, %71, %cst_32 [1] : vector<24x128xf32> to vector<24xf32>
    %73 = vector.shape_cast %72 : vector<24xf32> to vector<24x1xf32>
    %cst_33 = arith.constant 3.125000e-02 : f32
    %74 = vector.broadcast %cst_33 : f32 to vector<24x1xf32>
    %75 = arith.mulf %73, %74 : vector<24x1xf32>
    %cst_34 = arith.constant 9.99999974E-6 : f32
    %76 = vector.broadcast %cst_34 : f32 to vector<24x1xf32>
    %77 = arith.addf %75, %76 : vector<24x1xf32>
    %78 = math.rsqrt %77 : vector<24x1xf32>
    %79 = vector.broadcast %78 : vector<24x1xf32> to vector<24x128xf32>
    %80 = arith.mulf %70, %79 : vector<24x128xf32>
    %81 = vector.broadcast %60 : vector<1x128xf32> to vector<24x128xf32>
    %82 = arith.mulf %80, %81 : vector<24x128xf32>
    %83 = vector.broadcast %62 : vector<1x128xf32> to vector<24x128xf32>
    %84 = arith.addf %82, %83 : vector<24x128xf32>
    %c0_35 = arith.constant 0 : index
    %c0_36 = arith.constant 0 : index
    %c128_37 = arith.constant 128 : index
    %85 = vector.load %arg9[%c0_35, %c0_36, %c128_37] : memref<1x128x1152xf32, #tpu.memory_space<vmem>>, vector<1x128x384xf32>
    %86 = vector.shape_cast %85 : vector<1x128x384xf32> to vector<128x384xf32>
    %cst_38 = arith.constant dense<0.000000e+00> : vector<24x384xf32>
    %87 = tpu.matmul %84, %86, %cst_38 {dimension_numbers = #tpu.dot_dimension_numbers<[1], [0], [0], [1], [0, 0, 1, 1], [], []>} : vector<24x128xf32>, vector<128x384xf32>, vector<24x384xf32> -> vector<24x384xf32>
    %c0_39 = arith.constant 0 : index
    %c0_40 = arith.constant 0 : index
    %c768 = arith.constant 768 : index
    %88 = vector.load %arg11[%c0_39, %c0_40, %c768] : memref<1x1x3456xf32, #tpu.memory_space<vmem>>, vector<1x1x384xf32>
    %89 = vector.shape_cast %88 : vector<1x1x384xf32> to vector<1x384xf32>
    %90 = vector.broadcast %89 : vector<1x384xf32> to vector<24x384xf32>
    %91 = arith.addf %87, %90 : vector<24x384xf32>
    %92 = vector.extract_strided_slice %91 {offsets = [0, 0], sizes = [24, 128], strides = [1, 1]} : vector<24x384xf32> to vector<24x128xf32>
    %cst_41 = arith.constant 0.353553385 : f32
    %93 = vector.broadcast %cst_41 : f32 to vector<24x128xf32>
    %94 = arith.mulf %92, %93 : vector<24x128xf32>
    %95 = vector.extract_strided_slice %91 {offsets = [0, 128], sizes = [24, 128], strides = [1, 1]} : vector<24x384xf32> to vector<24x128xf32>
    %96 = vector.extract_strided_slice %91 {offsets = [0, 256], sizes = [24, 128], strides = [1, 1]} : vector<24x384xf32> to vector<24x128xf32>
    %c0_42 = arith.constant 0 : index
    %c0_43 = arith.constant 0 : index
    %97 = vector.load %arg6[%c0_42, %c0_43] : memref<96x128xf32, #tpu.memory_space<vmem>>, vector<96x128xf32>
    %98 = tpu.concatenate %94, %94, %94, %94 in 0 : vector<24x128xf32>, vector<24x128xf32>, vector<24x128xf32>, vector<24x128xf32> -> vector<96x128xf32>
    %99 = arith.mulf %98, %97 : vector<96x128xf32>
    %cst_44 = arith.constant dense<0.000000e+00> : vector<96x24xf32>
    %100 = tpu.matmul %99, %95, %cst_44 {dimension_numbers = #tpu.dot_dimension_numbers<[1], [1], [0], [0], [0, 0, 1, 0], [], []>} : vector<96x128xf32>, vector<24x128xf32>, vector<96x24xf32> -> vector<96x24xf32>
    %c0_45 = arith.constant 0 : index
    %c0_46 = arith.constant 0 : index
    %c0_47 = arith.constant 0 : index
    %101 = vector.load %arg5[%c0_45, %c0_46, %c0_47] : memref<1x1x24xf32, #tpu.memory_space<vmem>>, vector<1x1x24xf32>
    %102 = vector.shape_cast %101 : vector<1x1x24xf32> to vector<1x24xf32>
    %103 = vector.broadcast %102 : vector<1x24xf32> to vector<96x24xf32>
    %104 = arith.addf %100, %103 : vector<96x24xf32>
    %cst_48 = arith.constant dense<0xFF800000> : vector<96xf32>
    %105 = vector.multi_reduction <maximumf>, %104, %cst_48 [1] : vector<96x24xf32> to vector<96xf32>
    %106 = vector.shape_cast %105 : vector<96xf32> to vector<96x1xf32>
    %107 = vector.broadcast %106 : vector<96x1xf32> to vector<96x24xf32>
    %108 = arith.subf %104, %107 : vector<96x24xf32>
    %109 = math.exp %108 : vector<96x24xf32>
    %cst_49 = arith.constant dense<0.000000e+00> : vector<96xf32>
    %110 = vector.multi_reduction <add>, %109, %cst_49 [1] : vector<96x24xf32> to vector<96xf32>
    %111 = vector.shape_cast %110 : vector<96xf32> to vector<96x1xf32>
    %112 = vector.broadcast %111 : vector<96x1xf32> to vector<96x24xf32>
    %113 = arith.divf %109, %112 : vector<96x24xf32>
    %cst_50 = arith.constant dense<0.000000e+00> : vector<96x128xf32>
    %114 = tpu.matmul %113, %96, %cst_50 {dimension_numbers = #tpu.dot_dimension_numbers<[1], [0], [0], [1], [0, 0, 1, 1], [], []>} : vector<96x24xf32>, vector<24x128xf32>, vector<96x128xf32> -> vector<96x128xf32>
    %115 = arith.mulf %114, %97 : vector<96x128xf32>
    %116 = vector.extract_strided_slice %115 {offsets = [0, 0], sizes = [24, 128], strides = [1, 1]} : vector<96x128xf32> to vector<24x128xf32>
    %117 = vector.extract_strided_slice %115 {offsets = [24, 0], sizes = [24, 128], strides = [1, 1]} : vector<96x128xf32> to vector<24x128xf32>
    %118 = arith.addf %116, %117 : vector<24x128xf32>
    %119 = vector.extract_strided_slice %115 {offsets = [48, 0], sizes = [24, 128], strides = [1, 1]} : vector<96x128xf32> to vector<24x128xf32>
    %120 = arith.addf %118, %119 : vector<24x128xf32>
    %121 = vector.extract_strided_slice %115 {offsets = [72, 0], sizes = [24, 128], strides = [1, 1]} : vector<96x128xf32> to vector<24x128xf32>
    %122 = arith.addf %120, %121 : vector<24x128xf32>
    %c0_51 = arith.constant 0 : index
    %c0_52 = arith.constant 0 : index
    %c512_53 = arith.constant 512 : index
    %123 = vector.load %arg9[%c0_51, %c0_52, %c512_53] : memref<1x128x1152xf32, #tpu.memory_space<vmem>>, vector<1x128x128xf32>
    %124 = vector.shape_cast %123 : vector<1x128x128xf32> to vector<128x128xf32>
    %cst_54 = arith.constant dense<0.000000e+00> : vector<24x128xf32>
    %125 = tpu.matmul %122, %124, %cst_54 {dimension_numbers = #tpu.dot_dimension_numbers<[1], [0], [0], [1], [0, 0, 1, 1], [], []>} : vector<24x128xf32>, vector<128x128xf32>, vector<24x128xf32> -> vector<24x128xf32>
    %126 = arith.addf %58, %125 : vector<24x128xf32>
    %c0_55 = arith.constant 0 : index
    %c0_56 = arith.constant 0 : index
    %c1152 = arith.constant 1152 : index
    %127 = vector.load %arg11[%c0_55, %c0_56, %c1152] : memref<1x1x3456xf32, #tpu.memory_space<vmem>>, vector<1x1x128xf32>
    %128 = vector.shape_cast %127 : vector<1x1x128xf32> to vector<1x128xf32>
    %129 = vector.broadcast %128 : vector<1x128xf32> to vector<24x128xf32>
    %130 = arith.addf %126, %129 : vector<24x128xf32>
    %c0_57 = arith.constant 0 : index
    %c0_58 = arith.constant 0 : index
    %c1280 = arith.constant 1280 : index
    %131 = vector.load %arg11[%c0_57, %c0_58, %c1280] : memref<1x1x3456xf32, #tpu.memory_space<vmem>>, vector<1x1x128xf32>
    %132 = vector.shape_cast %131 : vector<1x1x128xf32> to vector<1x128xf32>
    %c0_59 = arith.constant 0 : index
    %c0_60 = arith.constant 0 : index
    %c1408 = arith.constant 1408 : index
    %133 = vector.load %arg11[%c0_59, %c0_60, %c1408] : memref<1x1x3456xf32, #tpu.memory_space<vmem>>, vector<1x1x128xf32>
    %134 = vector.shape_cast %133 : vector<1x1x128xf32> to vector<1x128xf32>
    %cst_61 = arith.constant dense<0.000000e+00> : vector<24xf32>
    %135 = vector.multi_reduction <add>, %130, %cst_61 [1] : vector<24x128xf32> to vector<24xf32>
    %136 = vector.shape_cast %135 : vector<24xf32> to vector<24x1xf32>
    %cst_62 = arith.constant 3.125000e-02 : f32
    %137 = vector.broadcast %cst_62 : f32 to vector<24x1xf32>
    %138 = arith.mulf %136, %137 : vector<24x1xf32>
    %139 = vector.broadcast %138 : vector<24x1xf32> to vector<24x128xf32>
    %140 = arith.subf %130, %139 : vector<24x128xf32>
    %141 = vector.broadcast %4 : vector<1x128xf32> to vector<24x128xf32>
    %142 = arith.mulf %140, %141 : vector<24x128xf32>
    %143 = arith.mulf %142, %142 : vector<24x128xf32>
    %cst_63 = arith.constant dense<0.000000e+00> : vector<24xf32>
    %144 = vector.multi_reduction <add>, %143, %cst_63 [1] : vector<24x128xf32> to vector<24xf32>
    %145 = vector.shape_cast %144 : vector<24xf32> to vector<24x1xf32>
    %cst_64 = arith.constant 3.125000e-02 : f32
    %146 = vector.broadcast %cst_64 : f32 to vector<24x1xf32>
    %147 = arith.mulf %145, %146 : vector<24x1xf32>
    %cst_65 = arith.constant 9.99999974E-6 : f32
    %148 = vector.broadcast %cst_65 : f32 to vector<24x1xf32>
    %149 = arith.addf %147, %148 : vector<24x1xf32>
    %150 = math.rsqrt %149 : vector<24x1xf32>
    %151 = vector.broadcast %150 : vector<24x1xf32> to vector<24x128xf32>
    %152 = arith.mulf %142, %151 : vector<24x128xf32>
    %153 = vector.broadcast %132 : vector<1x128xf32> to vector<24x128xf32>
    %154 = arith.mulf %152, %153 : vector<24x128xf32>
    %155 = vector.broadcast %134 : vector<1x128xf32> to vector<24x128xf32>
    %156 = arith.addf %154, %155 : vector<24x128xf32>
    %c0_66 = arith.constant 0 : index
    %c0_67 = arith.constant 0 : index
    %c640_68 = arith.constant 640 : index
    %157 = vector.load %arg9[%c0_66, %c0_67, %c640_68] : memref<1x128x1152xf32, #tpu.memory_space<vmem>>, vector<1x128x256xf32>
    %158 = vector.shape_cast %157 : vector<1x128x256xf32> to vector<128x256xf32>
    %cst_69 = arith.constant dense<0.000000e+00> : vector<24x256xf32>
    %159 = tpu.matmul %156, %158, %cst_69 {dimension_numbers = #tpu.dot_dimension_numbers<[1], [0], [0], [1], [0, 0, 1, 1], [], []>} : vector<24x128xf32>, vector<128x256xf32>, vector<24x256xf32> -> vector<24x256xf32>
    %c0_70 = arith.constant 0 : index
    %c0_71 = arith.constant 0 : index
    %c1536 = arith.constant 1536 : index
    %160 = vector.load %arg11[%c0_70, %c0_71, %c1536] : memref<1x1x3456xf32, #tpu.memory_space<vmem>>, vector<1x1x256xf32>
    %161 = vector.shape_cast %160 : vector<1x1x256xf32> to vector<1x256xf32>
    %162 = vector.broadcast %161 : vector<1x256xf32> to vector<24x256xf32>
    %163 = arith.addf %159, %162 : vector<24x256xf32>
    %164 = vector.extract_strided_slice %163 {offsets = [0, 0], sizes = [24, 128], strides = [1, 1]} : vector<24x256xf32> to vector<24x128xf32>
    %165 = vector.extract_strided_slice %163 {offsets = [0, 128], sizes = [24, 128], strides = [1, 1]} : vector<24x256xf32> to vector<24x128xf32>
    %166 = arith.negf %165 : vector<24x128xf32>
    %167 = math.exp %166 : vector<24x128xf32>
    %cst_72 = arith.constant 1.000000e+00 : f32
    %168 = vector.broadcast %cst_72 : f32 to vector<24x128xf32>
    %169 = arith.addf %168, %167 : vector<24x128xf32>
    %170 = arith.divf %168, %169 : vector<24x128xf32>
    %171 = arith.mulf %164, %170 : vector<24x128xf32>
    %c0_73 = arith.constant 0 : index
    %c0_74 = arith.constant 0 : index
    %172 = vector.load %arg4[%c0_73, %c0_74] : memref<24x1xf32, #tpu.memory_space<vmem>>, vector<24x1xf32>
    %173 = vector.broadcast %172 : vector<24x1xf32> to vector<24x128xf32>
    %174 = arith.mulf %171, %173 : vector<24x128xf32>
    %cst_75 = arith.constant 0.000000e+00 : f32
    %175 = vector.broadcast %cst_75 : f32 to vector<24x128xf32>
    %c1_i32 = arith.constant 1 : i32
    %176 = tpu.dynamic_rotate %174 by %c1_i32 dim 0 : vector<24x128xf32>, i32 -> vector<24x128xf32>
    %c0_76 = arith.constant 0 : index
    %c0_77 = arith.constant 0 : index
    %c3072 = arith.constant 3072 : index
    %177 = vector.load %arg11[%c0_76, %c0_77, %c3072] : memref<1x1x3456xf32, #tpu.memory_space<vmem>>, vector<1x1x128xf32>
    %178 = vector.shape_cast %177 : vector<1x1x128xf32> to vector<1x128xf32>
    %179 = vector.broadcast %178 : vector<1x128xf32> to vector<24x128xf32>
    %180 = arith.mulf %176, %179 : vector<24x128xf32>
    %181 = arith.addf %175, %180 : vector<24x128xf32>
    %c0_78 = arith.constant 0 : index
    %c0_79 = arith.constant 0 : index
    %c3200 = arith.constant 3200 : index
    %182 = vector.load %arg11[%c0_78, %c0_79, %c3200] : memref<1x1x3456xf32, #tpu.memory_space<vmem>>, vector<1x1x128xf32>
    %183 = vector.shape_cast %182 : vector<1x1x128xf32> to vector<1x128xf32>
    %184 = vector.broadcast %183 : vector<1x128xf32> to vector<24x128xf32>
    %185 = arith.mulf %174, %184 : vector<24x128xf32>
    %186 = arith.addf %181, %185 : vector<24x128xf32>
    %c23_i32 = arith.constant 23 : i32
    %187 = tpu.dynamic_rotate %174 by %c23_i32 dim 0 : vector<24x128xf32>, i32 -> vector<24x128xf32>
    %c0_80 = arith.constant 0 : index
    %c0_81 = arith.constant 0 : index
    %c3328 = arith.constant 3328 : index
    %188 = vector.load %arg11[%c0_80, %c0_81, %c3328] : memref<1x1x3456xf32, #tpu.memory_space<vmem>>, vector<1x1x128xf32>
    %189 = vector.shape_cast %188 : vector<1x1x128xf32> to vector<1x128xf32>
    %190 = vector.broadcast %189 : vector<1x128xf32> to vector<24x128xf32>
    %191 = arith.mulf %187, %190 : vector<24x128xf32>
    %192 = arith.addf %186, %191 : vector<24x128xf32>
    %c0_82 = arith.constant 0 : index
    %c0_83 = arith.constant 0 : index
    %c1792 = arith.constant 1792 : index
    %193 = vector.load %arg11[%c0_82, %c0_83, %c1792] : memref<1x1x3456xf32, #tpu.memory_space<vmem>>, vector<1x1x128xf32>
    %194 = vector.shape_cast %193 : vector<1x1x128xf32> to vector<1x128xf32>
    %195 = vector.broadcast %194 : vector<1x128xf32> to vector<24x128xf32>
    %196 = arith.addf %192, %195 : vector<24x128xf32>
    %cst_84 = arith.constant 0.999994993 : f32
    %197 = vector.broadcast %cst_84 : f32 to vector<24x128xf32>
    %198 = arith.mulf %196, %197 : vector<24x128xf32>
    %c0_85 = arith.constant 0 : index
    %c0_86 = arith.constant 0 : index
    %c1920 = arith.constant 1920 : index
    %199 = vector.load %arg11[%c0_85, %c0_86, %c1920] : memref<1x1x3456xf32, #tpu.memory_space<vmem>>, vector<1x1x128xf32>
    %200 = vector.shape_cast %199 : vector<1x1x128xf32> to vector<1x128xf32>
    %201 = vector.broadcast %200 : vector<1x128xf32> to vector<24x128xf32>
    %202 = arith.mulf %198, %201 : vector<24x128xf32>
    %c0_87 = arith.constant 0 : index
    %c0_88 = arith.constant 0 : index
    %c2048 = arith.constant 2048 : index
    %203 = vector.load %arg11[%c0_87, %c0_88, %c2048] : memref<1x1x3456xf32, #tpu.memory_space<vmem>>, vector<1x1x128xf32>
    %204 = vector.shape_cast %203 : vector<1x1x128xf32> to vector<1x128xf32>
    %205 = vector.broadcast %204 : vector<1x128xf32> to vector<24x128xf32>
    %206 = arith.addf %202, %205 : vector<24x128xf32>
    %207 = arith.negf %206 : vector<24x128xf32>
    %208 = math.exp %207 : vector<24x128xf32>
    %cst_89 = arith.constant 1.000000e+00 : f32
    %209 = vector.broadcast %cst_89 : f32 to vector<24x128xf32>
    %210 = arith.addf %209, %208 : vector<24x128xf32>
    %211 = arith.divf %209, %210 : vector<24x128xf32>
    %212 = arith.mulf %206, %211 : vector<24x128xf32>
    %c0_90 = arith.constant 0 : index
    %c0_91 = arith.constant 0 : index
    %c896 = arith.constant 896 : index
    %213 = vector.load %arg9[%c0_90, %c0_91, %c896] : memref<1x128x1152xf32, #tpu.memory_space<vmem>>, vector<1x128x128xf32>
    %214 = vector.shape_cast %213 : vector<1x128x128xf32> to vector<128x128xf32>
    %cst_92 = arith.constant dense<0.000000e+00> : vector<24x128xf32>
    %215 = tpu.matmul %212, %214, %cst_92 {dimension_numbers = #tpu.dot_dimension_numbers<[1], [0], [0], [1], [0, 0, 1, 1], [], []>} : vector<24x128xf32>, vector<128x128xf32>, vector<24x128xf32> -> vector<24x128xf32>
    %c0_93 = arith.constant 0 : index
    %c0_94 = arith.constant 0 : index
    %c2176 = arith.constant 2176 : index
    %216 = vector.load %arg11[%c0_93, %c0_94, %c2176] : memref<1x1x3456xf32, #tpu.memory_space<vmem>>, vector<1x1x128xf32>
    %217 = vector.shape_cast %216 : vector<1x1x128xf32> to vector<1x128xf32>
    %218 = vector.broadcast %217 : vector<1x128xf32> to vector<24x128xf32>
    %219 = arith.addf %215, %218 : vector<24x128xf32>
    %220 = arith.addf %130, %219 : vector<24x128xf32>
    %c0_95 = arith.constant 0 : index
    %c0_96 = arith.constant 0 : index
    %c2304 = arith.constant 2304 : index
    %221 = vector.load %arg11[%c0_95, %c0_96, %c2304] : memref<1x1x3456xf32, #tpu.memory_space<vmem>>, vector<1x1x128xf32>
    %222 = vector.shape_cast %221 : vector<1x1x128xf32> to vector<1x128xf32>
    %c0_97 = arith.constant 0 : index
    %c0_98 = arith.constant 0 : index
    %c2432 = arith.constant 2432 : index
    %223 = vector.load %arg11[%c0_97, %c0_98, %c2432] : memref<1x1x3456xf32, #tpu.memory_space<vmem>>, vector<1x1x128xf32>
    %224 = vector.shape_cast %223 : vector<1x1x128xf32> to vector<1x128xf32>
    %cst_99 = arith.constant dense<0.000000e+00> : vector<24xf32>
    %225 = vector.multi_reduction <add>, %220, %cst_99 [1] : vector<24x128xf32> to vector<24xf32>
    %226 = vector.shape_cast %225 : vector<24xf32> to vector<24x1xf32>
    %cst_100 = arith.constant 3.125000e-02 : f32
    %227 = vector.broadcast %cst_100 : f32 to vector<24x1xf32>
    %228 = arith.mulf %226, %227 : vector<24x1xf32>
    %229 = vector.broadcast %228 : vector<24x1xf32> to vector<24x128xf32>
    %230 = arith.subf %220, %229 : vector<24x128xf32>
    %231 = vector.broadcast %4 : vector<1x128xf32> to vector<24x128xf32>
    %232 = arith.mulf %230, %231 : vector<24x128xf32>
    %233 = arith.mulf %232, %232 : vector<24x128xf32>
    %cst_101 = arith.constant dense<0.000000e+00> : vector<24xf32>
    %234 = vector.multi_reduction <add>, %233, %cst_101 [1] : vector<24x128xf32> to vector<24xf32>
    %235 = vector.shape_cast %234 : vector<24xf32> to vector<24x1xf32>
    %cst_102 = arith.constant 3.125000e-02 : f32
    %236 = vector.broadcast %cst_102 : f32 to vector<24x1xf32>
    %237 = arith.mulf %235, %236 : vector<24x1xf32>
    %cst_103 = arith.constant 9.99999974E-6 : f32
    %238 = vector.broadcast %cst_103 : f32 to vector<24x1xf32>
    %239 = arith.addf %237, %238 : vector<24x1xf32>
    %240 = math.rsqrt %239 : vector<24x1xf32>
    %241 = vector.broadcast %240 : vector<24x1xf32> to vector<24x128xf32>
    %242 = arith.mulf %232, %241 : vector<24x128xf32>
    %243 = vector.broadcast %222 : vector<1x128xf32> to vector<24x128xf32>
    %244 = arith.mulf %242, %243 : vector<24x128xf32>
    %245 = vector.broadcast %224 : vector<1x128xf32> to vector<24x128xf32>
    %246 = arith.addf %244, %245 : vector<24x128xf32>
    %c0_104 = arith.constant 0 : index
    %c0_105 = arith.constant 0 : index
    %c1024 = arith.constant 1024 : index
    %247 = vector.load %arg9[%c0_104, %c0_105, %c1024] : memref<1x128x1152xf32, #tpu.memory_space<vmem>>, vector<1x128x128xf32>
    %248 = vector.shape_cast %247 : vector<1x128x128xf32> to vector<128x128xf32>
    %cst_106 = arith.constant dense<0.000000e+00> : vector<24x128xf32>
    %249 = tpu.matmul %246, %248, %cst_106 {dimension_numbers = #tpu.dot_dimension_numbers<[1], [0], [0], [1], [0, 0, 1, 1], [], []>} : vector<24x128xf32>, vector<128x128xf32>, vector<24x128xf32> -> vector<24x128xf32>
    %c0_107 = arith.constant 0 : index
    %c0_108 = arith.constant 0 : index
    %c2560 = arith.constant 2560 : index
    %250 = vector.load %arg11[%c0_107, %c0_108, %c2560] : memref<1x1x3456xf32, #tpu.memory_space<vmem>>, vector<1x1x128xf32>
    %251 = vector.shape_cast %250 : vector<1x1x128xf32> to vector<1x128xf32>
    %252 = vector.broadcast %251 : vector<1x128xf32> to vector<24x128xf32>
    %253 = arith.addf %249, %252 : vector<24x128xf32>
    %254 = arith.negf %253 : vector<24x128xf32>
    %255 = math.exp %254 : vector<24x128xf32>
    %cst_109 = arith.constant 1.000000e+00 : f32
    %256 = vector.broadcast %cst_109 : f32 to vector<24x128xf32>
    %257 = arith.addf %256, %255 : vector<24x128xf32>
    %258 = arith.divf %256, %257 : vector<24x128xf32>
    %259 = arith.mulf %253, %258 : vector<24x128xf32>
    %c0_110 = arith.constant 0 : index
    %c0_111 = arith.constant 0 : index
    %c128_112 = arith.constant 128 : index
    %260 = vector.load %arg10[%c0_110, %c0_111, %c128_112] : memref<1x128x256xf32, #tpu.memory_space<vmem>>, vector<1x128x128xf32>
    %261 = vector.shape_cast %260 : vector<1x128x128xf32> to vector<128x128xf32>
    %cst_113 = arith.constant dense<0.000000e+00> : vector<24x128xf32>
    %262 = tpu.matmul %259, %261, %cst_113 {dimension_numbers = #tpu.dot_dimension_numbers<[1], [0], [0], [1], [0, 0, 1, 1], [], []>} : vector<24x128xf32>, vector<128x128xf32>, vector<24x128xf32> -> vector<24x128xf32>
    %c0_114 = arith.constant 0 : index
    %c0_115 = arith.constant 0 : index
    %c2688 = arith.constant 2688 : index
    %263 = vector.load %arg11[%c0_114, %c0_115, %c2688] : memref<1x1x3456xf32, #tpu.memory_space<vmem>>, vector<1x1x128xf32>
    %264 = vector.shape_cast %263 : vector<1x1x128xf32> to vector<1x128xf32>
    %265 = vector.broadcast %264 : vector<1x128xf32> to vector<24x128xf32>
    %266 = arith.addf %262, %265 : vector<24x128xf32>
    %cst_116 = arith.constant 5.000000e-01 : f32
    %267 = vector.broadcast %cst_116 : f32 to vector<24x128xf32>
    %268 = arith.mulf %267, %266 : vector<24x128xf32>
    %269 = arith.addf %220, %268 : vector<24x128xf32>
    %c0_117 = arith.constant 0 : index
    %c0_118 = arith.constant 0 : index
    %c2816 = arith.constant 2816 : index
    %270 = vector.load %arg11[%c0_117, %c0_118, %c2816] : memref<1x1x3456xf32, #tpu.memory_space<vmem>>, vector<1x1x128xf32>
    %271 = vector.shape_cast %270 : vector<1x1x128xf32> to vector<1x128xf32>
    %c0_119 = arith.constant 0 : index
    %c0_120 = arith.constant 0 : index
    %c2944 = arith.constant 2944 : index
    %272 = vector.load %arg11[%c0_119, %c0_120, %c2944] : memref<1x1x3456xf32, #tpu.memory_space<vmem>>, vector<1x1x128xf32>
    %273 = vector.shape_cast %272 : vector<1x1x128xf32> to vector<1x128xf32>
    %cst_121 = arith.constant dense<0.000000e+00> : vector<24xf32>
    %274 = vector.multi_reduction <add>, %269, %cst_121 [1] : vector<24x128xf32> to vector<24xf32>
    %275 = vector.shape_cast %274 : vector<24xf32> to vector<24x1xf32>
    %cst_122 = arith.constant 3.125000e-02 : f32
    %276 = vector.broadcast %cst_122 : f32 to vector<24x1xf32>
    %277 = arith.mulf %275, %276 : vector<24x1xf32>
    %278 = vector.broadcast %277 : vector<24x1xf32> to vector<24x128xf32>
    %279 = arith.subf %269, %278 : vector<24x128xf32>
    %280 = vector.broadcast %4 : vector<1x128xf32> to vector<24x128xf32>
    %281 = arith.mulf %279, %280 : vector<24x128xf32>
    %282 = arith.mulf %281, %281 : vector<24x128xf32>
    %cst_123 = arith.constant dense<0.000000e+00> : vector<24xf32>
    %283 = vector.multi_reduction <add>, %282, %cst_123 [1] : vector<24x128xf32> to vector<24xf32>
    %284 = vector.shape_cast %283 : vector<24xf32> to vector<24x1xf32>
    %cst_124 = arith.constant 3.125000e-02 : f32
    %285 = vector.broadcast %cst_124 : f32 to vector<24x1xf32>
    %286 = arith.mulf %284, %285 : vector<24x1xf32>
    %cst_125 = arith.constant 9.99999974E-6 : f32
    %287 = vector.broadcast %cst_125 : f32 to vector<24x1xf32>
    %288 = arith.addf %286, %287 : vector<24x1xf32>
    %289 = math.rsqrt %288 : vector<24x1xf32>
    %290 = vector.broadcast %289 : vector<24x1xf32> to vector<24x128xf32>
    %291 = arith.mulf %281, %290 : vector<24x128xf32>
    %292 = vector.broadcast %271 : vector<1x128xf32> to vector<24x128xf32>
    %293 = arith.mulf %291, %292 : vector<24x128xf32>
    %294 = vector.broadcast %273 : vector<1x128xf32> to vector<24x128xf32>
    %295 = arith.addf %293, %294 : vector<24x128xf32>
    %c0_126 = arith.constant 0 : index
    %c0_127 = arith.constant 0 : index
    %c0_128 = arith.constant 0 : index
    %296 = vector.load %arg12[%c0_126, %c0_127, %c0_128] : memref<1x24x128xf32, #tpu.memory_space<vmem>>, vector<1x24x128xf32>
    %297 = vector.shape_cast %296 : vector<1x24x128xf32> to vector<24x128xf32>
    %298 = vector.shape_cast %295 : vector<24x128xf32> to vector<1x24x128xf32>
    tpu.vector_store %arg12[%c0_126, %c0_127, %c0_128], %298 {strides = array<i32>} : memref<1x24x128xf32, #tpu.memory_space<vmem>>, vector<1x24x128xf32>,
    return
  }
  func.func @transform_0(%arg0: i32, %arg1: i32) -> (i32, i32, i32) {
    %c0_i32 = arith.constant 0 : i32
    %c0_i32_0 = arith.constant 0 : i32
    %c0_i32_1 = arith.constant 0 : i32
    return %arg0, %c0_i32, %c0_i32_0 : i32, i32, i32
  }
  func.func @transform_1(%arg0: i32, %arg1: i32) -> (i32, i32) {
    %c0_i32 = arith.constant 0 : i32
    %c0_i32_0 = arith.constant 0 : i32
    %c0_i32_1 = arith.constant 0 : i32
    return %c0_i32, %c0_i32_0 : i32, i32
  }
  func.func @transform_2(%arg0: i32, %arg1: i32) -> (i32, i32) {
    %c0_i32 = arith.constant 0 : i32
    %c0_i32_0 = arith.constant 0 : i32
    %c0_i32_1 = arith.constant 0 : i32
    return %c0_i32, %c0_i32_0 : i32, i32
  }
  func.func @transform_3(%arg0: i32, %arg1: i32) -> (i32, i32, i32) {
    %c0_i32 = arith.constant 0 : i32
    %c0_i32_0 = arith.constant 0 : i32
    %c0_i32_1 = arith.constant 0 : i32
    return %arg0, %c0_i32, %c0_i32_0 : i32, i32, i32
  }
  func.func @transform_4(%arg0: i32, %arg1: i32) -> (i32, i32) {
    %c0_i32 = arith.constant 0 : i32
    %c0_i32_0 = arith.constant 0 : i32
    %c0_i32_1 = arith.constant 0 : i32
    return %c0_i32, %c0_i32_0 : i32, i32
  }
  func.func @transform_5(%arg0: i32, %arg1: i32) -> (i32, i32) {
    %c0_i32 = arith.constant 0 : i32
    %c0_i32_0 = arith.constant 0 : i32
    %c0_i32_1 = arith.constant 0 : i32
    return %c0_i32, %c0_i32_0 : i32, i32
  }
  func.func @transform_6(%arg0: i32, %arg1: i32) -> (i32, i32) {
    %c0_i32 = arith.constant 0 : i32
    %c0_i32_0 = arith.constant 0 : i32
    %c0_i32_1 = arith.constant 0 : i32
    return %c0_i32, %c0_i32_0 : i32, i32
  }
  func.func @transform_7(%arg0: i32, %arg1: i32) -> (i32, i32, i32) {
    %c0_i32 = arith.constant 0 : i32
    %c0_i32_0 = arith.constant 0 : i32
    %c0_i32_1 = arith.constant 0 : i32
    return %arg1, %c0_i32, %c0_i32_0 : i32, i32, i32
  }
  func.func @transform_8(%arg0: i32, %arg1: i32) -> (i32, i32, i32) {
    %c0_i32 = arith.constant 0 : i32
    %c0_i32_0 = arith.constant 0 : i32
    %c0_i32_1 = arith.constant 0 : i32
    return %arg1, %c0_i32, %c0_i32_0 : i32, i32, i32
  }
  func.func @transform_9(%arg0: i32, %arg1: i32) -> (i32, i32, i32) {
    %c0_i32 = arith.constant 0 : i32
    %c0_i32_0 = arith.constant 0 : i32
    %c0_i32_1 = arith.constant 0 : i32
    return %arg1, %c0_i32, %c0_i32_0 : i32, i32, i32
  }
  func.func @transform_10(%arg0: i32, %arg1: i32) -> (i32, i32, i32) {
    %c0_i32 = arith.constant 0 : i32
    %c0_i32_0 = arith.constant 0 : i32
    %c0_i32_1 = arith.constant 0 : i32
    return %arg0, %c0_i32, %c0_i32_0 : i32, i32, i32
  }
  func.func @transform_11(%arg0: i32, %arg1: i32) -> (i32, i32, i32) {
    %c0_i32 = arith.constant 0 : i32
    %c0_i32_0 = arith.constant 0 : i32
    %c0_i32_1 = arith.constant 0 : i32
    return %arg0, %c0_i32, %c0_i32_0 : i32, i32, i32
  }
}

</mosaic_0001>

<bundles_post_ra>
// kernel: _forward_impl.1
= control target key start
LH: loop header
LB: loop body
LE: loop exit
PB: predicated region body
PF: predicated region fallthrough
CT: control target
= control target key end

     0   :  { %s4468_s0 = inlined_call_operand.vmem [shape: f32[2,24,128], index: 0, kind: input, shape index: {}]   ;;  %s4469_s1 = inlined_call_operand.vmem [shape: f32[24,1], index: 1, kind: input, shape index: {}]   ;;  %s4470_s2 = inlined_call_operand.vmem [shape: f32[24,1], index: 2, kind: input, shape index: {}]   ;;  %s4471_s3 = inlined_call_operand.hbm [shape: f32[2,1,24], index: 3, kind: input, shape index: {}]   ;;  %s4472_s4 = inlined_call_operand.hbm [shape: f32[96,128], index: 4, kind: input, shape index: {}]   ;;  %s4473_s5 = inlined_call_operand.hbm [shape: f32[640,128], index: 5, kind: input, shape index: {}]   ;;  %s4474_s6 = inlined_call_operand.hbm [shape: f32[1,384], index: 6, kind: input, shape index: {}]   ;;  %s4475_s7 = inlined_call_operand.hbm [shape: f32[2,128,1152], index: 7, kind: input, shape index: {}]   ;;  %s4476_s8 = inlined_call_operand.hbm [shape: f32[2,128,256], index: 8, kind: input, shape index: {}]   ;;  %s4477_s9 = inlined_call_operand.hbm [shape: f32[2,1,3456], index: 9, kind: input, shape index: {}]   ;;  %s4478_s10 = inlined_call_operand.vmem [shape: f32[2,24,128], index: 10, kind: output, shape index: {0}]   ;;  %s4479_s11 = inlined_call_operand.vmem [shape: f32[2,24,128], index: 11, kind: output, shape index: {1}]  }
   0x1   :  { %4489 = sst [smem:[#allocation25_spill]] %s4468_s0 }
   0x2   :  { %4490 = sst [smem:[#allocation26_spill]] %s4469_s1 }
   0x3   :  { %4491 = sst [smem:[#allocation27_spill]] %s4470_s2 }
   0x4   :  { %4492 = sst [smem:[#allocation28_spill]] %s4471_s3 }
   0x5   :  { %4493 = sst [smem:[#allocation29_spill]] %s4472_s4 }
   0x6   :  { %4494 = sst [smem:[#allocation30_spill]] %s4475_s7 }
   0x7   :  { %4495 = sst [smem:[#allocation31_spill]] %s4476_s8 }
   0x8   :  { %4496 = sst [smem:[#allocation32_spill]] %s4478_s10 }
   0x9   :  { %4497 = sst [smem:[#allocation33_spill]] %s4479_s11 }
   0xa   :  { %17 = vsyncpa [#allocation3], 0 }
   0xb   :  { %19 = vsyncpa [#allocation3 + $0x1], 0 }
   0xc   :  { %20 = vsyncpa [#allocation5], 0 }
   0xd   :  { %21 = vsyncpa [#allocation8], 0  ;;  %s3606_s17 = smov 0   ;;  %s3608_s18 = smov 0  }
   0xe   :  { %s3610_s19 = smov 0   ;;  %s3612_s20 = smov 0  }
   0xf   :  { %s3614_s21 = smov 0   ;;  %s3616_s22 = smov 0  }
  0x10   :  { %s3618_s23 = smov 0   ;;  %s3620_s24 = smov 0  }
  0x11   :  { %s3622_s25 = smov 0   ;;  %s3624_s26 = smov 0  }
  0x12   :  { %s3626_s27 = smov 0  }
  0x13 LB: > { %4498 = sst [smem:[#allocation16_spill]] %s3500_s19  ;;  %s4480_s28 = sadd.s32 4294967295, %s3532_s27   ;;  %s3532_s27 = sphi %s3626_s27, %s27_s27   ;;  %s3528_s26 = sphi %s3624_s26, %s4533_s26   ;;  %s3524_s25 = sphi %s3622_s25, %s4539_s25   ;;  %s3520_s24 = sphi %s3620_s24, %s4531_s24   ;;  %s3516_s23 = sphi %s3618_s23, %s4538_s23   ;;  %s3512_s22 = sphi %s3616_s22, %s4530_s22   ;;  %s3508_s21 = sphi %s3614_s21, %s4537_s21   ;;  %s3504_s20 = sphi %s3612_s20, %s4536_s20   ;;  %s3500_s19 = sphi %s3610_s19, %s4528_s19   ;;  %s3496_s18 = sphi %s3608_s18, %s4535_s18   ;;  %s3492_s17 = sphi %s3606_s17, %s4534_s17  }
  0x14   : > { %4499 = sst [smem:[#allocation17_spill]] %s3512_s22  ;;  %s36_s29 = sadd.s32 1, %s3524_s25 }
  0x15   : > { %4500 = sst [smem:[#allocation18_spill]] %s3516_s23  ;;  %p37_p0 = scmp.ge.s32.totalorder %s36_s29, 2 }
  0x16   : > { %4501 = sst [smem:[#allocation19_spill]] %s3520_s24  ;;  %s39_s30 = sadd.s32 1, %s3528_s26 }
  0x17   : > { %4502 = sst [smem:[#allocation20_spill]] %s3528_s26  ;;  %s114_s12 = sadd.s32 1, %s3512_s22 }
  0x18   : > { %p121_p1 = scmp.ne.s32.totalorder %s3512_s22, %s3508_s21  ;;  %s4541_s29 = smov (%p37_p0, %s36_s29), 0 }
  0x19   : > { %4503 = sst [smem:[#allocation21_spill]] %s4541_s29  ;;  %s4543_s30 = smov (!%p37_p0, %s39_s30), %s3528_s26 }
  0x1a   : > { %p122_p2 = scmp.eq.s32.totalorder %s3532_s27, 0  ;;  %p127_p3 = scmp.ne.s32.totalorder %s3508_s21, %s3504_s20 }
  0x1b   : > { %p41_p4 = scmp.ge.s32.totalorder %s4543_s30, 2  ;;  %p3672_p5 = scmp.eq.s32.totalorder %s4480_s28, 0 }
  0x1c   : > { %p3678_p6 = por %p122_p2, %p121_p1  ;;  %s200_s15 = ssub.s32 %s3524_s25, %s4541_s29 }
  0x1d   : > { %s4545_s30 = smov (%p41_p4, %s4543_s30), 0  ;;  %p3688_p7 = por %p3672_p5, %p127_p3 }
  0x1e   : > { %4506 = sst [smem:[#allocation22_spill]] %s4545_s30  ;;  %p201_p8 = scmp.eq.s32.totalorder %s200_s15, 0 }
  0x1f   : > { %s111_s20 = ssub.s32 %s3528_s26, %s4545_s30  ;;  %s203_s28 = sadd.s32 1, %s3500_s19 }
  0x20   : > { %p112_p9 = scmp.eq.s32.totalorder %s111_s20, 0  ;;  %p210_p10 = scmp.ne.s32.totalorder %s3500_s19, %s3496_s18 }
  0x21   : > { %s3698_s2 = scalar_select %p201_p8, %s3500_s19, %s203_s28  }
  0x22   : > { %s3701_s1 = scalar_select %p112_p9, %s3512_s22, %s114_s12  }
  0x23   : > { %4508 = sst [smem:[#allocation23_spill]] %s3698_s2  ;;  %p3705_p11 = por %p210_p10, %p122_p2 }
  0x24   : > { %4509 = sst [smem:[#allocation24_spill]] %s3701_s1  ;;  %p216_p12 = scmp.ne.s32.totalorder %s3496_s18, %s3492_s17 }
  0x25   : > { %p2959_p0 = scmp.lt.s32.totalorder %s3532_s27, 4  ;;  %s398_s20 = sand.u32 1, %s3532_s27  }
  0x26   : > { %p3713_p13 = por %p216_p12, %p3672_p5  ;;  %s400_s28 = sand.u32 1, %s3512_s22  }
  0x27   : > { %s4512_s3 = sld [smem:[#allocation28_spill]]  ;;  %s401_s1 = scalar_lea.vmem [#allocation2], %s400_s28 }
  0x28   : > { %s408_s23 = sshll.u32 %s401_s1, 4  ;;  %p2944_p1 = pnand %p2959_p0, %p3678_p6  ;;  %s409_s23 = int_to_ptr.vmem [resolvable:$true] %s408_s23 }
  0x29   : > { %p3728_p2 = pnand %p2959_p0, %p3705_p11  ;;  %s3733_s22 = sand.u32 1, %s3500_s19  }
  0x2a   : > { %s2906_s2 = smul.u32 1152, %s3733_s22  ;;  %s3736_s30 = scalar_lea.sflag [#allocation3], %s398_s20 }
  0x2b   : > { %s2907_s1 = smul.u32 1152, %s3524_s25  ;;  %s4514_s7 = sld [smem:[#allocation30_spill]] }
  0x2c   : > { %s419_s14 = scalar_lea.vmem [#allocation9], %s2906_s2  ;;  %s3534_s19 = smov 1152  }
  0x2d   : > { %s404_s12 = scalar_lea.hbm %s4512_s3, %s3528_s26  ;;  %s427_s28 = sshll.u32 %s419_s14, 4  ;;  %s428_s28 = int_to_ptr.vmem [resolvable:$true] %s427_s28 }
  0x2e   : > { %s406_s11 = sshll.u32 %s404_s12, 4  ;;  %s3535_s10 = smov 72   ;;  %s407_s11 = int_to_ptr.hbm [resolvable:$true] %s406_s11 }
  0x2f   : > { %2946 = dma.hbm_to_vmem [thread:$0]  (!%p2944_p1), %s407_s11, 16, %s409_s23, %s3736_s30  }
  0x30   : > { %p2828_p3 = scmp.ge.s32.totalorder %s3532_s27, 1  ;;  %p331_p4 = scmp.lt.s32.totalorder %s3532_s27, 5 }
  0x31   : > { %s424_s3 = scalar_lea.hbm %s4514_s7, %s2907_s1  ;;  %s4515_s4 = sld [smem:[#allocation29_spill]] }
  0x32   : > { %s425_s26 = sshll.u32 %s424_s3, 4  ;;  %p3751_p6 = pnand %p2828_p3, %p331_p4  ;;  %s426_s26 = int_to_ptr.hbm [resolvable:$true] %s425_s26 }
  0x33   : > { %2949 = dma.hbm_to_vmem [thread:$0]  (!%p3728_p2), %s426_s26, 18432, %s428_s28, %s3736_s30, %s3534_s19, %s3534_s19, %s3535_s10  }
  0x34   : > { %s3536_s1 = smov [#allocation4]   ;;  %p2933_p8 = pneg %p3751_p6 }
  0x35   : > { %s350_s3 = sshll.u32 %s3536_s1, 4  ;;  %s2834_s10 = sshll.u32 %s3733_s22, 8  ;;  %s351_s3 = int_to_ptr.vmem [resolvable:$true] %s350_s3 }
  0x36   : > { %p3760_p9 = pnand %p2933_p8, %p3672_p5  ;;  %s2873_s26 = sshll.u32 %s3524_s25, 8 }
  0x37   : > { %s348_s20 = sshll.u32 %s4515_s4, 4  ;;  %s441_s14 = scalar_lea.vmem [#allocation10], %s2834_s10  ;;  %s349_s20 = int_to_ptr.hbm [resolvable:$true] %s348_s20 }
  0x38   : > { %s449_s28 = sshll.u32 %s441_s14, 4  ;;  %s4518_s8 = sld [smem:[#allocation31_spill]]  ;;  %s450_s28 = int_to_ptr.vmem [resolvable:$true] %s449_s28 }
  0x39   : > { %s3537_s23 = smov 128   ;;  %s3538_s1 = smov 8  }
  0x3a   : > { %2936 = dma.hbm_to_vmem [thread:$0]  (!%p3760_p9), %s349_s20, 1536, %s351_s3, [#allocation5], %s3537_s23, %s3537_s23, %s3538_s1  }
  0x3b   : > { %s362_s24 = sshll.u32 %s4473_s5, 4  ;;  %s3539_s10 = smov 256   ;;  %s363_s24 = int_to_ptr.hbm [resolvable:$true] %s362_s24 }
  0x3c   : > { %s3540_s14 = smov 16   ;;  %s377_s20 = sshll.u32 %s4474_s6, 4  ;;  %s378_s20 = int_to_ptr.hbm [resolvable:$true] %s377_s20 }
  0x3d   : > { %s2908_s0 = smul.u32 27, %s3733_s22  ;;  %s3542_s7 = smov [#allocation7]  }
  0x3e   : > { %s446_s11 = scalar_lea.hbm %s4518_s8, %s2873_s26  ;;  %s3541_s26 = smov [#allocation6]  }
  0x3f   : > { %s447_s4 = sshll.u32 %s446_s11, 4  ;;  %s364_s29 = sshll.u32 %s3541_s26, 4  ;;  %s448_s4 = int_to_ptr.hbm [resolvable:$true] %s447_s4  ;;  %s365_s29 = int_to_ptr.vmem [resolvable:$true] %s364_s29 }
  0x40   : > { %2952 = dma.hbm_to_vmem [thread:$0]  (!%p3728_p2), %s448_s4, 4096, %s450_s28, %s3736_s30, %s3539_s10, %s3539_s10, %s3540_s14  }
  0x41   : > { %2939 = dma.hbm_to_vmem [thread:$0]  (!%p3760_p9), %s363_s24, 10240, %s365_s29, [#allocation5], %s3537_s23, %s3537_s23, %s3538_s1  }
  0x42   : > { %s379_s3 = sshll.u32 %s3542_s7, 4  ;;  %s2909_s11 = smul.u32 27, %s3524_s25  ;;  %s380_s3 = int_to_ptr.vmem [resolvable:$true] %s379_s3 }
  0x43   : > { %2942 = dma.hbm_to_vmem [thread:$0]  (!%p3760_p9), %s378_s20, 48, %s380_s3, [#allocation8]  }
  0x44   : > { %s467_s10 = scalar_lea.hbm %s4477_s9, %s2909_s11  ;;  %s463_s14 = scalar_lea.vmem [#allocation11], %s2908_s0 }
  0x45   : > { %s471_s8 = sshll.u32 %s463_s14, 4  ;;  %s469_s26 = sshll.u32 %s467_s10, 4  ;;  %s472_s8 = int_to_ptr.vmem [resolvable:$true] %s471_s8  ;;  %s470_s26 = int_to_ptr.hbm [resolvable:$true] %s469_s26 }
  0x46   : > { %2955 = dma.hbm_to_vmem [thread:$0]  (!%p3728_p2), %s470_s26, 432, %s472_s8, %s3736_s30  }
  0x47   : > { %480 = sbr.rel (%p3751_p6) target bundleno = 3696 (0xe70), region = 60  ;;  %s4519_s22 = sadd.s32 (!%p3751_p6), 4294967295, %s3532_s27  }
  0x48   : > { %s482_s24 = sand.u32 (!%p3751_p6), 1, %s4519_s22   ;;  %s484_s19 = sand.u32 (!%p3751_p6), 1, %s3508_s21  }
  0x49   : > { %s483_s23 = scalar_lea.sflag (!%p3751_p6), [#allocation3], %s482_s24  ;;  %s3796_s1 = scalar_lea.vmem (!%p3751_p6), [#allocation2], %s484_s19 }
  0x4c   : > { %3475 = dma.done.wait (%p3688_p7), %s483_s23, 16  }
  0x4d   : > { %3477 = vsyncadd (%p3688_p7), %s483_s23, 4294967280 }
  0x4e   : > { %3479 = dma.done.wait (%p3672_p5), [#allocation5], 11776  }
  0x4f   : > { %3481 = vsyncadd (%p3672_p5), [#allocation5], 4294955520 }
  0x50   : > { %3483 = dma.done.wait (%p3672_p5), [#allocation8], 48  }
  0x51   : > { %3485 = vsyncadd (%p3672_p5), [#allocation8], 4294967248  ;;  %s508_s17 = sand.u32 1, %s3496_s18  }
  0x52   : > { %s2910_s30 = smul.u32 1152, %s508_s17 }
  0x54   : > { %s3811_s2 = scalar_lea.vmem [#allocation9], %s2910_s30 }
  0x55   : > { %3487 = dma.done.wait (%p3713_p13), %s483_s23, 22960  }
  0x56   : > { %3489 = vsyncadd (%p3713_p13), %s483_s23, 4294944336  ;;  %s4520_s16 = sld [smem:[#allocation19_spill]]  ;;  %s2841_s29 = sshll.u32 %s508_s17, 8  ;;  %v609_v0 = vlaneseq  ;;  %v3543_v2 = vmov 0.0  }
  0x57   : > { %s2911_s12 = smul.u32 27, %s508_s17  ;;  %s4521_s7 = sld [smem:[#allocation25_spill]] }
  0x58   : > { %v610_v1 = vand.u32 127, %v609_v0  ;;  %s4522_s4 = sld [smem:[#allocation32_spill]]  ;;  %s3837_s22 = scalar_lea.vmem [#allocation10], %s2841_s29 }
  0x59   : > { %s4523_s8 = sld [smem:[#allocation33_spill]]  ;;  %s3839_s24 = scalar_lea.vmem [#allocation11], %s2911_s12 }
  0x5a   : > { %vm611_vm0 = vcmp.lt.s32.totalorder %v610_v1, 32  ;;  %s4524_s19 = sld [smem:[#allocation18_spill]] }
  0x5b   : > { %v3820_v3 = vsel %vm611_vm0, 1.0, %v3543_v2 }
  0x5c   : > { %p594_p7 = scmp.lt.s32.totalorder %s4520_s16, 1 }
  0x5e   : > { %s4547_s16 = smov (!%p594_p7, %s4520_s16), 1 }
  0x5f   : > { %s2912_s13 = smul.u32 24, %s4547_s16 }
  0x60   : > { %p2846_p5 = scmp.ne.s32.totalorder %s4524_s19, 0 }
  0x61   : > { %s3825_s3 = scalar_lea.vmem %s4521_s7, %s2912_s13  ;;  %s3830_s28 = scalar_lea.vmem %s4522_s4, %s2912_s13 }
  0x62   : > { %s3835_s26 = scalar_lea.vmem %s4523_s8, %s2912_s13  ;;  %617 = sbr.rel (%p2846_p5) target bundleno = 424 (0x1a8), region = 92 }
  0x63   : > { %s4525_s30 = sld [smem:[#allocation26_spill]] (!%p2846_p5) }
  0x67   : > { %v736_v4 = vld [vmem:[#allocation6 + $0x178] sm:$0xff]  ;;  %v735_v5 = vld [vmem:[#allocation6 + $0x170] sm:$0xff]  ;;  %v734_v9 = vld [vmem:[#allocation6 + $0x168] sm:$0xff]  ;;  %v3544_v24 = vmov 0   ;;  %v3855_v50 = vshrl.u32 %v609_v0, 7 }
  0x68   : > { %v661_v6 = vld [vmem:[#allocation6 + $0xf8] sm:$0xff]  ;;  %737 = vmatpush.msra.mxu2 %v736_v4  ;;  %v660_v8 = vld [vmem:[#allocation6 + $0xf0] sm:$0xff]  ;;  %v659_v11 = vld [vmem:[#allocation6 + $0xe8] sm:$0xff]  ;;  %3063 = vset.pattern.permute.xlu0 %v3544_v24 }
  0x69   : > { %662 = vmatpush.msra.mxu0 %v661_v6  ;;  %v645_v7 = vld [vmem:[#allocation6 + $0x78] sm:$0xff]  ;;  %v644_v10 = vld [vmem:[#allocation6 + $0x70] sm:$0xff]  ;;  %v643_v12 = vld [vmem:[#allocation6 + $0x68] sm:$0xff]  ;;  %3064 = vset.pattern.permute.xlu1 %v3544_v24  ;;  %vm717_vm1 = vcmp.lt.s32.totalorder %v3855_v50, 7  ;;  %vm626_vm2 = vcmp.lt.s32.totalorder %v3855_v50, 1 }
  0x6a   : > { %688 = vmatpush.msra.mxu1 %v645_v7  ;;  %738 = vmatpush.msra.mxu2 %v735_v5  ;;  %v733_v13 = vld [vmem:[#allocation6 + $0x160] sm:$0xff]  ;;  %v732_v16 = vld [vmem:[#allocation6 + $0x158] sm:$0xff]  ;;  %v731_v19 = vld [vmem:[#allocation6 + $0x150] sm:$0xff] }
  0x6b   : > { %663 = vmatpush.msra.mxu0 %v660_v8  ;;  %v658_v14 = vld [vmem:[#allocation6 + $0xe0] sm:$0xff]  ;;  %v657_v17 = vld [vmem:[#allocation6 + $0xd8] sm:$0xff]  ;;  %v656_v20 = vld [vmem:[#allocation6 + $0xd0] sm:$0xff] }
  0x6c   : > { %689 = vmatpush.msra.mxu1 %v644_v10  ;;  %739 = vmatpush.msra.mxu2 %v734_v9  ;;  %v642_v15 = vld [vmem:[#allocation6 + $0x60] sm:$0xff]  ;;  %v641_v18 = vld [vmem:[#allocation6 + $0x58] sm:$0xff]  ;;  %v640_v21 = vld [vmem:[#allocation6 + $0x50] sm:$0xff] }
  0x6d   : > { %664 = vmatpush.msra.mxu0 %v659_v11  ;;  %v730_v22 = vld [vmem:[#allocation6 + $0x148] sm:$0xff]  ;;  %v729_v26 = vld [vmem:[#allocation6 + $0x140] sm:$0xff]  ;;  %v728_v29 = vld [vmem:[#allocation6 + $0x138] sm:$0xff] }
  0x6e   : > { %690 = vmatpush.msra.mxu1 %v643_v12  ;;  %740 = vmatpush.msra.mxu2 %v733_v13  ;;  %v655_v23 = vld [vmem:[#allocation6 + $0xc8] sm:$0xff]  ;;  %v654_v27 = vld [vmem:[#allocation6 + $0xc0] sm:$0xff]  ;;  %v653_v30 = vld [vmem:[#allocation6 + $0xb8] sm:$0xff] }
  0x6f   : > { %665 = vmatpush.msra.mxu0 %v658_v14  ;;  %v639_v25 = vld [vmem:[#allocation6 + $0x48] sm:$0xff]  ;;  %v638_v28 = vld [vmem:[#allocation6 + $0x40] sm:$0xff]  ;;  %v637_v31 = vld [vmem:[#allocation6 + $0x38] sm:$0xff] }
  0x70   : > { %691 = vmatpush.msra.mxu1 %v642_v15  ;;  %741 = vmatpush.msra.mxu2 %v732_v16  ;;  %v727_v32 = vld [vmem:[#allocation6 + $0x130] sm:$0xff]  ;;  %v823_v36 = vld [vmem:[%s4525_s30 + $0x8] sm:$0xff]  ;;  %v788_v40 = vld [vmem:[#allocation6 + $0x278] sm:$0xff] }
  0x71   : > { %666 = vmatpush.msra.mxu0 %v657_v17  ;;  %v652_v33 = vld [vmem:[#allocation6 + $0xb0] sm:$0xff]  ;;  %v726_v37 = vld [vmem:[#allocation6 + $0x128] sm:$0xff]  ;;  %v725_v41 = vld [vmem:[#allocation6 + $0x120] sm:$0xff]  ;;  %832 = vperm.xlu1 %3064, %v823_v36  }
  0x72   : > { %692 = vmatpush.msra.mxu1 %v641_v18  ;;  %742 = vmatpush.msra.mxu2 %v731_v19  ;;  %v636_v34 = vld [vmem:[#allocation6 + $0x30] sm:$0xff]  ;;  %v651_v38 = vld [vmem:[#allocation6 + $0xa8] sm:$0xff]  ;;  %v650_v42 = vld [vmem:[#allocation6 + $0xa0] sm:$0xff] }
  0x73   : > { %667 = vmatpush.msra.mxu0 %v656_v20  ;;  %v824_v35 = vld [vmem:[%s4525_s30 + $0x10] sm:$0xff]  ;;  %v634_v43 = vld [vmem:[#allocation6 + $0x20] sm:$0xff]  ;;  %v724_v47 = vld [vmem:[#allocation6 + $0x118] sm:$0xff]  ;;  %793 = vmatpush.msra.mxu3 %v788_v40 }
  0x74   : > { %693 = vmatpush.msra.mxu1 %v640_v21  ;;  %743 = vmatpush.msra.mxu2 %v730_v22  ;;  %v635_v39 = vld [vmem:[#allocation6 + $0x28] sm:$0xff]  ;;  %v3849_v44 = vld [vmem:[%s3825_s3] sm:$0xff]  ;;  %v787_v46 = vld [vmem:[#allocation6 + $0x270] sm:$0xff] }
  0x75   : > { %668 = vmatpush.msra.mxu0 %v655_v23  ;;  %837 = vperm.xlu0 %3063, %v824_v35   ;;  %v3852_v45 = vld [vmem:[%s3825_s3 + $0x8] sm:$0xff]  ;;  %v723_v48 = vld [vmem:[#allocation6 + $0x110] sm:$0xff]  ;;  %v649_v49 = vld [vmem:[#allocation6 + $0x98] sm:$0xff]  ;;  %v714_v56 = vrot.slane %v3849_v44, 1  ;;  %v621_v61 = vrot.slane %v3849_v44, 7 }
  0x76   : > { %694 = vmatpush.msra.mxu1 %v639_v25  ;;  %744 = vmatpush.msra.mxu2 %v729_v26  ;;  %v633_v51 = vld [vmem:[#allocation6 + $0x18] sm:$0xff]  ;;  %v3858_v52 = vld [vmem:[%s3825_s3 + $0x10] sm:$0xff]  ;;  %v715_v57 = vrot.slane %v3852_v45, 1  ;;  %v785_v1 = vld [vmem:[#allocation6 + $0x260] sm:$0xff]  ;;  %v622_v13 = vrot.slane %v3852_v45, 7 }
  0x77   : > { %669 = vmatpush.msra.mxu0 %v654_v27  ;;  %v822_v53 = vld [vmem:[%s4525_s30] sm:$0xff]  ;;  %v648_v54 = vld [vmem:[#allocation6 + $0x90] sm:$0xff]  ;;  %794 = vmatpush.msra.mxu3 %v787_v46  ;;  %v786_v58 = vld [vmem:[#allocation6 + $0x268] sm:$0xff]  ;;  %v623_v62 = vrot.slane %v3858_v52, 7  ;;  %v716_v10 = vrot.slane %v3858_v52, 1 }
  0x78   : > { %695 = vmatpush.msra.mxu1 %v638_v28  ;;  %745 = vmatpush.msra.mxu2 %v728_v29  ;;  %v632_v55 = vld [vmem:[#allocation6 + $0x10] sm:$0xff]  ;;  %v722_v59 = vld [vmem:[#allocation6 + $0x108] sm:$0xff]  ;;  %v721_v2 = vld [vmem:[#allocation6 + $0x100] sm:$0xff]  ;;  %v719_v5 = vsel %vm717_vm1, %v714_v56, %v715_v57  ;;  %v628_v18 = vsel %vm626_vm2, %v621_v61, %v622_v13 }
  0x79   : > { %670 = vmatpush.msra.mxu0 %v653_v30  ;;  %v647_v60 = vld [vmem:[#allocation6 + $0x88] sm:$0xff]  ;;  %v646_v4 = vld [vmem:[#allocation6 + $0x80] sm:$0xff]  ;;  %795 = vmatpush.msra.mxu3 %v786_v58  ;;  %v629_v7 = vsel %vm626_vm2, %v623_v62, %v621_v61  ;;  %v858_v8 = vld [vmem:[#allocation6 + $0x1f8] sm:$0xff]  ;;  %v718_v16 = vsel %vm717_vm1, %v715_v57, %v716_v10  ;;  %v720_v25 = vsel %vm717_vm1, %v716_v10, %v714_v56 }
  0x7a   : > { %696 = vmatpush.msra.mxu1 %v637_v31  ;;  %746 = vmatpush.msra.mxu2 %v727_v32  ;;  %v631_v63 = vld [vmem:[#allocation6 + $0x8] sm:$0xff]  ;;  %v630_v6 = vld [vmem:[#allocation6] sm:$0xff]  ;;  %v784_v9 = vld [vmem:[#allocation6 + $0x258] sm:$0xff]  ;;  %v627_v27 = vsel %vm626_vm2, %v622_v13, %v623_v62 }
  0x7b   : > { %671 = vmatpush.msra.mxu0 %v652_v33  ;;  %796 = vmatpush.msra.mxu3 %v785_v1  ;;  %v857_v11 = vld [vmem:[#allocation6 + $0x1f0] sm:$0xff]  ;;  %v856_v14 = vld [vmem:[#allocation6 + $0x1e8] sm:$0xff]  ;;  %v855_v17 = vld [vmem:[#allocation6 + $0x1e0] sm:$0xff] }
  0x7c   : > { %697 = vmatpush.msra.mxu1 %v636_v34  ;;  %747 = vmatpush.msra.mxu2 %v726_v37  ;;  %v783_v12 = vld [vmem:[#allocation6 + $0x250] sm:$0xff]  ;;  %v782_v15 = vld [vmem:[#allocation6 + $0x248] sm:$0xff]  ;;  %v854_v19 = vld [vmem:[#allocation6 + $0x1d8] sm:$0xff] }
  0x7d   : > { %672 = vmatpush.msra.mxu0 %v651_v38  ;;  %827 = vperm.xlu0 %3063, %v822_v53   ;;  %v781_v20 = vld [vmem:[#allocation6 + $0x240] sm:$0xff]  ;;  %v853_v21 = vld [vmem:[#allocation6 + $0x1d0] sm:$0xff]  ;;  %v780_v22 = vld [vmem:[#allocation6 + $0x238] sm:$0xff] }
  0x7e   : > { %698 = vmatpush.msra.mxu1 %v635_v39  ;;  %748 = vmatpush.msra.mxu2 %v725_v41  ;;  %v852_v23 = vld [vmem:[#allocation6 + $0x1c8] sm:$0xff]  ;;  %v779_v24 = vld [vmem:[#allocation6 + $0x230] sm:$0xff]  ;;  %v851_v26 = vld [vmem:[#allocation6 + $0x1c0] sm:$0xff] }
  0x7f   : > { %673 = vmatpush.msra.mxu0 %v650_v42  ;;  %797 = vmatpush.msra.mxu3 %v784_v9  ;;  %v850_v28 = vld [vmem:[#allocation6 + $0x1b8] sm:$0xff]  ;;  %v778_v29 = vld [vmem:[#allocation6 + $0x228] sm:$0xff]  ;;  %v849_v30 = vld [vmem:[#allocation6 + $0x1b0] sm:$0xff] }
  0x80   : > { %699 = vmatpush.msra.mxu1 %v634_v43  ;;  %749 = vmatpush.msra.mxu2 %v724_v47  ;;  %v777_v31 = vld [vmem:[#allocation6 + $0x220] sm:$0xff]  ;;  %v848_v32 = vld [vmem:[#allocation6 + $0x1a8] sm:$0xff]  ;;  %v776_v33 = vld [vmem:[#allocation6 + $0x218] sm:$0xff] }
  0x81   : > { %674 = vmatpush.msra.mxu0 %v649_v49  ;;  %798 = vmatpush.msra.mxu3 %v783_v12  ;;  %v847_v34 = vld [vmem:[#allocation6 + $0x1a0] sm:$0xff]  ;;  %v775_v35 = vld [vmem:[#allocation6 + $0x210] sm:$0xff]  ;;  %v846_v36 = vld [vmem:[#allocation6 + $0x198] sm:$0xff] }
  0x82   : > { %700 = vmatpush.msra.mxu1 %v633_v51  ;;  %750 = vmatpush.msra.mxu2 %v723_v48  ;;  %v774_v37 = vld [vmem:[#allocation6 + $0x208] sm:$0xff]  ;;  %v845_v38 = vld [vmem:[#allocation6 + $0x190] sm:$0xff]  ;;  %v773_v39 = vld [vmem:[#allocation6 + $0x200] sm:$0xff] }
  0x83   : > { %675 = vmatpush.msra.mxu0 %v648_v54  ;;  %799 = vmatpush.msra.mxu3 %v782_v15  ;;  %v844_v40 = vld [vmem:[#allocation6 + $0x188] sm:$0xff]  ;;  %v843_v41 = vld [vmem:[#allocation6 + $0x180] sm:$0xff] }
  0x84   : > { %701 = vmatpush.msra.mxu1 %v632_v55  ;;  %751 = vmatpush.msra.mxu2 %v722_v59  ;;  %v3065_v46 = vld [vmem:[#allocation7] ss:$0 sm:$0xff] }
  0x85   : > { %676 = vmatpush.msra.mxu0 %v647_v60  ;;  %800 = vmatpush.msra.mxu3 %v781_v20 }
  0x86   : > { %702 = vmatpush.msra.mxu1 %v631_v63  ;;  %752 = vmatpush.msra.mxu2 %v721_v2 }
  0x87   : > { %677 = vmatpush.msra.mxu0 %v646_v4  ;;  %753 = vmatmul.f32.vlgmr.msra.gmra.mxu2 %v719_v5  ;;  %v3066_v5 = vld [vmem:[#allocation7 + $0x1] ss:$0 sm:$0xff] }
  0x88   : > { %703 = vmatpush.msra.mxu1 %v630_v6  ;;  %678 = vmatmul.f32.vlgmr.msra.gmra.mxu0 %v3849_v44 }
  0x89   : > { %704 = vmatmul.f32.vlgmr.msra.gmra.mxu1 %v629_v7  ;;  %863 = vmatpush.msrb.mxu0 %v858_v8 }
  0x8a   : > { %2874 = vmatpush.msrb.mxu1 %v858_v8  ;;  %2875 = vmatpush.msrb.mxu2 %v858_v8  ;;  %v3067_v8 = vld [vmem:[#allocation7 + $0x2] ss:$0 sm:$0xff] }
  0x8b   : > { %864 = vmatpush.msrb.mxu0 %v857_v11  ;;  %801 = vmatpush.msra.mxu3 %v780_v22 }
  0x8c   : > { %2876 = vmatpush.msrb.mxu1 %v857_v11  ;;  %2877 = vmatpush.msrb.mxu2 %v857_v11 }
  0x8d   : > { %865 = vmatpush.msrb.mxu0 %v856_v14  ;;  %802 = vmatpush.msra.mxu3 %v779_v24 }
  0x8e   : > { %2878 = vmatpush.msrb.mxu1 %v856_v14  ;;  %2879 = vmatpush.msrb.mxu2 %v856_v14 }
  0x8f   : > { %756 = vmatmul.f32.gmra.mxu2 %v718_v16  ;;  %866 = vmatpush.msrb.mxu0 %v855_v17 }
  0x90   : > { %681 = vmatmul.f32.gmra.mxu0 %v3852_v45  ;;  %2880 = vmatpush.msrb.mxu1 %v855_v17 }
  0x91   : > { %707 = vmatmul.f32.gmra.mxu1 %v628_v18  ;;  %867 = vmatpush.msrb.mxu0 %v854_v19 }
  0x92   : > { %2881 = vmatpush.msrb.mxu2 %v855_v17  ;;  %2882 = vmatpush.msrb.mxu1 %v854_v19 }
  0x93   : > { %868 = vmatpush.msrb.mxu0 %v853_v21  ;;  %803 = vmatpush.msra.mxu3 %v778_v29 }
  0x94   : > { %2883 = vmatpush.msrb.mxu2 %v854_v19  ;;  %2884 = vmatpush.msrb.mxu1 %v853_v21 }
  0x95   : > { %869 = vmatpush.msrb.mxu0 %v852_v23  ;;  %804 = vmatpush.msra.mxu3 %v777_v31 }
  0x96   : > { %2885 = vmatpush.msrb.mxu2 %v853_v21  ;;  %2886 = vmatpush.msrb.mxu1 %v852_v23 }
  0x97   : > { %759 = vmatmul.f32.gmra.mxu2 %v720_v25  ;;  %870 = vmatpush.msrb.mxu0 %v851_v26 }
  0x98   : > { %684 = vmatmul.f32.gmra.mxu0 %v3858_v52  ;;  %2887 = vmatpush.msrb.mxu2 %v852_v23 }
  0x99   : > { %710 = vmatmul.f32.gmra.mxu1 %v627_v27  ;;  %871 = vmatpush.msrb.mxu0 %v850_v28 }
  0x9a   : > { %2888 = vmatpush.msrb.mxu1 %v851_v26  ;;  %2889 = vmatpush.msrb.mxu2 %v851_v26 }
  0x9b   : > { %872 = vmatpush.msrb.mxu0 %v849_v30  ;;  %805 = vmatpush.msra.mxu3 %v776_v33 }
  0x9c   : > { %2890 = vmatpush.msrb.mxu1 %v850_v28  ;;  %2891 = vmatpush.msrb.mxu2 %v850_v28 }
  0x9d   : > { %873 = vmatpush.msrb.mxu0 %v848_v32  ;;  %806 = vmatpush.msra.mxu3 %v775_v35 }
  0x9e   : > { %2892 = vmatpush.msrb.mxu1 %v849_v30  ;;  %2893 = vmatpush.msrb.mxu2 %v849_v30 }
  0x9f   : > { %874 = vmatpush.msrb.mxu0 %v847_v34  ;;  %807 = vmatpush.msra.mxu3 %v774_v37 }
  0xa0   : > { %2894 = vmatpush.msrb.mxu1 %v848_v32  ;;  %2895 = vmatpush.msrb.mxu2 %v848_v32 }
  0xa1   : > { %875 = vmatpush.msrb.mxu0 %v846_v36  ;;  %808 = vmatpush.msra.mxu3 %v773_v39 }
  0xa2   : > { %2896 = vmatpush.msrb.mxu1 %v847_v34  ;;  %2897 = vmatpush.msrb.mxu2 %v847_v34 }
  0xa3   : > { %876 = vmatpush.msrb.mxu0 %v845_v38 }
  0xa4   : > { %2898 = vmatpush.msrb.mxu1 %v846_v36  ;;  %2899 = vmatpush.msrb.mxu2 %v846_v36 }
  0xa5   : > { %877 = vmatpush.msrb.mxu0 %v844_v40 }
  0xa6   : > { %2900 = vmatpush.msrb.mxu1 %v845_v38  ;;  %2901 = vmatpush.msrb.mxu2 %v845_v38 }
  0xa7   : > { %878 = vmatpush.msrb.mxu0 %v843_v41 }
  0xa8   : > { %2902 = vmatpush.msrb.mxu1 %v844_v40  ;;  %2903 = vmatpush.msrb.mxu2 %v844_v40 }
  0xaa   : > { %2904 = vmatpush.msrb.mxu1 %v843_v41  ;;  %2905 = vmatpush.msrb.mxu2 %v843_v41 }
  0xe3   : > { %v833_v57 = vpop.permute.xlu1 %832 }
  0xe7   : > { %v838_v42 = vpop.permute.xlu0 %837 }
  0xef   : > { %v828_v49 = vpop.permute.xlu0 %827 }
 0x105   : > { %v679_v43 = vpop.f32.mrf.mxu0 }
 0x106   : > { %v705_v44 = vpop.f32.mrf.mxu1 }
 0x107   : > { %v706_v45 = vadd.f32 %v705_v44, %v679_v43 }
 0x10a   : > { %v754_v47 = vpop.f32.mrf.mxu2 }
 0x10b   : > { %v763_v48 = vadd.f32 %v754_v47, %v706_v45 }
 0x10d   : > { %v770_v50 = vadd.f32 %v3065_v46, %v763_v48  ;;  %v682_v51 = vpop.f32.mrf.mxu0 }
 0x10e   : > { %v708_v52 = vpop.f32.mrf.mxu1 }
 0x10f   : > { %v840_v53 = vmul.f32 %v828_v49, %v770_v50  ;;  %809 = vmatmul.f32.vlgmr.msra.gmra.mxu3 %v770_v50  ;;  %v709_v54 = vadd.f32 %v708_v52, %v682_v51 }
 0x111   : > { %879 = vmatmul.f32.vlgmr.msrb.gmra.mxu0 %v840_v53 }
 0x112   : > { %v757_v55 = vpop.f32.mrf.mxu2 }
 0x113   : > { %v764_v56 = vadd.f32 %v757_v55, %v709_v54 }
 0x115   : > { %v771_v58 = vadd.f32 %v3065_v46, %v764_v56  ;;  %v685_v59 = vpop.f32.mrf.mxu0 }
 0x116   : > { %v711_v60 = vpop.f32.mrf.mxu1 }
 0x117   : > { %v841_v61 = vmul.f32 %v833_v57, %v771_v58  ;;  %812 = vmatmul.f32.gmra.mxu3 %v771_v58  ;;  %v712_v62 = vadd.f32 %v711_v60, %v685_v59 }
 0x119   : > { %882 = vmatmul.f32.vlgmr.msrb.gmra.mxu1 %v841_v61 }
 0x11a   : > { %v760_v63 = vpop.f32.mrf.mxu2 }
 0x11b   : > { %v765_v1 = vadd.f32 %v760_v63, %v712_v62 }
 0x11d   : > { %v772_v2 = vadd.f32 %v3065_v46, %v765_v1 }
 0x11f   : > { %815 = vmatmul.f32.gmra.mxu3 %v772_v2  ;;  %v842_v4 = vmul.f32 %v838_v42, %v772_v2 }
 0x121   : > { %885 = vmatmul.f32.vlgmr.msrb.gmra.mxu2 %v842_v4 }
 0x18e   : > { %v880_v6 = vpop.f32.mrf.mxu0 }
 0x18f   : > { %v881_v7 = vadd.f32 %v3066_v5, %v880_v6 }
 0x191   : > { %889 = vst [vmem:[%s3830_s28] sm:$0xff] %v881_v7 }
 0x192   : > { %v810_v9 = vpop.f32.mrf.mxu3 }
 0x193   : > { %v811_v10 = vadd.f32 %v3067_v8, %v810_v9 }
 0x195   : > { %819 = vst [vmem:[%s3835_s26] sm:$0xff] %v811_v10 }
 0x196   : > { %v883_v11 = vpop.f32.mrf.mxu1 }
 0x197   : > { %v884_v12 = vadd.f32 %v3066_v5, %v883_v11 }
 0x199   : > { %890 = vst [vmem:[%s3830_s28 + $0x8] sm:$0xff] %v884_v12 }
 0x19a   : > { %v813_v13 = vpop.f32.mrf.mxu3 }
 0x19b   : > { %v814_v14 = vadd.f32 %v3067_v8, %v813_v13 }
 0x19d   : > { %820 = vst [vmem:[%s3835_s26 + $0x8] sm:$0xff] %v814_v14 }
 0x1a2   : > { %v816_v15 = vpop.f32.mrf.mxu3 }
 0x1a3   : > { %v817_v16 = vadd.f32 %v3067_v8, %v816_v15 }
 0x1a4   : > { %v886_v17 = vpop.f32.mrf.mxu2 }
 0x1a5   : > { %821 = vst [vmem:[%s3835_s26 + $0x10] sm:$0xff] %v817_v16  ;;  %v887_v18 = vadd.f32 %v3066_v5, %v886_v17 }
 0x1a7   : > { %891 = vst [vmem:[%s3830_s28 + $0x10] sm:$0xff] %v887_v18 }
 0x1a8 PF: > { %v3901_v19 = vld [vmem:[%s3830_s28] sm:$0xff]  ;;  %v3909_v21 = vld [vmem:[%s3830_s28 + $0x8] sm:$0xff]  ;;  %v986_v23 = vld [vmem:[%s3811_s2 + $0x3f0] sm:$0xff]  ;;  %s4526_s0 = sld [smem:[#allocation27_spill]] }
 0x1a9   : > { %897 = vadd.xlane.f32.xlu0 %v3901_v19  ;;  %v987_v22 = vld [vmem:[%s3811_s2 + $0x438] sm:$0xff]  ;;  %v985_v39 = vld [vmem:[%s3811_s2 + $0x3a8] sm:$0xff]  ;;  %v984_v40 = vld [vmem:[%s3811_s2 + $0x360] sm:$0xff] }
 0x1aa   : > { %992 = vmatpush.msra.mxu0 %v987_v22  ;;  %v983_v41 = vld [vmem:[%s3811_s2 + $0x318] sm:$0xff]  ;;  %v982_v42 = vld [vmem:[%s3811_s2 + $0x2d0] sm:$0xff]  ;;  %v981_v43 = vld [vmem:[%s3811_s2 + $0x288] sm:$0xff] }
 0x1ab   : > { %v980_v44 = vld [vmem:[%s3811_s2 + $0x240] sm:$0xff]  ;;  %v979_v45 = vld [vmem:[%s3811_s2 + $0x1f8] sm:$0xff]  ;;  %v978_v46 = vld [vmem:[%s3811_s2 + $0x1b0] sm:$0xff] }
 0x1ac   : > { %993 = vmatpush.msra.mxu0 %v986_v23  ;;  %v977_v47 = vld [vmem:[%s3811_s2 + $0x168] sm:$0xff]  ;;  %v976_v48 = vld [vmem:[%s3811_s2 + $0x120] sm:$0xff]  ;;  %v975_v49 = vld [vmem:[%s3811_s2 + $0xd8] sm:$0xff] }
 0x1ad   : > { %v974_v50 = vld [vmem:[%s3811_s2 + $0x90] sm:$0xff]  ;;  %v973_v51 = vld [vmem:[%s3811_s2 + $0x48] sm:$0xff]  ;;  %v972_v52 = vld [vmem:[%s3811_s2] sm:$0xff] }
 0x1ae   : > { %v3904_v20 = vld [vmem:[%s3830_s28 + $0x10] sm:$0xff]  ;;  %994 = vmatpush.msra.mxu0 %v985_v39  ;;  %v3071_v8 = vld [vmem:[%s3839_s24] ss:$0 sm:$0xff]  ;;  %v3072_v12 = vld [vmem:[%s3839_s24 + $0x1] ss:$0 sm:$0xff] }
 0x1af   : > { %901 = vadd.xlane.f32.xlu1 %v3904_v20  ;;  %v1090_v39 = vld [vmem:[%s3837_s22 + $0xc0] sm:$0xff] }
 0x1b0   : > { %995 = vmatpush.msra.mxu0 %v984_v40  ;;  %v1089_v40 = vld [vmem:[%s3837_s22 + $0xb0] sm:$0xff] }
 0x1b1   : > { %899 = vadd.xlane.f32.xlu0 %v3909_v21 }
 0x1b2   : > { %996 = vmatpush.msra.mxu0 %v983_v41  ;;  %v1087_v41 = vld [vmem:[%s3837_s22 + $0x90] sm:$0xff] }
 0x1b4   : > { %997 = vmatpush.msra.mxu0 %v982_v42  ;;  %v1086_v42 = vld [vmem:[%s3837_s22 + $0x80] sm:$0xff] }
 0x1b6   : > { %998 = vmatpush.msra.mxu0 %v981_v43  ;;  %v1085_v43 = vld [vmem:[%s3837_s22 + $0x70] sm:$0xff] }
 0x1b8   : > { %999 = vmatpush.msra.mxu0 %v980_v44  ;;  %v1084_v44 = vld [vmem:[%s3837_s22 + $0x60] sm:$0xff] }
 0x1ba   : > { %1000 = vmatpush.msra.mxu0 %v979_v45  ;;  %v1083_v45 = vld [vmem:[%s3837_s22 + $0x50] sm:$0xff] }
 0x1bc   : > { %1001 = vmatpush.msra.mxu0 %v978_v46  ;;  %v1082_v46 = vld [vmem:[%s3837_s22 + $0x40] sm:$0xff] }
 0x1be   : > { %1002 = vmatpush.msra.mxu0 %v977_v47  ;;  %v1081_v47 = vld [vmem:[%s3837_s22 + $0x30] sm:$0xff] }
 0x1c0   : > { %1003 = vmatpush.msra.mxu0 %v976_v48  ;;  %v1080_v48 = vld [vmem:[%s3837_s22 + $0x20] sm:$0xff] }
 0x1c2   : > { %1004 = vmatpush.msra.mxu0 %v975_v49  ;;  %v3073_v49 = vld [vmem:[%s3839_s24 + $0x2] ss:$0 sm:$0xff] }
 0x1c4   : > { %1005 = vmatpush.msra.mxu0 %v974_v50  ;;  %v1079_v50 = vld [vmem:[%s3837_s22 + $0x10] sm:$0xff] }
 0x1c6   : > { %1006 = vmatpush.msra.mxu0 %v973_v51  ;;  %v1078_v51 = vld [vmem:[%s3837_s22] sm:$0xff] }
 0x1c8   : > { %1007 = vmatpush.msra.mxu0 %v972_v52 }
 0x21c   : > { %v898_v24 = vpop.xlane.xlu0 %897 }
 0x21d   : > { %v903_v25 = vmul.f32 0.03125, %v898_v24 }
 0x21f   : > { %v906_v26 = vsub.f32 %v3901_v19, %v903_v25 }
 0x221   : > { %v3916_v27 = vmul.f32 %v3820_v3, %v906_v26 }
 0x222   : > { %v902_v28 = vpop.xlane.xlu1 %901 }
 0x223   : > { %v912_v29 = vmul.f32 %v3916_v27, %v3916_v27  ;;  %v905_v32 = vmul.f32 0.03125, %v902_v28 }
 0x224   : > { %v900_v30 = vpop.xlane.xlu0 %899 }
 0x225   : > { %v904_v31 = vmul.f32 0.03125, %v900_v30  ;;  %915 = vadd.xlane.f32.xlu1 %v912_v29  ;;  %v908_v34 = vsub.f32 %v3904_v20, %v905_v32 }
 0x227   : > { %v907_v33 = vsub.f32 %v3909_v21, %v904_v31  ;;  %v3928_v37 = vmul.f32 %v3820_v3, %v908_v34 }
 0x229   : > { %v3923_v35 = vmul.f32 %v3820_v3, %v907_v33  ;;  %v914_v38 = vmul.f32 %v3928_v37, %v3928_v37 }
 0x22b   : > { %v913_v36 = vmul.f32 %v3923_v35, %v3923_v35 }
 0x22d   : > { %917 = vadd.xlane.f32.xlu2 %v913_v36  ;;  %v1092_v36 = vld [vmem:[%s3837_s22 + $0xe0] sm:$0xff] }
 0x235   : > { %919 = vadd.xlane.f32.xlu2 %v914_v38  ;;  %v1091_v38 = vld [vmem:[%s3837_s22 + $0xd0] sm:$0xff] }
 0x298   : > { %v916_v53 = vpop.xlane.xlu1 %915 }
 0x299   : > { %v921_v54 = vmul.f32 0.03125, %v916_v53 }
 0x29b   : > { %v924_v55 = vadd.f32 1e-05, %v921_v54 }
 0x29d   : > { %3094 = vrsqrt.f32 %v924_v55  ;;  %vm933_vm4 = vweird.f32 %v924_v55 }
 0x2a0   : > { %v918_v56 = vpop.xlane.xlu2 %917 }
 0x2a1   : > { %v922_v57 = vmul.f32 0.03125, %v918_v56 }
 0x2a3   : > { %v3095_v58 = vpop.eup %3094  ;;  %v925_v59 = vadd.f32 1e-05, %v922_v57 }
 0x2a4   : > { %v928_v60 = vmul.f32 %v3095_v58, %v924_v55  ;;  %vm934_vm3 = vweird.f32 %v3095_v58 }
 0x2a5   : > { %3096 = vrsqrt.f32 %v925_v59  ;;  %vm935_vm5 = vmor %vm933_vm4, %vm934_vm3  ;;  %vm943_vm7 = vweird.f32 %v925_v59 }
 0x2a6   : > { %v929_v61 = vmul.f32 %v3095_v58, %v928_v60 }
 0x2a8   : > { %v930_v62 = vmul.f32 0.5, %v929_v61  ;;  %v920_v63 = vpop.xlane.xlu2 %919 }
 0x2a9   : > { %v923_v1 = vmul.f32 0.03125, %v920_v63 }
 0x2aa   : > { %v931_v2 = vsub.f32 1.5, %v930_v62 }
 0x2ab   : > { %v3097_v4 = vpop.eup %3096  ;;  %v926_v5 = vadd.f32 1e-05, %v923_v1 }
 0x2ac   : > { %v932_v6 = vmul.f32 %v3095_v58, %v931_v2  ;;  %v938_v7 = vmul.f32 %v3097_v4, %v925_v59  ;;  %vm944_vm6 = vweird.f32 %v3097_v4 }
 0x2ad   : > { %3098 = vrsqrt.f32 %v926_v5  ;;  %vm945_vm8 = vmor %vm943_vm7, %vm944_vm6  ;;  %vm953_vm10 = vweird.f32 %v926_v5 }
 0x2ae   : > { %v939_v9 = vmul.f32 %v3097_v4, %v938_v7  ;;  %v936_v10 = vsel %vm935_vm5, %v3095_v58, %v932_v6 }
 0x2af   : > { %v957_v11 = vmul.f32 %v936_v10, %v3916_v27 }
 0x2b0   : > { %v940_v13 = vmul.f32 0.5, %v939_v9 }
 0x2b1   : > { %v963_v14 = vmul.f32 %v3071_v8, %v957_v11 }
 0x2b2   : > { %v941_v15 = vsub.f32 1.5, %v940_v13 }
 0x2b3   : > { %v3099_v16 = vpop.eup %3098  ;;  %v969_v17 = vadd.f32 %v3072_v12, %v963_v14 }
 0x2b4   : > { %v942_v18 = vmul.f32 %v3097_v4, %v941_v15  ;;  %v948_v22 = vmul.f32 %v3099_v16, %v926_v5  ;;  %vm954_vm9 = vweird.f32 %v3099_v16 }
 0x2b5   : > { %1008 = vmatmul.f32.vlgmr.msra.gmra.mxu0 %v969_v17  ;;  %vm955_vm11 = vmor %vm953_vm10, %vm954_vm9 }
 0x2b6   : > { %v949_v23 = vmul.f32 %v3099_v16, %v948_v22  ;;  %v946_v24 = vsel %vm945_vm8, %v3097_v4, %v942_v18 }
 0x2b7   : > { %v958_v25 = vmul.f32 %v946_v24, %v3923_v35  ;;  %v1093_v35 = vld [vmem:[%s3837_s22 + $0xf0] sm:$0xff] }
 0x2b8   : > { %v950_v26 = vmul.f32 0.5, %v949_v23  ;;  %1098 = vmatpush.msra.mxu1 %v1093_v35 }
 0x2b9   : > { %v964_v27 = vmul.f32 %v3071_v8, %v958_v25 }
 0x2ba   : > { %v951_v28 = vsub.f32 1.5, %v950_v26  ;;  %1099 = vmatpush.msra.mxu1 %v1092_v36 }
 0x2bb   : > { %v970_v29 = vadd.f32 %v3072_v12, %v964_v27 }
 0x2bc   : > { %v952_v30 = vmul.f32 %v3099_v16, %v951_v28  ;;  %1100 = vmatpush.msra.mxu1 %v1091_v38 }
 0x2bd   : > { %1011 = vmatmul.f32.gmra.mxu0 %v970_v29 }
 0x2be   : > { %v956_v31 = vsel %vm955_vm11, %v3099_v16, %v952_v30  ;;  %1101 = vmatpush.msra.mxu1 %v1090_v39 }
 0x2bf   : > { %v959_v32 = vmul.f32 %v956_v31, %v3928_v37  ;;  %v1088_v37 = vld [vmem:[%s3837_s22 + $0xa0] sm:$0xff] }
 0x2c0   : > { %1102 = vmatpush.msra.mxu1 %v1089_v40 }
 0x2c1   : > { %v965_v33 = vmul.f32 %v3071_v8, %v959_v32 }
 0x2c2   : > { %1103 = vmatpush.msra.mxu1 %v1088_v37 }
 0x2c3   : > { %v971_v34 = vadd.f32 %v3072_v12, %v965_v33 }
 0x2c4   : > { %1104 = vmatpush.msra.mxu1 %v1087_v41  ;;  %v3074_v41 = vld [vmem:[%s3839_s24 + $0x3] ss:$0 sm:$0xff] }
 0x2c5   : > { %1014 = vmatmul.f32.gmra.mxu0 %v971_v34 }
 0x2c6   : > { %1105 = vmatpush.msra.mxu1 %v1086_v42 }
 0x2c8   : > { %1106 = vmatpush.msra.mxu1 %v1085_v43 }
 0x2ca   : > { %1107 = vmatpush.msra.mxu1 %v1084_v44 }
 0x2cc   : > { %1108 = vmatpush.msra.mxu1 %v1083_v45 }
 0x2ce   : > { %1109 = vmatpush.msra.mxu1 %v1082_v46 }
 0x2d0   : > { %1110 = vmatpush.msra.mxu1 %v1081_v47 }
 0x2d2   : > { %1111 = vmatpush.msra.mxu1 %v1080_v48 }
 0x2d4   : > { %1112 = vmatpush.msra.mxu1 %v1079_v50 }
 0x2d6   : > { %1113 = vmatpush.msra.mxu1 %v1078_v51 }
 0x332   : > { %v1009_v52 = vpop.f32.mrf.mxu0 }
 0x333   : > { %v1010_v53 = vadd.f32 %v3073_v49, %v1009_v52 }
 0x335   : > { %v2847_v54 = vmul.f32 -1.442695, %v1010_v53 }
 0x337   : > { %3100 = vpow2.f32 %v2847_v54  ;;  %v1253_v54 = vld [vmem:[%s3811_s2 + $0x448] sm:$0xff] }
 0x338   : > { %1289 = vmatpush.msra.mxu3 %v1253_v54  ;;  %v1207_v54 = vld [vmem:[%s3811_s2 + $0x8] sm:$0xff] }
 0x33a   : > { %v1012_v55 = vpop.f32.mrf.mxu0 }
 0x33b   : > { %v1013_v56 = vadd.f32 %v3073_v49, %v1012_v55  ;;  %v1254_v55 = vld [vmem:[%s3811_s2 + $0x450] sm:$0xff] }
 0x33c   : > { %1315 = vmatpush.msrb.mxu0 %v1254_v55  ;;  %v1208_v55 = vld [vmem:[%s3811_s2 + $0x10] sm:$0xff] }
 0x33d   : > { %v3101_v57 = vpop.eup %3100  ;;  %v2848_v58 = vmul.f32 -1.442695, %v1013_v56 }
 0x33e   : > { %v1027_v59 = vadd.f32 1.0, %v3101_v57  ;;  %v1250_v57 = vld [vmem:[%s3811_s2 + $0x400] sm:$0xff] }
 0x33f   : > { %3102 = vpow2.f32 %v2848_v58  ;;  %v1251_v58 = vld [vmem:[%s3811_s2 + $0x408] sm:$0xff]  ;;  %1290 = vmatpush.msra.mxu3 %v1250_v57 }
 0x340   : > { %3104 = vrcp.f32 %v1027_v59  ;;  %v1041_v6 = vand.u32 2147483648, %v1027_v59  ;;  %v1039_v8 = vand.u32 2147483647, %v1027_v59  ;;  %vm1035_vm13 = vweird.f32 %v1027_v59  ;;  %1316 = vmatpush.msrb.mxu0 %v1251_v58 }
 0x342   : > { %v1015_v60 = vpop.f32.mrf.mxu0  ;;  %v1042_v13 = vor.u32 1.1754944e-38, %v1041_v6  ;;  %vm1040_vm15 = vcmp.eq.f32.partialorder %v1039_v8, 8.507059e+37 }
 0x343   : > { %v1016_v61 = vadd.f32 %v3073_v49, %v1015_v60 }
 0x345   : > { %v3103_v62 = vpop.eup %3102  ;;  %v2849_v63 = vmul.f32 -1.442695, %v1016_v61 }
 0x346   : > { %v3105_v1 = vpop.eup %3104  ;;  %v1028_v2 = vadd.f32 1.0, %v3103_v62 }
 0x347   : > { %3106 = vpow2.f32 %v2849_v63  ;;  %v1031_v4 = vmul.f32 %v3105_v1, %v1027_v59  ;;  %vm1036_vm12 = vweird.f32 %v3105_v1 }
 0x348   : > { %3108 = vrcp.f32 %v1028_v2  ;;  %vm1037_vm14 = vmor %vm1035_vm13, %vm1036_vm12  ;;  %v1056_v22 = vand.u32 2147483648, %v1028_v2  ;;  %v1054_v24 = vand.u32 2147483647, %v1028_v2  ;;  %vm1050_vm1 = vweird.f32 %v1028_v2 }
 0x349   : > { %v1032_v5 = vsub.f32 1.0, %v1031_v4 }
 0x34a   : > { %v1057_v27 = vor.u32 1.1754944e-38, %v1056_v22  ;;  %vm1055_vm3 = vcmp.eq.f32.partialorder %v1054_v24, 8.507059e+37  ;;  %v1237_v22 = vld [vmem:[%s3811_s2 + $0x2d8] sm:$0xff]  ;;  %v1239_v24 = vld [vmem:[%s3811_s2 + $0x2e8] sm:$0xff] }
 0x34b   : > { %v1033_v7 = vmul.f32 %v3105_v1, %v1032_v5 }
 0x34d   : > { %v3107_v9 = vpop.eup %3106  ;;  %v1034_v10 = vadd.f32 %v3105_v1, %v1033_v7 }
 0x34e   : > { %v3109_v11 = vpop.eup %3108  ;;  %v1029_v12 = vadd.f32 1.0, %v3107_v9 }
 0x34f   : > { %v1038_v14 = vsel %vm1037_vm14, %v3105_v1, %v1034_v10  ;;  %v1046_v15 = vmul.f32 %v3109_v11, %v1028_v2  ;;  %vm1051_vm0 = vweird.f32 %v3109_v11  ;;  %v1246_v10 = vld [vmem:[%s3811_s2 + $0x3b0] sm:$0xff] }
 0x350   : > { %3110 = vrcp.f32 %v1029_v12  ;;  %v1043_v16 = vsel %vm1040_vm15, %v1042_v13, %v1038_v14  ;;  %vm1052_vm2 = vmor %vm1050_vm1, %vm1051_vm0  ;;  %v1071_v33 = vand.u32 2147483648, %v1029_v12  ;;  %v1069_v35 = vand.u32 2147483647, %v1029_v12  ;;  %v1243_v13 = vld [vmem:[%s3811_s2 + $0x368] sm:$0xff]  ;;  %v1244_v14 = vld [vmem:[%s3811_s2 + $0x370] sm:$0xff] }
 0x351   : > { %v1075_v17 = vmul.f32 %v1043_v16, %v1010_v53  ;;  %v1047_v18 = vsub.f32 1.0, %v1046_v15  ;;  %vm1065_vm5 = vweird.f32 %v1029_v12  ;;  %v1245_v15 = vld [vmem:[%s3811_s2 + $0x378] sm:$0xff]  ;;  %v1240_v16 = vld [vmem:[%s3811_s2 + $0x320] sm:$0xff]  ;;  %vm1425_vm1 = vcmask 195584  }
 0x352   : > { %v1072_v38 = vor.u32 1.1754944e-38, %v1071_v33  ;;  %vm1070_vm7 = vcmp.eq.f32.partialorder %v1069_v35, 8.507059e+37  ;;  %v1230_v33 = vld [vmem:[%s3811_s2 + $0x210] sm:$0xff]  ;;  %v1226_v35 = vld [vmem:[%s3811_s2 + $0x1c0] sm:$0xff] }
 0x353   : > { %1114 = vmatmul.f32.vlgmr.msra.gmra.mxu1 %v1075_v17  ;;  %v1048_v23 = vmul.f32 %v3109_v11, %v1047_v18  ;;  %v1241_v17 = vld [vmem:[%s3811_s2 + $0x328] sm:$0xff]  ;;  %v1242_v18 = vld [vmem:[%s3811_s2 + $0x330] sm:$0xff] }
 0x355   : > { %v1049_v25 = vadd.f32 %v3109_v11, %v1048_v23  ;;  %v1238_v23 = vld [vmem:[%s3811_s2 + $0x2e0] sm:$0xff] }
 0x356   : > { %v3111_v26 = vpop.eup %3110 }
 0x357   : > { %v1053_v28 = vsel %vm1052_vm2, %v3109_v11, %v1049_v25  ;;  %v1061_v29 = vmul.f32 %v3111_v26, %v1029_v12  ;;  %vm1066_vm4 = vweird.f32 %v3111_v26  ;;  %v1247_v11 = vld [vmem:[%s3811_s2 + $0x3b8] sm:$0xff]  ;;  %v1248_v12 = vld [vmem:[%s3811_s2 + $0x3c0] sm:$0xff]  ;;  %v1234_v25 = vld [vmem:[%s3811_s2 + $0x290] sm:$0xff] }
 0x358   : > { %v1058_v30 = vsel %vm1055_vm3, %v1057_v27, %v1053_v28  ;;  %vm1067_vm6 = vmor %vm1065_vm5, %vm1066_vm4  ;;  %1291 = vmatpush.msra.mxu3 %v1247_v11  ;;  %1317 = vmatpush.msrb.mxu0 %v1248_v12  ;;  %v1236_v27 = vld [vmem:[%s3811_s2 + $0x2a0] sm:$0xff]  ;;  %v1231_v28 = vld [vmem:[%s3811_s2 + $0x248] sm:$0xff] }
 0x359   : > { %v1076_v31 = vmul.f32 %v1058_v30, %v1013_v56  ;;  %v1062_v32 = vsub.f32 1.0, %v1061_v29  ;;  %v1249_v56 = vld [vmem:[%s3811_s2 + $0x3f8] sm:$0xff]  ;;  %v1232_v29 = vld [vmem:[%s3811_s2 + $0x250] sm:$0xff] }
 0x35a   : > { %1292 = vmatpush.msra.mxu3 %v1244_v14  ;;  %1318 = vmatpush.msrb.mxu0 %v1245_v15  ;;  %v1233_v30 = vld [vmem:[%s3811_s2 + $0x258] sm:$0xff] }
 0x35b   : > { %1117 = vmatmul.f32.gmra.mxu1 %v1076_v31  ;;  %v1063_v34 = vmul.f32 %v3111_v26, %v1062_v32  ;;  %v1228_v31 = vld [vmem:[%s3811_s2 + $0x200] sm:$0xff]  ;;  %v1229_v32 = vld [vmem:[%s3811_s2 + $0x208] sm:$0xff] }
 0x35c   : > { %1293 = vmatpush.msra.mxu3 %v1241_v17  ;;  %1319 = vmatpush.msrb.mxu0 %v1242_v18  ;;  %v3076_v17 = vld [vmem:[%s3839_s24 + $0x5] ss:$0 sm:$0xff] }
 0x35d   : > { %v1064_v36 = vadd.f32 %v3111_v26, %v1063_v34  ;;  %v1225_v34 = vld [vmem:[%s3811_s2 + $0x1b8] sm:$0xff] }
 0x35e   : > { %1294 = vmatpush.msra.mxu3 %v1238_v23  ;;  %1320 = vmatpush.msrb.mxu0 %v1239_v24 }
 0x35f   : > { %v1068_v39 = vsel %vm1067_vm6, %v3111_v26, %v1064_v36  ;;  %v1235_v26 = vld [vmem:[%s3811_s2 + $0x298] sm:$0xff]  ;;  %v1227_v36 = vld [vmem:[%s3811_s2 + $0x1c8] sm:$0xff] }
 0x360   : > { %v1073_v40 = vsel %vm1070_vm7, %v1072_v38, %v1068_v39  ;;  %1295 = vmatpush.msra.mxu3 %v1235_v26  ;;  %1321 = vmatpush.msrb.mxu0 %v1236_v27  ;;  %v1222_v38 = vld [vmem:[%s3811_s2 + $0x170] sm:$0xff]  ;;  %v1223_v39 = vld [vmem:[%s3811_s2 + $0x178] sm:$0xff] }
 0x361   : > { %v1077_v37 = vmul.f32 %v1073_v40, %v1016_v61  ;;  %v1224_v40 = vld [vmem:[%s3811_s2 + $0x180] sm:$0xff] }
 0x362   : > { %1296 = vmatpush.msra.mxu3 %v1232_v29  ;;  %1322 = vmatpush.msrb.mxu0 %v1233_v30 }
 0x363   : > { %1120 = vmatmul.f32.gmra.mxu1 %v1077_v37  ;;  %v1219_v37 = vld [vmem:[%s3811_s2 + $0x128] sm:$0xff] }
 0x364   : > { %1297 = vmatpush.msra.mxu3 %v1229_v32  ;;  %1323 = vmatpush.msrb.mxu0 %v1230_v33 }
 0x366   : > { %1298 = vmatpush.msra.mxu3 %v1226_v35  ;;  %1324 = vmatpush.msrb.mxu0 %v1227_v36 }
 0x368   : > { %1299 = vmatpush.msra.mxu3 %v1223_v39  ;;  %1325 = vmatpush.msrb.mxu0 %v1224_v40 }
 0x3d0   : > { %v1115_v42 = vpop.f32.mrf.mxu1 }
 0x3d1   : > { %v1116_v43 = vadd.f32 %v3074_v41, %v1115_v42  ;;  %v1221_v42 = vld [vmem:[%s3811_s2 + $0x138] sm:$0xff] }
 0x3d2   : > { %1326 = vmatpush.msrb.mxu0 %v1221_v42 }
 0x3d3   : > { %v1124_v44 = vmul.f32 0.5, %v1116_v43  ;;  %v1216_v43 = vld [vmem:[%s3811_s2 + $0xe0] sm:$0xff] }
 0x3d5   : > { %v3970_v45 = vadd.f32 %v1124_v44, %v3901_v19  ;;  %v1252_v19 = vld [vmem:[%s3811_s2 + $0x440] sm:$0xff]  ;;  %v1217_v44 = vld [vmem:[%s3811_s2 + $0xe8] sm:$0xff] }
 0x3d6   : > { %1263 = vmatpush.msra.mxu2 %v1252_v19  ;;  %v1212_v19 = vld [vmem:[%s3811_s2 + $0x60] sm:$0xff] }
 0x3d7   : > { %1132 = vadd.xlane.f32.xlu0 %v3970_v45 }
 0x3d8   : > { %v1118_v46 = vpop.f32.mrf.mxu1  ;;  %1264 = vmatpush.msra.mxu2 %v1249_v56  ;;  %v1209_v56 = vld [vmem:[%s3811_s2 + $0x18] sm:$0xff] }
 0x3d9   : > { %v1119_v47 = vadd.f32 %v3074_v41, %v1118_v46  ;;  %v1218_v46 = vld [vmem:[%s3811_s2 + $0xf0] sm:$0xff] }
 0x3da   : > { %1265 = vmatpush.msra.mxu2 %v1246_v10  ;;  %1327 = vmatpush.msrb.mxu0 %v1218_v46 }
 0x3db   : > { %v1125_v48 = vmul.f32 0.5, %v1119_v47  ;;  %v1213_v47 = vld [vmem:[%s3811_s2 + $0x98] sm:$0xff] }
 0x3dc   : > { %1266 = vmatpush.msra.mxu2 %v1243_v13  ;;  %v3075_v13 = vld [vmem:[%s3839_s24 + $0x4] ss:$0 sm:$0xff] }
 0x3dd   : > { %v3974_v49 = vadd.f32 %v1125_v48, %v3909_v21  ;;  %v1214_v48 = vld [vmem:[%s3811_s2 + $0xa0] sm:$0xff] }
 0x3de   : > { %1267 = vmatpush.msra.mxu2 %v1240_v16 }
 0x3df   : > { %1134 = vadd.xlane.f32.xlu1 %v3974_v49 }
 0x3e0   : > { %v1121_v50 = vpop.f32.mrf.mxu1  ;;  %1268 = vmatpush.msra.mxu2 %v1237_v22 }
 0x3e1   : > { %v1122_v51 = vadd.f32 %v3074_v41, %v1121_v50  ;;  %v1220_v41 = vld [vmem:[%s3811_s2 + $0x130] sm:$0xff]  ;;  %v1215_v50 = vld [vmem:[%s3811_s2 + $0xa8] sm:$0xff] }
 0x3e2   : > { %1269 = vmatpush.msra.mxu2 %v1234_v25  ;;  %1300 = vmatpush.msra.mxu3 %v1220_v41  ;;  %v1255_v41 = vld [vmem:[%s3839_s24 + $0x6] sm:$0x7] }
 0x3e3   : > { %v1126_v52 = vmul.f32 0.5, %v1122_v51  ;;  %1328 = vmatpush.msrb.mxu0 %v1215_v50  ;;  %v1210_v51 = vld [vmem:[%s3811_s2 + $0x50] sm:$0xff]  ;;  %v1258_v50 = vperm.slane %v1255_v41, 1 }
 0x3e4   : > { %1270 = vmatpush.msra.mxu2 %v1231_v28  ;;  %1301 = vmatpush.msra.mxu3 %v1217_v44 }
 0x3e5   : > { %v3978_v53 = vadd.f32 %v1126_v52, %v3904_v20  ;;  %v1211_v52 = vld [vmem:[%s3811_s2 + $0x58] sm:$0xff]  ;;  %1329 = vmatpush.msrb.mxu0 %v1212_v19 }
 0x3e6   : > { %1271 = vmatpush.msra.mxu2 %v1228_v31  ;;  %1302 = vmatpush.msra.mxu3 %v1214_v48 }
 0x3e7   : > { %1136 = vadd.xlane.f32.xlu2 %v3978_v53  ;;  %1330 = vmatpush.msrb.mxu0 %v1209_v56 }
 0x3e8   : > { %1272 = vmatpush.msra.mxu2 %v1225_v34  ;;  %1303 = vmatpush.msra.mxu3 %v1211_v52  ;;  %v1257_v52 = vperm.slane %v1255_v41, 0 }
 0x3ea   : > { %1273 = vmatpush.msra.mxu2 %v1222_v38  ;;  %1304 = vmatpush.msra.mxu3 %v1208_v55 }
 0x3ec   : > { %1274 = vmatpush.msra.mxu2 %v1219_v37 }
 0x3ee   : > { %1275 = vmatpush.msra.mxu2 %v1216_v43  ;;  %v1259_v43 = vperm.slane %v1255_v41, 2 }
 0x3f0   : > { %1276 = vmatpush.msra.mxu2 %v1213_v47 }
 0x3f2   : > { %1277 = vmatpush.msra.mxu2 %v1210_v51 }
 0x3f4   : > { %1278 = vmatpush.msra.mxu2 %v1207_v54 }
 0x44a   : > { %v1133_v21 = vpop.xlane.xlu0 %1132 }
 0x44b   : > { %v1138_v59 = vmul.f32 0.03125, %v1133_v21 }
 0x44d   : > { %v1141_v60 = vsub.f32 %v3970_v45, %v1138_v59 }
 0x44f   : > { %v3989_v20 = vmul.f32 %v3820_v3, %v1141_v60 }
 0x451   : > { %v1147_v61 = vmul.f32 %v3989_v20, %v3989_v20 }
 0x452   : > { %v1135_v62 = vpop.xlane.xlu1 %1134 }
 0x453   : > { %v1139_v63 = vmul.f32 0.03125, %v1135_v62  ;;  %1150 = vadd.xlane.f32.xlu0 %v1147_v61 }
 0x455   : > { %v1142_v1 = vsub.f32 %v3974_v49, %v1139_v63 }
 0x457   : > { %v3995_v2 = vmul.f32 %v3820_v3, %v1142_v1 }
 0x459   : > { %v1148_v4 = vmul.f32 %v3995_v2, %v3995_v2 }
 0x45a   : > { %v1137_v5 = vpop.xlane.xlu2 %1136 }
 0x45b   : > { %v1140_v6 = vmul.f32 0.03125, %v1137_v5  ;;  %1152 = vadd.xlane.f32.xlu1 %v1148_v4 }
 0x45d   : > { %v1143_v7 = vsub.f32 %v3978_v53, %v1140_v6 }
 0x45f   : > { %v4001_v8 = vmul.f32 %v3820_v3, %v1143_v7 }
 0x461   : > { %v1149_v9 = vmul.f32 %v4001_v8, %v4001_v8 }
 0x463   : > { %1154 = vadd.xlane.f32.xlu2 %v1149_v9 }
 0x4c6   : > { %v1151_v57 = vpop.xlane.xlu0 %1150 }
 0x4c7   : > { %v1156_v58 = vmul.f32 0.03125, %v1151_v57 }
 0x4c9   : > { %v1159_v21 = vadd.f32 1e-05, %v1156_v58 }
 0x4cb   : > { %3112 = vrsqrt.f32 %v1159_v21  ;;  %vm1168_vm9 = vweird.f32 %v1159_v21 }
 0x4ce   : > { %v1153_v59 = vpop.xlane.xlu1 %1152 }
 0x4cf   : > { %v1157_v60 = vmul.f32 0.03125, %v1153_v59 }
 0x4d1   : > { %v3113_v61 = vpop.eup %3112  ;;  %v1160_v62 = vadd.f32 1e-05, %v1157_v60 }
 0x4d2   : > { %v1163_v63 = vmul.f32 %v3113_v61, %v1159_v21  ;;  %vm1169_vm8 = vweird.f32 %v3113_v61  ;;  %v4053_v21 = vld [vmem:[#allocation4] sm:$0xff] }
 0x4d3   : > { %3114 = vrsqrt.f32 %v1160_v62  ;;  %vm1170_vm10 = vmor %vm1168_vm9, %vm1169_vm8  ;;  %vm1178_vm12 = vweird.f32 %v1160_v62 }
 0x4d4   : > { %v1164_v1 = vmul.f32 %v3113_v61, %v1163_v63  ;;  %v4056_v63 = vld [vmem:[#allocation4 + $0x8] sm:$0xff] }
 0x4d6   : > { %v1165_v4 = vmul.f32 0.5, %v1164_v1  ;;  %v1155_v5 = vpop.xlane.xlu2 %1154 }
 0x4d7   : > { %v1158_v6 = vmul.f32 0.03125, %v1155_v5 }
 0x4d8   : > { %v1166_v7 = vsub.f32 1.5, %v1165_v4 }
 0x4d9   : > { %v3115_v9 = vpop.eup %3114  ;;  %v1161_v10 = vadd.f32 1e-05, %v1158_v6  ;;  %v4059_v6 = vld [vmem:[#allocation4 + $0x10] sm:$0xff] }
 0x4da   : > { %v1167_v11 = vmul.f32 %v3113_v61, %v1166_v7  ;;  %v1173_v12 = vmul.f32 %v3115_v9, %v1160_v62  ;;  %vm1179_vm11 = vweird.f32 %v3115_v9 }
 0x4db   : > { %3116 = vrsqrt.f32 %v1161_v10  ;;  %vm1180_vm13 = vmor %vm1178_vm12, %vm1179_vm11  ;;  %vm1188_vm15 = vweird.f32 %v1161_v10 }
 0x4dc   : > { %v1171_v14 = vsel %vm1170_vm10, %v3113_v61, %v1167_v11  ;;  %v1174_v15 = vmul.f32 %v3115_v9, %v1173_v12  ;;  %v4065_v11 = vld [vmem:[#allocation4 + $0x20] sm:$0xff] }
 0x4dd   : > { %v1192_v16 = vmul.f32 %v1171_v14, %v3989_v20 }
 0x4de   : > { %v1175_v18 = vmul.f32 0.5, %v1174_v15  ;;  %v4071_v15 = vld [vmem:[#allocation4 + $0x30] sm:$0xff] }
 0x4df   : > { %v1198_v22 = vmul.f32 %v3075_v13, %v1192_v16 }
 0x4e0   : > { %v1176_v23 = vsub.f32 1.5, %v1175_v18 }
 0x4e1   : > { %v3117_v24 = vpop.eup %3116  ;;  %v1204_v25 = vadd.f32 %v3076_v17, %v1198_v22  ;;  %v4077_v22 = vld [vmem:[#allocation4 + $0x40] sm:$0xff] }
 0x4e2   : > { %v1177_v26 = vmul.f32 %v3115_v9, %v1176_v23  ;;  %v1183_v27 = vmul.f32 %v3117_v24, %v1161_v10  ;;  %vm1189_vm14 = vweird.f32 %v3117_v24 }
 0x4e3   : > { %1279 = vmatmul.f32.vlgmr.msra.gmra.mxu2 %v1204_v25  ;;  %1305 = vmatmul.f32.vlgmr.msra.gmra.mxu3 %v1204_v25  ;;  %vm1190_vm0 = vmor %vm1188_vm15, %vm1189_vm14 }
 0x4e4   : > { %v1181_v28 = vsel %vm1180_vm13, %v3115_v9, %v1177_v26  ;;  %v1184_v29 = vmul.f32 %v3117_v24, %v1183_v27  ;;  %1331 = vmatmul.f32.vlgmr.msrb.gmra.mxu0 %v1204_v25  ;;  %v4062_v9 = vld [vmem:[#allocation4 + $0x18] sm:$0xff]  ;;  %v4083_v26 = vld [vmem:[#allocation4 + $0x50] sm:$0xff] }
 0x4e5   : > { %v1193_v30 = vmul.f32 %v1181_v28, %v3995_v2  ;;  %v4086_v28 = vld [vmem:[#allocation4 + $0x58] sm:$0xff] }
 0x4e6   : > { %v1185_v31 = vmul.f32 0.5, %v1184_v29 }
 0x4e7   : > { %v1199_v20 = vmul.f32 %v3075_v13, %v1193_v30  ;;  %v4090_v30 = vld [vmem:[%s3796_s1] ss:$0 sm:$0xff] }
 0x4e8   : > { %v1186_v32 = vsub.f32 1.5, %v1185_v31 }
 0x4e9   : > { %v1205_v33 = vadd.f32 %v3076_v17, %v1199_v20 }
 0x4ea   : > { %v1187_v34 = vmul.f32 %v3117_v24, %v1186_v32 }
 0x4eb   : > { %1282 = vmatmul.f32.gmra.mxu2 %v1205_v33  ;;  %1308 = vmatmul.f32.gmra.mxu3 %v1205_v33 }
 0x4ec   : > { %v1191_v35 = vsel %vm1190_vm0, %v3117_v24, %v1187_v34  ;;  %1334 = vmatmul.f32.gmra.mxu0 %v1205_v33  ;;  %v4080_v24 = vld [vmem:[#allocation4 + $0x48] sm:$0xff] }
 0x4ed   : > { %v1194_v36 = vmul.f32 %v1191_v35, %v4001_v8 }
 0x4ef   : > { %v1200_v38 = vmul.f32 %v3075_v13, %v1194_v36  ;;  %v4068_v13 = vld [vmem:[#allocation4 + $0x28] sm:$0xff] }
 0x4f1   : > { %v1206_v39 = vadd.f32 %v3076_v17, %v1200_v38  ;;  %v4074_v17 = vld [vmem:[#allocation4 + $0x38] sm:$0xff] }
 0x4f3   : > { %1285 = vmatmul.f32.gmra.mxu2 %v1206_v39  ;;  %1311 = vmatmul.f32.gmra.mxu3 %v1206_v39 }
 0x4f4   : > { %1337 = vmatmul.f32.gmra.mxu0 %v1206_v39 }
 0x561   : > { %v1332_v2 = vpop.f32.mrf.mxu0 }
 0x562   : > { %v1333_v51 = vadd.f32 %v1332_v2, %v1259_v43 }
 0x566   : > { %v1306_v40 = vpop.f32.mrf.mxu3  ;;  %v1280_v47 = vpop.f32.mrf.mxu2 }
 0x567   : > { %v1281_v54 = vadd.f32 %v1280_v47, %v1257_v52  ;;  %v1307_v58 = vadd.f32 %v1306_v40, %v1258_v50 }
 0x569   : > { %v1335_v37 = vpop.f32.mrf.mxu0  ;;  %v1341_v57 = vmul.f32 0.35355338, %v1281_v54 }
 0x56a   : > { %v1336_v48 = vadd.f32 %v1335_v37, %v1259_v43 }
 0x56b   : > { %v1356_v60 = vmul.f32 %v4053_v21, %v1341_v57  ;;  %v1359_v10 = vmul.f32 %v4062_v9, %v1341_v57  ;;  %v1362_v16 = vmul.f32 %v4071_v15, %v1341_v57  ;;  %v1365_v25 = vmul.f32 %v4080_v24, %v1341_v57 }
 0x56e   : > { %v1309_v42 = vpop.f32.mrf.mxu3  ;;  %v1283_v56 = vpop.f32.mrf.mxu2 }
 0x56f   : > { %v1310_v55 = vadd.f32 %v1309_v42, %v1258_v50  ;;  %v1284_v59 = vadd.f32 %v1283_v56, %v1257_v52 }
 0x571   : > { %v1338_v44 = vpop.f32.mrf.mxu0  ;;  %v1342_v61 = vmul.f32 0.35355338, %v1284_v59 }
 0x572   : > { %v1339_v46 = vadd.f32 %v1338_v44, %v1259_v43 }
 0x573   : > { %v1357_v4 = vmul.f32 %v4056_v63, %v1342_v61  ;;  %v1360_v12 = vmul.f32 %v4065_v11, %v1342_v61  ;;  %v1363_v18 = vmul.f32 %v4074_v17, %v1342_v61  ;;  %v1366_v27 = vmul.f32 %v4083_v26, %v1342_v61 }
 0x574   : > { %1763 = vmatpush.msrb.mxu2 %v1339_v46 }
 0x576   : > { %1764 = vmatpush.msrb.mxu2 %v1336_v48  ;;  %v1312_v8 = vpop.f32.mrf.mxu3  ;;  %v1286_v62 = vpop.f32.mrf.mxu2 }
 0x577   : > { %v1313_v19 = vadd.f32 %v1312_v8, %v1258_v50  ;;  %v1287_v1 = vadd.f32 %v1286_v62, %v1257_v52 }
 0x578   : > { %1765 = vmatpush.msrb.mxu2 %v1333_v51 }
 0x579   : > { %1385 = vmatpush.xpose.msrb.mxu1 %v1313_v19  ;;  %v1343_v5 = vmul.f32 0.35355338, %v1287_v1 }
 0x57b   : > { %v1358_v7 = vmul.f32 %v4059_v6, %v1343_v5  ;;  %v1361_v14 = vmul.f32 %v4068_v13, %v1343_v5  ;;  %v1364_v23 = vmul.f32 %v4077_v22, %v1343_v5  ;;  %v1367_v29 = vmul.f32 %v4086_v28, %v1343_v5 }
 0x57d   : > { %1386 = vmatpush.xpose.msrb.mxu1 %v1310_v55 }
 0x581   : > { %1387 = vmatpush.xpose.msrb.mxu1 %v1307_v58 }
 0x584   : > { %1388 = vmatmul.f32.vlgmr.msrb.gmra.mxu1 %v1356_v60 }
 0x58c   : > { %1391 = vmatmul.f32.gmra.mxu1 %v1357_v4 }
 0x594   : > { %1394 = vmatmul.f32.gmra.mxu1 %v1358_v7 }
 0x59c   : > { %1397 = vmatmul.f32.gmra.mxu1 %v1359_v10 }
 0x5a4   : > { %1400 = vmatmul.f32.gmra.mxu1 %v1360_v12 }
 0x5ac   : > { %1403 = vmatmul.f32.gmra.mxu1 %v1361_v14 }
 0x5b4   : > { %1406 = vmatmul.f32.gmra.mxu1 %v1362_v16 }
 0x5bc   : > { %1409 = vmatmul.f32.gmra.mxu1 %v1363_v18 }
 0x5c4   : > { %1412 = vmatmul.f32.gmra.mxu1 %v1364_v23 }
 0x5cc   : > { %1415 = vmatmul.f32.gmra.mxu1 %v1365_v25 }
 0x5d4   : > { %1418 = vmatmul.f32.gmra.mxu1 %v1366_v27 }
 0x5dc   : > { %1421 = vmatmul.f32.gmra.mxu1 %v1367_v29 }
 0x601   : > { %v1389_v31 = vpop.f32.mrf.mxu1 }
 0x602   : > { %v1390_v20 = vadd.f32 %v4090_v30, %v1389_v31 }
 0x604   : > { %v1426_v32 = vsel %vm1425_vm1, %v1390_v20, -inf }
 0x605   : > { %1427 = vmax.xlane.f32.xlu0 %v1426_v32 }
 0x609   : > { %v1392_v33 = vpop.f32.mrf.mxu1 }
 0x60a   : > { %v1393_v34 = vadd.f32 %v4090_v30, %v1392_v33 }
 0x60c   : > { %v1429_v35 = vsel %vm1425_vm1, %v1393_v34, -inf }
 0x60d   : > { %1430 = vmax.xlane.f32.xlu1 %v1429_v35 }
 0x611   : > { %v1395_v36 = vpop.f32.mrf.mxu1 }
 0x612   : > { %v1396_v38 = vadd.f32 %v4090_v30, %v1395_v36 }
 0x614   : > { %v1432_v39 = vsel %vm1425_vm1, %v1396_v38, -inf }
 0x615   : > { %1433 = vmax.xlane.f32.xlu2 %v1432_v39 }
 0x619   : > { %v1398_v2 = vpop.f32.mrf.mxu1 }
 0x61a   : > { %v1399_v40 = vadd.f32 %v4090_v30, %v1398_v2 }
 0x61c   : > { %v1435_v37 = vsel %vm1425_vm1, %v1399_v40, -inf }
 0x61d   : > { %1436 = vmax.xlane.f32.xlu0 %v1435_v37 }
 0x621   : > { %v1401_v41 = vpop.f32.mrf.mxu1 }
 0x622   : > { %v1402_v42 = vadd.f32 %v4090_v30, %v1401_v41 }
 0x624   : > { %v1438_v43 = vsel %vm1425_vm1, %v1402_v42, -inf }
 0x625   : > { %1439 = vmax.xlane.f32.xlu1 %v1438_v43 }
 0x629   : > { %v1404_v44 = vpop.f32.mrf.mxu1 }
 0x62a   : > { %v1405_v46 = vadd.f32 %v4090_v30, %v1404_v44 }
 0x62c   : > { %v1441_v47 = vsel %vm1425_vm1, %v1405_v46, -inf }
 0x62d   : > { %1442 = vmax.xlane.f32.xlu2 %v1441_v47 }
 0x631   : > { %v1407_v48 = vpop.f32.mrf.mxu1 }
 0x632   : > { %v4105_v50 = vadd.f32 %v4090_v30, %v1407_v48 }
 0x634   : > { %v1444_v51 = vsel %vm1425_vm1, %v4105_v50, -inf }
 0x635   : > { %1445 = vmax.xlane.f32.xlu0 %v1444_v51 }
 0x639   : > { %v1410_v52 = vpop.f32.mrf.mxu1 }
 0x63a   : > { %v4110_v8 = vadd.f32 %v4090_v30, %v1410_v52 }
 0x63c   : > { %v1447_v19 = vsel %vm1425_vm1, %v4110_v8, -inf }
 0x63d   : > { %1448 = vmax.xlane.f32.xlu2 %v1447_v19 }
 0x641   : > { %v1413_v57 = vpop.f32.mrf.mxu1 }
 0x642   : > { %v4119_v1 = vadd.f32 %v4090_v30, %v1413_v57 }
 0x644   : > { %v1450_v16 = vsel %vm1425_vm1, %v4119_v1, -inf }
 0x649   : > { %v1416_v5 = vpop.f32.mrf.mxu1 }
 0x64a   : > { %v4128_v18 = vadd.f32 %v4090_v30, %v1416_v5 }
 0x64c   : > { %v1453_v32 = vsel %vm1425_vm1, %v4128_v18, -inf }
 0x651   : > { %v1419_v29 = vpop.f32.mrf.mxu1 }
 0x652   : > { %v4137_v33 = vadd.f32 %v4090_v30, %v1419_v29 }
 0x654   : > { %v1456_v39 = vsel %vm1425_vm1, %v4137_v33, -inf }
 0x678   : > { %v1428_v54 = vpop.xlane.xlu0 %1427 }
 0x679   : > { %v1462_v55 = vsub.f32 %v1390_v20, %v1428_v54 }
 0x67b   : > { %v1474_v56 = vmul.f32 1.442695, %v1462_v55 }
 0x67d   : > { %3118 = vpow2.f32 %v1474_v56 }
 0x680   : > { %v1431_v58 = vpop.xlane.xlu1 %1430 }
 0x681   : > { %v1463_v59 = vsub.f32 %v1393_v34, %v1431_v58 }
 0x683   : > { %v4114_v60 = vpop.eup %3118  ;;  %v1476_v61 = vmul.f32 1.442695, %v1463_v59 }
 0x684   : > { %v1498_v62 = vsel %vm1425_vm1, %v4114_v60, 0.0 }
 0x685   : > { %3120 = vpow2.f32 %v1476_v61  ;;  %1499 = vadd.xlane.f32.xlu1 %v1498_v62 }
 0x688   : > { %v1434_v4 = vpop.xlane.xlu2 %1433 }
 0x689   : > { %v1464_v7 = vsub.f32 %v1396_v38, %v1434_v4 }
 0x68b   : > { %v4121_v10 = vpop.eup %3120  ;;  %v1478_v12 = vmul.f32 1.442695, %v1464_v7 }
 0x68c   : > { %v1501_v14 = vsel %vm1425_vm1, %v4121_v10, 0.0 }
 0x68d   : > { %3122 = vpow2.f32 %v1478_v12  ;;  %1502 = vadd.xlane.f32.xlu0 %v1501_v14  ;;  %1451 = vmax.xlane.f32.xlu1 %v1450_v16 }
 0x690   : > { %v1437_v23 = vpop.xlane.xlu0 %1436 }
 0x691   : > { %v1465_v25 = vsub.f32 %v1399_v40, %v1437_v23  ;;  %v1422_v40 = vpop.f32.mrf.mxu1 }
 0x692   : > { %v4146_v37 = vadd.f32 %v4090_v30, %v1422_v40 }
 0x693   : > { %v4130_v27 = vpop.eup %3122  ;;  %v1480_v31 = vmul.f32 1.442695, %v1465_v25 }
 0x694   : > { %v1504_v20 = vsel %vm1425_vm1, %v4130_v27, 0.0  ;;  %v1459_v48 = vsel %vm1425_vm1, %v4146_v37, -inf }
 0x695   : > { %3124 = vpow2.f32 %v1480_v31  ;;  %1505 = vadd.xlane.f32.xlu2 %v1504_v20  ;;  %1454 = vmax.xlane.f32.xlu0 %v1453_v32 }
 0x698   : > { %v1440_v34 = vpop.xlane.xlu1 %1439 }
 0x699   : > { %v1466_v35 = vsub.f32 %v1402_v42, %v1440_v34 }
 0x69b   : > { %v4139_v36 = vpop.eup %3124  ;;  %v1482_v38 = vmul.f32 1.442695, %v1466_v35 }
 0x69c   : > { %v1507_v2 = vsel %vm1425_vm1, %v4139_v36, 0.0 }
 0x69d   : > { %3126 = vpow2.f32 %v1482_v38  ;;  %1457 = vmax.xlane.f32.xlu2 %v1456_v39  ;;  %1508 = vadd.xlane.f32.xlu1 %v1507_v2 }
 0x6a0   : > { %v1443_v41 = vpop.xlane.xlu2 %1442 }
 0x6a1   : > { %v1467_v43 = vsub.f32 %v1405_v46, %v1443_v41 }
 0x6a3   : > { %v4148_v44 = vpop.eup %3126  ;;  %v1484_v42 = vmul.f32 1.442695, %v1467_v43 }
 0x6a4   : > { %v1510_v47 = vsel %vm1425_vm1, %v4148_v44, 0.0 }
 0x6a5   : > { %3128 = vpow2.f32 %v1484_v42  ;;  %1511 = vadd.xlane.f32.xlu0 %v1510_v47  ;;  %1460 = vmax.xlane.f32.xlu1 %v1459_v48 }
 0x6a8   : > { %v1446_v51 = vpop.xlane.xlu0 %1445 }
 0x6a9   : > { %v1468_v52 = vsub.f32 %v4105_v50, %v1446_v51 }
 0x6ab   : > { %v4155_v19 = vpop.eup %3128  ;;  %v1486_v30 = vmul.f32 1.442695, %v1468_v52 }
 0x6ac   : > { %v1513_v46 = vsel %vm1425_vm1, %v4155_v19, 0.0 }
 0x6ad   : > { %3130 = vpow2.f32 %v1486_v30  ;;  %1514 = vadd.xlane.f32.xlu2 %v1513_v46 }
 0x6b0   : > { %v1449_v54 = vpop.xlane.xlu2 %1448 }
 0x6b1   : > { %v1469_v55 = vsub.f32 %v4110_v8, %v1449_v54 }
 0x6b3   : > { %v4160_v56 = vpop.eup %3130  ;;  %v1488_v57 = vmul.f32 1.442695, %v1469_v55 }
 0x6b4   : > { %v1516_v58 = vsel %vm1425_vm1, %v4160_v56, 0.0 }
 0x6b5   : > { %3132 = vpow2.f32 %v1488_v57  ;;  %1517 = vadd.xlane.f32.xlu0 %v1516_v58 }
 0x6bb   : > { %v4164_v50 = vpop.eup %3132 }
 0x6bc   : > { %v1519_v59 = vsel %vm1425_vm1, %v4164_v50, 0.0 }
 0x6bd   : > { %1520 = vadd.xlane.f32.xlu1 %v1519_v59 }
 0x6f8   : > { %v1500_v61 = vpop.xlane.xlu1 %1499 }
 0x6f9   : > { %3134 = vrcp.f32 %v1500_v61  ;;  %v1545_v23 = vand.u32 2147483648, %v1500_v61  ;;  %v1543_v25 = vand.u32 2147483647, %v1500_v61  ;;  %vm1539_vm3 = vweird.f32 %v1500_v61 }
 0x6fb   : > { %v1546_v20 = vor.u32 1.1754944e-38, %v1545_v23  ;;  %vm1544_vm5 = vcmp.eq.f32.partialorder %v1543_v25, 8.507059e+37 }
 0x6ff   : > { %v3135_v62 = vpop.eup %3134 }
 0x700   : > { %v1535_v4 = vmul.f32 %v3135_v62, %v1500_v61  ;;  %v1452_v5 = vpop.xlane.xlu1 %1451  ;;  %v1503_v8 = vpop.xlane.xlu0 %1502  ;;  %vm1540_vm2 = vweird.f32 %v3135_v62 }
 0x701   : > { %v1470_v7 = vsub.f32 %v4119_v1, %v1452_v5  ;;  %3136 = vrcp.f32 %v1503_v8  ;;  %vm1541_vm4 = vmor %vm1539_vm3, %vm1540_vm2  ;;  %v1560_v47 = vand.u32 2147483648, %v1503_v8  ;;  %v1558_v51 = vand.u32 2147483647, %v1503_v8 }
 0x702   : > { %v1536_v12 = vsub.f32 1.0, %v1535_v4  ;;  %vm1554_vm7 = vweird.f32 %v1503_v8 }
 0x703   : > { %v1490_v14 = vmul.f32 1.442695, %v1470_v7  ;;  %v1561_v30 = vor.u32 1.1754944e-38, %v1560_v47  ;;  %vm1559_vm9 = vcmp.eq.f32.partialorder %v1558_v51, 8.507059e+37 }
 0x704   : > { %v1537_v16 = vmul.f32 %v3135_v62, %v1536_v12 }
 0x705   : > { %3138 = vpow2.f32 %v1490_v14 }
 0x706   : > { %v1538_v29 = vadd.f32 %v3135_v62, %v1537_v16 }
 0x707   : > { %v3137_v31 = vpop.eup %3136 }
 0x708   : > { %v1550_v32 = vmul.f32 %v3137_v31, %v1503_v8  ;;  %v1506_v34 = vpop.xlane.xlu2 %1505  ;;  %v1455_v35 = vpop.xlane.xlu0 %1454  ;;  %v1542_v38 = vsel %vm1541_vm4, %v3135_v62, %v1538_v29  ;;  %vm1555_vm6 = vweird.f32 %v3137_v31 }
 0x709   : > { %3140 = vrcp.f32 %v1506_v34  ;;  %v1471_v1 = vsub.f32 %v4128_v18, %v1455_v35  ;;  %v1547_v2 = vsel %vm1544_vm5, %v1546_v20, %v1542_v38  ;;  %vm1556_vm8 = vmor %vm1554_vm7, %vm1555_vm6  ;;  %v1575_v8 = vand.u32 2147483648, %v1506_v34 }
 0x70a   : > { %v1551_v39 = vsub.f32 1.0, %v1550_v32  ;;  %v1548_v43 = vmul.f32 %v4114_v60, %v1547_v2  ;;  %vm1569_vm11 = vweird.f32 %v1506_v34 }
 0x70b   : > { %v4170_v40 = vpop.eup %3138  ;;  %v1492_v41 = vmul.f32 1.442695, %v1471_v1  ;;  %v1576_v16 = vor.u32 1.1754944e-38, %v1575_v8 }
 0x70c   : > { %v1552_v42 = vmul.f32 %v3137_v31, %v1551_v39  ;;  %v1522_v48 = vsel %vm1425_vm1, %v4170_v40, 0.0  ;;  %2850 = vmatmul.msk.f32.vlgmr.msrb.gmra.mxu2 %vm1425_vm1, %v1548_v43 }
 0x70d   : > { %3142 = vpow2.f32 %v1492_v41  ;;  %1523 = vadd.xlane.f32.xlu2 %v1522_v48 }
 0x70e   : > { %v1553_v18 = vadd.f32 %v3137_v31, %v1552_v42 }
 0x70f   : > { %v3141_v52 = vpop.eup %3140 }
 0x710   : > { %v1565_v46 = vmul.f32 %v3141_v52, %v1506_v34  ;;  %v1458_v54 = vpop.xlane.xlu2 %1457  ;;  %v1509_v55 = vpop.xlane.xlu1 %1508  ;;  %v1557_v60 = vsel %vm1556_vm8, %v3137_v31, %v1553_v18  ;;  %vm1570_vm10 = vweird.f32 %v3141_v52 }
 0x711   : > { %v1472_v57 = vsub.f32 %v4137_v33, %v1458_v54  ;;  %3144 = vrcp.f32 %v1509_v55  ;;  %v1562_v59 = vsel %vm1559_vm9, %v1561_v30, %v1557_v60  ;;  %v1573_v33 = vand.u32 2147483647, %v1506_v34  ;;  %vm1571_vm12 = vmor %vm1569_vm11, %vm1570_vm10 }
 0x712   : > { %v1566_v58 = vsub.f32 1.0, %v1565_v46  ;;  %v1563_v4 = vmul.f32 %v4121_v10, %v1562_v59  ;;  %v1590_v38 = vand.u32 2147483648, %v1509_v55  ;;  %v1588_v41 = vand.u32 2147483647, %v1509_v55 }
 0x713   : > { %v4177_v61 = vpop.eup %3142  ;;  %v1494_v62 = vmul.f32 1.442695, %v1472_v57  ;;  %vm1574_vm13 = vcmp.eq.f32.partialorder %v1573_v33, 8.507059e+37  ;;  %vm1584_vm15 = vweird.f32 %v1509_v55 }
 0x714   : > { %v1567_v5 = vmul.f32 %v3141_v52, %v1566_v58  ;;  %v1525_v7 = vsel %vm1425_vm1, %v4177_v61, 0.0  ;;  %2851 = vmatmul.msk.f32.gmra.mxu2 %vm1425_vm1, %v1563_v4  ;;  %v1591_v42 = vor.u32 1.1754944e-38, %v1590_v38  ;;  %vm1589_vm2 = vcmp.eq.f32.partialorder %v1588_v41, 8.507059e+37 }
 0x715   : > { %3146 = vpow2.f32 %v1494_v62  ;;  %1526 = vadd.xlane.f32.xlu0 %v1525_v7 }
 0x716   : > { %v1568_v12 = vadd.f32 %v3141_v52, %v1567_v5 }
 0x717   : > { %v3145_v14 = vpop.eup %3144 }
 0x718   : > { %v1580_v23 = vmul.f32 %v3145_v14, %v1509_v55  ;;  %v1461_v25 = vpop.xlane.xlu1 %1460  ;;  %v1512_v29 = vpop.xlane.xlu0 %1511  ;;  %v1572_v10 = vsel %vm1571_vm12, %v3141_v52, %v1568_v12  ;;  %vm1585_vm14 = vweird.f32 %v3145_v14 }
 0x719   : > { %v1473_v31 = vsub.f32 %v4146_v37, %v1461_v25  ;;  %3148 = vrcp.f32 %v1512_v29  ;;  %v1577_v32 = vsel %vm1574_vm13, %v1576_v16, %v1572_v10  ;;  %vm1586_vm0 = vmor %vm1584_vm15, %vm1585_vm14  ;;  %v1605_v46 = vand.u32 2147483648, %v1512_v29 }
 0x71a   : > { %v1581_v20 = vsub.f32 1.0, %v1580_v23  ;;  %v1578_v34 = vmul.f32 %v4130_v27, %v1577_v32  ;;  %v1603_v60 = vand.u32 2147483647, %v1512_v29  ;;  %vm1599_vm4 = vweird.f32 %v1512_v29 }
 0x71b   : > { %v4184_v35 = vpop.eup %3146  ;;  %v1496_v1 = vmul.f32 1.442695, %v1473_v31  ;;  %v1606_v59 = vor.u32 1.1754944e-38, %v1605_v46 }
 0x71c   : > { %v1582_v39 = vmul.f32 %v3145_v14, %v1581_v20  ;;  %v1528_v2 = vsel %vm1425_vm1, %v4184_v35, 0.0  ;;  %2852 = vmatmul.msk.f32.gmra.mxu2 %vm1425_vm1, %v1578_v34  ;;  %vm1604_vm6 = vcmp.eq.f32.partialorder %v1603_v60, 8.507059e+37 }
 0x71d   : > { %3150 = vpow2.f32 %v1496_v1  ;;  %1529 = vadd.xlane.f32.xlu1 %v1528_v2 }
 0x71e   : > { %v1583_v37 = vadd.f32 %v3145_v14, %v1582_v39 }
 0x71f   : > { %v3149_v43 = vpop.eup %3148 }
 0x720   : > { %v1595_v47 = vmul.f32 %v3149_v43, %v1512_v29  ;;  %v1515_v48 = vpop.xlane.xlu2 %1514  ;;  %v1587_v51 = vsel %vm1586_vm0, %v3145_v14, %v1583_v37  ;;  %vm1600_vm3 = vweird.f32 %v3149_v43 }
 0x721   : > { %3152 = vrcp.f32 %v1515_v48  ;;  %v1592_v27 = vsel %vm1589_vm2, %v1591_v42, %v1587_v51  ;;  %vm1601_vm5 = vmor %vm1599_vm4, %vm1600_vm3  ;;  %v1620_v33 = vand.u32 2147483648, %v1515_v48  ;;  %v1618_v14 = vand.u32 2147483647, %v1515_v48 }
 0x722   : > { %v1596_v18 = vsub.f32 1.0, %v1595_v47  ;;  %v1593_v52 = vmul.f32 %v4139_v36, %v1592_v27  ;;  %vm1614_vm8 = vweird.f32 %v1515_v48 }
 0x723   : > { %v4191_v30 = vpop.eup %3150  ;;  %v1621_v25 = vor.u32 1.1754944e-38, %v1620_v33  ;;  %vm1619_vm10 = vcmp.eq.f32.partialorder %v1618_v14, 8.507059e+37 }
 0x724   : > { %v1597_v54 = vmul.f32 %v3149_v43, %v1596_v18  ;;  %v1531_v55 = vsel %vm1425_vm1, %v4191_v30, 0.0  ;;  %2853 = vmatmul.msk.f32.gmra.mxu2 %vm1425_vm1, %v1593_v52 }
 0x725   : > { %1532 = vadd.xlane.f32.xlu2 %v1531_v55 }
 0x726   : > { %v1598_v57 = vadd.f32 %v3149_v43, %v1597_v54 }
 0x727   : > { %v3153_v58 = vpop.eup %3152 }
 0x728   : > { %v1610_v62 = vmul.f32 %v3153_v58, %v1515_v48  ;;  %v1518_v4 = vpop.xlane.xlu0 %1517  ;;  %v1602_v36 = vsel %vm1601_vm5, %v3149_v43, %v1598_v57  ;;  %vm1615_vm7 = vweird.f32 %v3153_v58 }
 0x729   : > { %3154 = vrcp.f32 %v1518_v4  ;;  %v1607_v5 = vsel %vm1604_vm6, %v1606_v59, %v1602_v36  ;;  %vm1616_vm9 = vmor %vm1614_vm8, %vm1615_vm7  ;;  %v1635_v38 = vand.u32 2147483648, %v1518_v4  ;;  %v1633_v34 = vand.u32 2147483647, %v1518_v4 }
 0x72a   : > { %v1611_v8 = vsub.f32 1.0, %v1610_v62  ;;  %v1608_v7 = vmul.f32 %v4148_v44, %v1607_v5  ;;  %vm1629_vm12 = vweird.f32 %v1518_v4 }
 0x72b   : > { %v1636_v41 = vor.u32 1.1754944e-38, %v1635_v38  ;;  %vm1634_vm14 = vcmp.eq.f32.partialorder %v1633_v34, 8.507059e+37 }
 0x72c   : > { %v1612_v12 = vmul.f32 %v3153_v58, %v1611_v8  ;;  %2854 = vmatmul.msk.f32.gmra.mxu2 %vm1425_vm1, %v1608_v7 }
 0x72e   : > { %v1613_v16 = vadd.f32 %v3153_v58, %v1612_v12 }
 0x72f   : > { %v3155_v23 = vpop.eup %3154 }
 0x730   : > { %v1625_v29 = vmul.f32 %v3155_v23, %v1518_v4  ;;  %v1521_v10 = vpop.xlane.xlu1 %1520  ;;  %v1617_v31 = vsel %vm1616_vm9, %v3153_v58, %v1613_v16  ;;  %vm1630_vm11 = vweird.f32 %v3155_v23 }
 0x731   : > { %3156 = vrcp.f32 %v1521_v10  ;;  %v1622_v20 = vsel %vm1619_vm10, %v1621_v25, %v1617_v31  ;;  %vm1631_vm13 = vmor %vm1629_vm12, %vm1630_vm11  ;;  %v1650_v51 = vand.u32 2147483648, %v1521_v10  ;;  %v1648_v27 = vand.u32 2147483647, %v1521_v10 }
 0x732   : > { %v1626_v32 = vsub.f32 1.0, %v1625_v29  ;;  %v1623_v44 = vmul.f32 %v4155_v19, %v1622_v20  ;;  %vm1644_vm0 = vweird.f32 %v1521_v10 }
 0x733   : > { %v1651_v52 = vor.u32 1.1754944e-38, %v1650_v51  ;;  %vm1649_vm3 = vcmp.eq.f32.partialorder %v1648_v27, 8.507059e+37 }
 0x734   : > { %v1627_v1 = vmul.f32 %v3155_v23, %v1626_v32  ;;  %2855 = vmatmul.msk.f32.gmra.mxu2 %vm1425_vm1, %v1623_v44 }
 0x736   : > { %v1628_v39 = vadd.f32 %v3155_v23, %v1627_v1 }
 0x737   : > { %v3157_v2 = vpop.eup %3156 }
 0x738   : > { %v1640_v37 = vmul.f32 %v3157_v2, %v1521_v10  ;;  %v1632_v43 = vsel %vm1631_vm13, %v3155_v23, %v1628_v39  ;;  %vm1645_vm15 = vweird.f32 %v3157_v2 }
 0x739   : > { %v1637_v42 = vsel %vm1634_vm14, %v1636_v41, %v1632_v43  ;;  %vm1646_vm2 = vmor %vm1644_vm0, %vm1645_vm15 }
 0x73a   : > { %v1641_v47 = vsub.f32 1.0, %v1640_v37  ;;  %v1638_v48 = vmul.f32 %v4160_v56, %v1637_v42 }
 0x73c   : > { %v1642_v19 = vmul.f32 %v3157_v2, %v1641_v47  ;;  %2856 = vmatmul.msk.f32.gmra.mxu2 %vm1425_vm1, %v1638_v48 }
 0x73e   : > { %v1643_v18 = vadd.f32 %v3157_v2, %v1642_v19 }
 0x740   : > { %v1647_v46 = vsel %vm1646_vm2, %v3157_v2, %v1643_v18 }
 0x741   : > { %v1652_v54 = vsel %vm1649_vm3, %v1651_v52, %v1647_v46 }
 0x742   : > { %v1653_v55 = vmul.f32 %v4164_v50, %v1652_v54 }
 0x744   : > { %2857 = vmatmul.msk.f32.gmra.mxu2 %vm1425_vm1, %v1653_v55 }
 0x780   : > { %v1524_v60 = vpop.xlane.xlu2 %1523 }
 0x781   : > { %3158 = vrcp.f32 %v1524_v60  ;;  %v1665_v4 = vand.u32 2147483648, %v1524_v60  ;;  %v1663_v36 = vand.u32 2147483647, %v1524_v60  ;;  %vm1659_vm5 = vweird.f32 %v1524_v60 }
 0x783   : > { %v1666_v7 = vor.u32 1.1754944e-38, %v1665_v4  ;;  %vm1664_vm7 = vcmp.eq.f32.partialorder %v1663_v36, 8.507059e+37  ;;  %v1835_v4 = vld [vmem:[%s3811_s2 + $0x338] sm:$0xff]  ;;  %v1834_v36 = vld [vmem:[%s3811_s2 + $0x2f0] sm:$0xff] }
 0x787   : > { %v3159_v56 = vpop.eup %3158 }
 0x788   : > { %v1655_v57 = vmul.f32 %v3159_v56, %v1524_v60  ;;  %v1527_v58 = vpop.xlane.xlu0 %1526  ;;  %vm1660_vm4 = vweird.f32 %v3159_v56 }
 0x789   : > { %3160 = vrcp.f32 %v1527_v58  ;;  %vm1661_vm6 = vmor %vm1659_vm5, %vm1660_vm4  ;;  %v1680_v29 = vand.u32 2147483648, %v1527_v58  ;;  %v1678_v10 = vand.u32 2147483647, %v1527_v58  ;;  %vm1674_vm9 = vweird.f32 %v1527_v58 }
 0x78a   : > { %v1656_v59 = vsub.f32 1.0, %v1655_v57  ;;  %v1839_v57 = vld [vmem:[%s3811_s2 + $0x458] sm:$0xff] }
 0x78b   : > { %v1681_v32 = vor.u32 1.1754944e-38, %v1680_v29  ;;  %vm1679_vm11 = vcmp.eq.f32.partialorder %v1678_v10, 8.507059e+37  ;;  %1840 = vmatpush.msrb.mxu3 %v1839_v57  ;;  %v1827_v29 = vld [vmem:[%s3811_s2 + $0xf8] sm:$0xff]  ;;  %v1984_v57 = vld [vmem:[%s3811_s2 + $0x468] sm:$0xff] }
 0x78c   : > { %v1657_v62 = vmul.f32 %v3159_v56, %v1656_v59  ;;  %v1837_v59 = vld [vmem:[%s3811_s2 + $0x3c8] sm:$0xff] }
 0x78e   : > { %v1658_v5 = vadd.f32 %v3159_v56, %v1657_v62  ;;  %v1836_v62 = vld [vmem:[%s3811_s2 + $0x380] sm:$0xff] }
 0x78f   : > { %v3161_v8 = vpop.eup %3160 }
 0x790   : > { %v1670_v33 = vmul.f32 %v3161_v8, %v1527_v58  ;;  %v1530_v50 = vpop.xlane.xlu1 %1529  ;;  %v1662_v12 = vsel %vm1661_vm6, %v3159_v56, %v1658_v5  ;;  %vm1675_vm8 = vweird.f32 %v3161_v8  ;;  %v1838_v58 = vld [vmem:[%s3811_s2 + $0x410] sm:$0xff]  ;;  %v1833_v5 = vld [vmem:[%s3811_s2 + $0x2a8] sm:$0xff] }
 0x791   : > { %3162 = vrcp.f32 %v1530_v50  ;;  %v1667_v16 = vsel %vm1664_vm7, %v1666_v7, %v1662_v12  ;;  %vm1676_vm10 = vmor %vm1674_vm9, %vm1675_vm8  ;;  %v1695_v2 = vand.u32 2147483648, %v1530_v50  ;;  %v1693_v37 = vand.u32 2147483647, %v1530_v50  ;;  %1841 = vmatpush.msrb.mxu3 %v1838_v58  ;;  %v1767_v7 = vpop.f32.mrf.mxu2  ;;  %v1981_v58 = vld [vmem:[%s3811_s2 + $0x418] sm:$0xff] }
 0x792   : > { %v1671_v14 = vsub.f32 1.0, %v1670_v33  ;;  %v1668_v23 = vmul.f32 %v4170_v40, %v1667_v16  ;;  %vm1689_vm13 = vweird.f32 %v1530_v50  ;;  %v1830_v16 = vld [vmem:[%s3811_s2 + $0x1d0] sm:$0xff] }
 0x793   : > { %v1696_v47 = vor.u32 1.1754944e-38, %v1695_v2  ;;  %vm1694_vm15 = vcmp.eq.f32.partialorder %v1693_v37, 8.507059e+37  ;;  %1842 = vmatpush.msrb.mxu3 %v1837_v59  ;;  %v1982_v59 = vld [vmem:[%s3811_s2 + $0x420] sm:$0xff] }
 0x794   : > { %v1672_v25 = vmul.f32 %v3161_v8, %v1671_v14  ;;  %2858 = vmatmul.msk.f32.gmra.mxu2 %vm1425_vm1, %v1668_v23  ;;  %v1829_v23 = vld [vmem:[%s3811_s2 + $0x188] sm:$0xff] }
 0x795   : > { %1843 = vmatpush.msrb.mxu3 %v1836_v62 }
 0x796   : > { %v1673_v31 = vadd.f32 %v3161_v8, %v1672_v25  ;;  %v1828_v25 = vld [vmem:[%s3811_s2 + $0x140] sm:$0xff] }
 0x797   : > { %v3163_v20 = vpop.eup %3162  ;;  %1844 = vmatpush.msrb.mxu3 %v1835_v4 }
 0x798   : > { %v1685_v44 = vmul.f32 %v3163_v20, %v1530_v50  ;;  %v1533_v38 = vpop.xlane.xlu2 %1532  ;;  %v1677_v1 = vsel %vm1676_vm10, %v3161_v8, %v1673_v31  ;;  %vm1690_vm12 = vweird.f32 %v3163_v20  ;;  %v1831_v8 = vld [vmem:[%s3811_s2 + $0x218] sm:$0xff]  ;;  %v1826_v31 = vld [vmem:[%s3811_s2 + $0xb0] sm:$0xff] }
 0x799   : > { %3164 = vrcp.f32 %v1533_v38  ;;  %v1682_v39 = vsel %vm1679_vm11, %v1681_v32, %v1677_v1  ;;  %vm1691_vm14 = vmor %vm1689_vm13, %vm1690_vm12  ;;  %v1708_v46 = vand.u32 2147483647, %v1533_v38  ;;  %vm1704_vm2 = vweird.f32 %v1533_v38  ;;  %1845 = vmatpush.msrb.mxu3 %v1834_v36  ;;  %v1770_v33 = vpop.f32.mrf.mxu2  ;;  %v1824_v32 = vld [vmem:[%s3811_s2 + $0x20] sm:$0xff] }
 0x79a   : > { %v1686_v34 = vsub.f32 1.0, %v1685_v44  ;;  %v1683_v40 = vmul.f32 %v4177_v61, %v1682_v39  ;;  %v1710_v61 = vand.u32 2147483648, %v1533_v38  ;;  %v1803_v39 = vmul.f32 %v1767_v7, %v4053_v21 }
 0x79b   : > { %vm1709_vm4 = vcmp.eq.f32.partialorder %v1708_v46, 8.507059e+37  ;;  %1846 = vmatpush.msrb.mxu3 %v1833_v5 }
 0x79c   : > { %v1687_v41 = vmul.f32 %v3163_v20, %v1686_v34  ;;  %2859 = vmatmul.msk.f32.gmra.mxu2 %vm1425_vm1, %v1683_v40  ;;  %v1711_v55 = vor.u32 1.1754944e-38, %v1710_v61 }
 0x79e   : > { %v1688_v43 = vadd.f32 %v3163_v20, %v1687_v41 }
 0x79f   : > { %v3165_v42 = vpop.eup %3164 }
 0x7a0   : > { %v1700_v48 = vmul.f32 %v3165_v42, %v1533_v38  ;;  %v1692_v51 = vsel %vm1691_vm14, %v3163_v20, %v1688_v43  ;;  %vm1705_vm0 = vweird.f32 %v3165_v42  ;;  %v1825_v20 = vld [vmem:[%s3811_s2 + $0x68] sm:$0xff] }
 0x7a1   : > { %v1697_v19 = vsel %vm1694_vm15, %v1696_v47, %v1692_v51  ;;  %vm1706_vm3 = vmor %vm1704_vm2, %vm1705_vm0  ;;  %v1773_v50 = vpop.f32.mrf.mxu2 }
 0x7a2   : > { %v1701_v27 = vsub.f32 1.0, %v1700_v48  ;;  %v1698_v18 = vmul.f32 %v4184_v35, %v1697_v19  ;;  %v1804_v48 = vmul.f32 %v1770_v33, %v4056_v63  ;;  %v1805_v61 = vmul.f32 %v1773_v50, %v4059_v6 }
 0x7a4   : > { %v1702_v52 = vmul.f32 %v3165_v42, %v1701_v27  ;;  %2860 = vmatmul.msk.f32.gmra.mxu2 %vm1425_vm1, %v1698_v18 }
 0x7a6   : > { %v1703_v54 = vadd.f32 %v3165_v42, %v1702_v52 }
 0x7a8   : > { %v1707_v60 = vsel %vm1706_vm3, %v3165_v42, %v1703_v54  ;;  %v3078_v54 = vld [vmem:[%s3839_s24 + $0x9] ss:$0 sm:$0xff] }
 0x7a9   : > { %v1712_v56 = vsel %vm1709_vm4, %v1711_v55, %v1707_v60  ;;  %v1776_v12 = vpop.f32.mrf.mxu2 }
 0x7aa   : > { %v1713_v35 = vmul.f32 %v4191_v30, %v1712_v56  ;;  %v1832_v30 = vld [vmem:[%s3811_s2 + $0x260] sm:$0xff]  ;;  %v1806_v34 = vmul.f32 %v1776_v12, %v4062_v9 }
 0x7ab   : > { %1847 = vmatpush.msrb.mxu3 %v1832_v30 }
 0x7ac   : > { %2861 = vmatmul.msk.f32.gmra.mxu2 %vm1425_vm1, %v1713_v35  ;;  %v1815_v40 = vadd.f32 %v1806_v34, %v1803_v39  ;;  %v1972_v34 = vld [vmem:[%s3811_s2 + $0x2b8] sm:$0xff]  ;;  %v1969_v39 = vld [vmem:[%s3811_s2 + $0x268] sm:$0xff] }
 0x7ad   : > { %1848 = vmatpush.msrb.mxu3 %v1831_v8 }
 0x7af   : > { %1849 = vmatpush.msrb.mxu3 %v1830_v16 }
 0x7b1   : > { %v1779_v14 = vpop.f32.mrf.mxu2  ;;  %1850 = vmatpush.msrb.mxu3 %v1829_v23 }
 0x7b2   : > { %v1807_v42 = vmul.f32 %v1779_v14, %v4065_v11 }
 0x7b3   : > { %1851 = vmatpush.msrb.mxu3 %v1828_v25  ;;  %v1979_v25 = vld [vmem:[%s3811_s2 + $0x3d0] sm:$0xff] }
 0x7b4   : > { %v1816_v19 = vadd.f32 %v1807_v42, %v1804_v48  ;;  %v1963_v42 = vld [vmem:[%s3811_s2 + $0x190] sm:$0xff]  ;;  %v1961_v48 = vld [vmem:[%s3811_s2 + $0x148] sm:$0xff] }
 0x7b5   : > { %1852 = vmatpush.msrb.mxu3 %v1827_v29  ;;  %v1980_v29 = vld [vmem:[%s3811_s2 + $0x3d8] sm:$0xff] }
 0x7b7   : > { %1853 = vmatpush.msrb.mxu3 %v1826_v31  ;;  %v1978_v31 = vld [vmem:[%s3811_s2 + $0x390] sm:$0xff] }
 0x7b9   : > { %v1782_v10 = vpop.f32.mrf.mxu2  ;;  %1854 = vmatpush.msrb.mxu3 %v1825_v20  ;;  %v1975_v20 = vld [vmem:[%s3811_s2 + $0x340] sm:$0xff] }
 0x7bb   : > { %1855 = vmatpush.msrb.mxu3 %v1824_v32  ;;  %v1976_v32 = vld [vmem:[%s3811_s2 + $0x348] sm:$0xff] }
 0x7bd   : > { %2017 = vmatpush.msra.mxu3 %v1984_v57 }
 0x7bf   : > { %2018 = vmatpush.msra.mxu3 %v1982_v59 }
 0x7c1   : > { %v1785_v44 = vpop.f32.mrf.mxu2  ;;  %2019 = vmatpush.msra.mxu3 %v1980_v29 }
 0x7c2   : > { %v1809_v2 = vmul.f32 %v1785_v44, %v4071_v15  ;;  %v1808_v15 = vmul.f32 %v1782_v10, %v4068_v13  ;;  %v1977_v10 = vld [vmem:[%s3811_s2 + $0x388] sm:$0xff]  ;;  %v1973_v44 = vld [vmem:[%s3811_s2 + $0x2f8] sm:$0xff] }
 0x7c3   : > { %2020 = vmatpush.msra.mxu3 %v1978_v31 }
 0x7c4   : > { %v1818_v37 = vadd.f32 %v1815_v40, %v1809_v2  ;;  %v1817_v11 = vadd.f32 %v1808_v15, %v1805_v61  ;;  %v1970_v2 = vld [vmem:[%s3811_s2 + $0x270] sm:$0xff]  ;;  %v1967_v40 = vld [vmem:[%s3811_s2 + $0x220] sm:$0xff]  ;;  %v1953_v61 = vld [vmem:[%s3811_s2 + $0x28] sm:$0xff] }
 0x7c5   : > { %2021 = vmatpush.msra.mxu3 %v1976_v32  ;;  %v1955_v15 = vld [vmem:[%s3811_s2 + $0x70] sm:$0xff] }
 0x7c9   : > { %v1788_v38 = vpop.f32.mrf.mxu2 }
 0x7ca   : > { %v1810_v51 = vmul.f32 %v1788_v38, %v4074_v17  ;;  %v1974_v38 = vld [vmem:[%s3811_s2 + $0x300] sm:$0xff] }
 0x7cb   : > { %2022 = vmatpush.msra.mxu3 %v1974_v38 }
 0x7cc   : > { %v1819_v27 = vadd.f32 %v1816_v19, %v1810_v51  ;;  %v1962_v51 = vld [vmem:[%s3811_s2 + $0x150] sm:$0xff]  ;;  %v1959_v19 = vld [vmem:[%s3811_s2 + $0x100] sm:$0xff] }
 0x7cd   : > { %2023 = vmatpush.msra.mxu3 %v1972_v34 }
 0x7cf   : > { %2024 = vmatpush.msra.mxu3 %v1970_v2 }
 0x817   : > { %v1791_v1 = vpop.f32.mrf.mxu2 }
 0x81f   : > { %v1794_v41 = vpop.f32.mrf.mxu2 }
 0x820   : > { %v1812_v43 = vmul.f32 %v1794_v41, %v4080_v24  ;;  %v1811_v24 = vmul.f32 %v1791_v1, %v4077_v22  ;;  %v1971_v1 = vld [vmem:[%s3811_s2 + $0x2b0] sm:$0xff]  ;;  %v1968_v41 = vld [vmem:[%s3811_s2 + $0x228] sm:$0xff] }
 0x821   : > { %2025 = vmatpush.msra.mxu3 %v1968_v41 }
 0x822   : > { %v1821_v47 = vadd.f32 %v1818_v37, %v1812_v43  ;;  %v1820_v63 = vadd.f32 %v1817_v11, %v1811_v24  ;;  %v1965_v37 = vld [vmem:[%s3811_s2 + $0x1d8] sm:$0xff]  ;;  %v1966_v43 = vld [vmem:[%s3811_s2 + $0x1e0] sm:$0xff]  ;;  %v1954_v24 = vld [vmem:[%s3811_s2 + $0x30] sm:$0xff] }
 0x823   : > { %2026 = vmatpush.msra.mxu3 %v1966_v43 }
 0x824   : > { %1856 = vmatmul.f32.vlgmr.msrb.gmra.mxu3 %v1821_v47  ;;  %v1964_v47 = vld [vmem:[%s3811_s2 + $0x198] sm:$0xff] }
 0x825   : > { %2027 = vmatpush.msra.mxu3 %v1964_v47 }
 0x827   : > { %v1797_v9 = vpop.f32.mrf.mxu2  ;;  %2028 = vmatpush.msra.mxu3 %v1962_v51 }
 0x828   : > { %v1813_v21 = vmul.f32 %v1797_v9, %v4083_v26  ;;  %v1960_v9 = vld [vmem:[%s3811_s2 + $0x108] sm:$0xff] }
 0x829   : > { %2029 = vmatpush.msra.mxu3 %v1960_v9 }
 0x82a   : > { %v1822_v18 = vadd.f32 %v1819_v27, %v1813_v21  ;;  %v1957_v27 = vld [vmem:[%s3811_s2 + $0xb8] sm:$0xff]  ;;  %v1958_v21 = vld [vmem:[%s3811_s2 + $0xc0] sm:$0xff] }
 0x82b   : > { %2030 = vmatpush.msra.mxu3 %v1958_v21 }
 0x82c   : > { %1859 = vmatmul.f32.gmra.mxu3 %v1822_v18  ;;  %v1956_v18 = vld [vmem:[%s3811_s2 + $0x78] sm:$0xff] }
 0x82d   : > { %2031 = vmatpush.msra.mxu3 %v1956_v18 }
 0x82f   : > { %v1800_v52 = vpop.f32.mrf.mxu2  ;;  %2032 = vmatpush.msra.mxu3 %v1954_v24 }
 0x830   : > { %v1814_v17 = vmul.f32 %v1800_v52, %v4086_v28 }
 0x832   : > { %v1823_v46 = vadd.f32 %v1820_v63, %v1814_v17 }
 0x834   : > { %1862 = vmatmul.f32.gmra.mxu3 %v1823_v46 }
 0x8a7   : > { %v1857_v26 = vpop.f32.mrf.mxu3 }
 0x8a8   : > { %v1866_v13 = vadd.f32 %v1857_v26, %v3970_v45  ;;  %v1983_v45 = vld [vmem:[%s3811_s2 + $0x460] sm:$0xff] }
 0x8a9   : > { %1991 = vmatpush.msra.mxu0 %v1983_v45  ;;  %v2104_v45 = vld [vmem:[%s4526_s0 + $0x8] sm:$0xff] }
 0x8aa   : > { %v4242_v55 = vadd.f32 %v3078_v54, %v1866_v13 }
 0x8ab   : > { %1992 = vmatpush.msra.mxu0 %v1981_v58 }
 0x8ac   : > { %1878 = vadd.xlane.f32.xlu0 %v4242_v55 }
 0x8ad   : > { %1993 = vmatpush.msra.mxu0 %v1979_v25 }
 0x8af   : > { %v1860_v6 = vpop.f32.mrf.mxu3  ;;  %1994 = vmatpush.msra.mxu0 %v1977_v10 }
 0x8b0   : > { %v1867_v22 = vadd.f32 %v1860_v6, %v3974_v49  ;;  %v2103_v6 = vld [vmem:[%s4526_s0] sm:$0xff] }
 0x8b1   : > { %1995 = vmatpush.msra.mxu0 %v1975_v20 }
 0x8b2   : > { %v4246_v60 = vadd.f32 %v3078_v54, %v1867_v22  ;;  %v2105_v22 = vld [vmem:[%s4526_s0 + $0x10] sm:$0xff] }
 0x8b3   : > { %1996 = vmatpush.msra.mxu0 %v1973_v44 }
 0x8b4   : > { %1880 = vadd.xlane.f32.xlu1 %v4246_v60 }
 0x8b5   : > { %1997 = vmatpush.msra.mxu0 %v1971_v1 }
 0x8b7   : > { %v1863_v28 = vpop.f32.mrf.mxu3  ;;  %1998 = vmatpush.msra.mxu0 %v1969_v39 }
 0x8b8   : > { %v1868_v56 = vadd.f32 %v1863_v28, %v3978_v53 }
 0x8b9   : > { %1999 = vmatpush.msra.mxu0 %v1967_v40 }
 0x8ba   : > { %v4250_v35 = vadd.f32 %v3078_v54, %v1868_v56  ;;  %v3545_v56 = vmov 0  }
 0x8bb   : > { %2000 = vmatpush.msra.mxu0 %v1965_v37  ;;  %3068 = vset.pattern.permute.xlu0 %v3545_v56 }
 0x8bc   : > { %1882 = vadd.xlane.f32.xlu2 %v4250_v35  ;;  %3069 = vset.pattern.permute.xlu1 %v3545_v56 }
 0x8bd   : > { %2001 = vmatpush.msra.mxu0 %v1963_v42  ;;  %3070 = vset.pattern.permute.xlu2 %v3545_v56  ;;  %v1985_v42 = vld [vmem:[%s3839_s24 + $0xc] sm:$0x3] }
 0x8bf   : > { %2002 = vmatpush.msra.mxu0 %v1961_v48 }
 0x8c1   : > { %2003 = vmatpush.msra.mxu0 %v1959_v19 }
 0x8c3   : > { %2004 = vmatpush.msra.mxu0 %v1957_v27 }
 0x8c5   : > { %2005 = vmatpush.msra.mxu0 %v1955_v15 }
 0x8c7   : > { %2006 = vmatpush.msra.mxu0 %v1953_v61 }
 0x91f   : > { %v1879_v49 = vpop.xlane.xlu0 %1878 }
 0x920   : > { %v1884_v62 = vmul.f32 0.03125, %v1879_v49 }
 0x922   : > { %v1887_v4 = vsub.f32 %v4242_v55, %v1884_v62 }
 0x924   : > { %v4259_v36 = vmul.f32 %v3820_v3, %v1887_v4 }
 0x926   : > { %v1893_v53 = vmul.f32 %v4259_v36, %v4259_v36 }
 0x927   : > { %v1881_v5 = vpop.xlane.xlu1 %1880 }
 0x928   : > { %v1885_v30 = vmul.f32 0.03125, %v1881_v5  ;;  %1896 = vadd.xlane.f32.xlu0 %v1893_v53 }
 0x92a   : > { %v1888_v8 = vsub.f32 %v4246_v60, %v1885_v30  ;;  %v3079_v30 = vld [vmem:[%s3839_s24 + $0xa] ss:$0 sm:$0xff] }
 0x92c   : > { %v4265_v7 = vmul.f32 %v3820_v3, %v1888_v8 }
 0x92e   : > { %v1894_v33 = vmul.f32 %v4265_v7, %v4265_v7 }
 0x92f   : > { %v1883_v50 = vpop.xlane.xlu2 %1882 }
 0x930   : > { %v1886_v12 = vmul.f32 0.03125, %v1883_v50  ;;  %1898 = vadd.xlane.f32.xlu1 %v1894_v33 }
 0x932   : > { %v1889_v14 = vsub.f32 %v4250_v35, %v1886_v12  ;;  %v3080_v12 = vld [vmem:[%s3839_s24 + $0xb] ss:$0 sm:$0xff] }
 0x934   : > { %v4271_v16 = vmul.f32 %v3820_v3, %v1889_v14 }
 0x936   : > { %v1895_v23 = vmul.f32 %v4271_v16, %v4271_v16 }
 0x938   : > { %1900 = vadd.xlane.f32.xlu2 %v1895_v23 }
 0x93c   : > { %2108 = vperm.xlu0 %3068, %v2103_v6   ;;  %v2268_v6 = vld [vmem:[%s3811_s2 + $0x428] sm:$0xff] }
 0x949   : > { %2118 = vperm.xlu1 %3069, %v2105_v22  }
 0x950   : > { %2113 = vperm.xlu2 %3070, %v2104_v45  }
 0x99b   : > { %v1897_v11 = vpop.xlane.xlu0 %1896 }
 0x99c   : > { %v1902_v52 = vmul.f32 0.03125, %v1897_v11 }
 0x99e   : > { %v1905_v63 = vadd.f32 1e-05, %v1902_v52 }
 0x9a0   : > { %3166 = vrsqrt.f32 %v1905_v63  ;;  %vm1914_vm5 = vweird.f32 %v1905_v63 }
 0x9a3   : > { %v1899_v17 = vpop.xlane.xlu1 %1898 }
 0x9a4   : > { %v1903_v46 = vmul.f32 0.03125, %v1899_v17 }
 0x9a6   : > { %v3167_v54 = vpop.eup %3166  ;;  %v1906_v26 = vadd.f32 1e-05, %v1903_v46 }
 0x9a7   : > { %v1909_v13 = vmul.f32 %v3167_v54, %v1905_v63  ;;  %vm1915_vm1 = vweird.f32 %v3167_v54 }
 0x9a8   : > { %3168 = vrsqrt.f32 %v1906_v26  ;;  %vm1916_vm6 = vmor %vm1914_vm5, %vm1915_vm1  ;;  %vm1924_vm8 = vweird.f32 %v1906_v26 }
 0x9a9   : > { %v1910_v28 = vmul.f32 %v3167_v54, %v1909_v13  ;;  %v2269_v13 = vld [vmem:[%s3811_s2 + $0x470] sm:$0xff] }
 0x9aa   : > { %2274 = vmatpush.msrb.mxu0 %v2269_v13 }
 0x9ab   : > { %v1911_v57 = vmul.f32 0.5, %v1910_v28  ;;  %v1901_v58 = vpop.xlane.xlu2 %1900 }
 0x9ac   : > { %v1904_v59 = vmul.f32 0.03125, %v1901_v58  ;;  %v2267_v58 = vld [vmem:[%s3811_s2 + $0x3e0] sm:$0xff]  ;;  %2275 = vmatpush.msrb.mxu0 %v2268_v6  ;;  %v2257_v6 = vld [vmem:[%s3811_s2 + $0x110] sm:$0xff] }
 0x9ad   : > { %v1912_v49 = vsub.f32 1.5, %v1911_v57 }
 0x9ae   : > { %v3169_v62 = vpop.eup %3168  ;;  %v1907_v4 = vadd.f32 1e-05, %v1904_v59  ;;  %v1987_v59 = vperm.slane %v1985_v42, 0  ;;  %2276 = vmatpush.msrb.mxu0 %v2267_v58 }
 0x9af   : > { %v1913_v53 = vmul.f32 %v3167_v54, %v1912_v49  ;;  %v1919_v5 = vmul.f32 %v3169_v62, %v1906_v26  ;;  %vm1925_vm7 = vweird.f32 %v3169_v62 }
 0x9b0   : > { %3170 = vrsqrt.f32 %v1907_v4  ;;  %vm1926_vm9 = vmor %vm1924_vm8, %vm1925_vm7  ;;  %vm1934_vm11 = vweird.f32 %v1907_v4 }
 0x9b1   : > { %v1917_v8 = vsel %vm1916_vm6, %v3167_v54, %v1913_v53  ;;  %v1920_v33 = vmul.f32 %v3169_v62, %v1919_v5  ;;  %v2266_v53 = vld [vmem:[%s3811_s2 + $0x398] sm:$0xff] }
 0x9b2   : > { %v1938_v50 = vmul.f32 %v1917_v8, %v4259_v36  ;;  %2277 = vmatpush.msrb.mxu0 %v2266_v53  ;;  %v2255_v53 = vld [vmem:[%s3811_s2 + $0x80] sm:$0xff] }
 0x9b3   : > { %v1921_v14 = vmul.f32 0.5, %v1920_v33 }
 0x9b4   : > { %v1944_v23 = vmul.f32 %v3079_v30, %v1938_v50  ;;  %v2265_v50 = vld [vmem:[%s3811_s2 + $0x350] sm:$0xff] }
 0x9b5   : > { %v1922_v25 = vsub.f32 1.5, %v1921_v14  ;;  %2278 = vmatpush.msrb.mxu0 %v2265_v50 }
 0x9b6   : > { %v3171_v29 = vpop.eup %3170  ;;  %v1950_v10 = vadd.f32 %v3080_v12, %v1944_v23 }
 0x9b7   : > { %v1923_v31 = vmul.f32 %v3169_v62, %v1922_v25  ;;  %v1929_v20 = vmul.f32 %v3171_v29, %v1907_v4  ;;  %vm1935_vm10 = vweird.f32 %v3171_v29  ;;  %v2264_v25 = vld [vmem:[%s3811_s2 + $0x308] sm:$0xff] }
 0x9b8   : > { %2007 = vmatmul.f32.vlgmr.msra.gmra.mxu0 %v1950_v10  ;;  %2033 = vmatmul.f32.vlgmr.msra.gmra.mxu3 %v1950_v10  ;;  %vm1936_vm12 = vmor %vm1934_vm11, %vm1935_vm10 }
 0x9b9   : > { %v1930_v32 = vmul.f32 %v3171_v29, %v1929_v20  ;;  %v1927_v44 = vsel %vm1926_vm9, %v3169_v62, %v1923_v31  ;;  %v2109_v20 = vpop.permute.xlu0 %2108  ;;  %2279 = vmatpush.msrb.mxu0 %v2264_v25  ;;  %v2254_v25 = vld [vmem:[%s3811_s2 + $0x38] sm:$0xff] }
 0x9ba   : > { %v1939_v38 = vmul.f32 %v1927_v44, %v4265_v7  ;;  %v1988_v7 = vperm.slane %v1985_v42, 1  ;;  %v2263_v44 = vld [vmem:[%s3811_s2 + $0x2c0] sm:$0xff] }
 0x9bb   : > { %v1931_v1 = vmul.f32 0.5, %v1930_v32  ;;  %2280 = vmatpush.msrb.mxu0 %v2263_v44 }
 0x9bc   : > { %v1945_v36 = vmul.f32 %v3079_v30, %v1939_v38 }
 0x9bd   : > { %v1932_v34 = vsub.f32 1.5, %v1931_v1 }
 0x9be   : > { %v1951_v39 = vadd.f32 %v3080_v12, %v1945_v36 }
 0x9bf   : > { %v1933_v2 = vmul.f32 %v3171_v29, %v1932_v34 }
 0x9c0   : > { %2010 = vmatmul.f32.gmra.mxu0 %v1951_v39  ;;  %2036 = vmatmul.f32.gmra.mxu3 %v1951_v39  ;;  %v2128_v39 = vshrl.u32 %v609_v0, 7  ;;  %v2260_v0 = vld [vmem:[%s3811_s2 + $0x1e8] sm:$0xff] }
 0x9c1   : > { %v1937_v40 = vsel %vm1936_vm12, %v3171_v29, %v1933_v2  ;;  %v2114_v2 = vpop.permute.xlu2 %2113 }
 0x9c2   : > { %v1940_v41 = vmul.f32 %v1937_v40, %v4271_v16  ;;  %v2262_v40 = vld [vmem:[%s3811_s2 + $0x278] sm:$0xff]  ;;  %vm2129_vm6 = vcmp.lt.s32.totalorder %v2128_v39, 1  ;;  %vm2156_vm10 = vcmp.lt.s32.totalorder %v2128_v39, 7 }
 0x9c3   : > { %2281 = vmatpush.msrb.mxu0 %v2262_v40 }
 0x9c4   : > { %v1946_v37 = vmul.f32 %v3079_v30, %v1940_v41 }
 0x9c6   : > { %v1952_v43 = vadd.f32 %v3080_v12, %v1946_v37 }
 0x9c8   : > { %2013 = vmatmul.f32.gmra.mxu0 %v1952_v43  ;;  %2039 = vmatmul.f32.gmra.mxu3 %v1952_v43 }
 0xa35   : > { %v2008_v17 = vpop.f32.mrf.mxu0 }
 0xa36   : > { %v2009_v12 = vadd.f32 %v2008_v17, %v1987_v59  ;;  %v2258_v17 = vld [vmem:[%s3811_s2 + $0x158] sm:$0xff] }
 0xa3b   : > { %v2034_v47 = vpop.f32.mrf.mxu3 }
 0xa3c   : > { %v2035_v48 = vadd.f32 %v2034_v47, %v1988_v7 }
 0xa3d   : > { %v2011_v30 = vpop.f32.mrf.mxu0 }
 0xa3e   : > { %v2862_v51 = vmul.f32 -1.442695, %v2035_v48  ;;  %v2012_v38 = vadd.f32 %v2011_v30, %v1987_v59 }
 0xa40   : > { %3172 = vpow2.f32 %v2862_v51 }
 0xa43   : > { %v2037_v19 = vpop.f32.mrf.mxu3 }
 0xa44   : > { %v2038_v9 = vadd.f32 %v2037_v19, %v1988_v7 }
 0xa45   : > { %v2014_v19 = vpop.f32.mrf.mxu0 }
 0xa46   : > { %v3173_v27 = vpop.eup %3172  ;;  %v2863_v21 = vmul.f32 -1.442695, %v2038_v9 }
 0xa47   : > { %v2052_v15 = vadd.f32 1.0, %v3173_v27 }
 0xa48   : > { %3174 = vpow2.f32 %v2863_v21 }
 0xa49   : > { %3176 = vrcp.f32 %v2052_v15  ;;  %v2066_v26 = vand.u32 2147483648, %v2052_v15  ;;  %vm2060_vm14 = vweird.f32 %v2052_v15  ;;  %v2064_v56 = vand.u32 2147483647, %v2052_v15 }
 0xa4b   : > { %v2040_v16 = vpop.f32.mrf.mxu3  ;;  %v2067_v4 = vor.u32 1.1754944e-38, %v2066_v26  ;;  %vm2065_vm0 = vcmp.eq.f32.partialorder %v2064_v56, 8.507059e+37 }
 0xa4c   : > { %v2041_v18 = vadd.f32 %v2040_v16, %v1988_v7  ;;  %v2261_v7 = vld [vmem:[%s3811_s2 + $0x230] sm:$0xff] }
 0xa4d   : > { %2282 = vmatpush.msrb.mxu0 %v2261_v7 }
 0xa4e   : > { %v3175_v61 = vpop.eup %3174  ;;  %v2864_v24 = vmul.f32 -1.442695, %v2041_v18  ;;  %v2259_v18 = vld [vmem:[%s3811_s2 + $0x1a0] sm:$0xff] }
 0xa4f   : > { %v3177_v11 = vpop.eup %3176  ;;  %v2053_v52 = vadd.f32 1.0, %v3175_v61  ;;  %v2015_v61 = vadd.f32 %v2014_v19, %v1987_v59  ;;  %2283 = vmatpush.msrb.mxu0 %v2260_v0 }
 0xa50   : > { %3178 = vpow2.f32 %v2864_v24  ;;  %v2056_v63 = vmul.f32 %v3177_v11, %v2052_v15  ;;  %vm2061_vm13 = vweird.f32 %v3177_v11  ;;  %v3082_v15 = vld [vmem:[%s3839_s24 + $0x18] ss:$0 sm:$0xff] }
 0xa51   : > { %3180 = vrcp.f32 %v2053_v52  ;;  %vm2062_vm15 = vmor %vm2060_vm14, %vm2061_vm13  ;;  %v2081_v33 = vand.u32 2147483648, %v2053_v52  ;;  %v2079_v23 = vand.u32 2147483647, %v2053_v52  ;;  %vm2075_vm3 = vweird.f32 %v2053_v52  ;;  %2284 = vmatpush.msrb.mxu0 %v2259_v18 }
 0xa52   : > { %v2057_v46 = vsub.f32 1.0, %v2056_v63 }
 0xa53   : > { %v2082_v32 = vor.u32 1.1754944e-38, %v2081_v33  ;;  %vm2080_vm1 = vcmp.eq.f32.partialorder %v2079_v23, 8.507059e+37  ;;  %2285 = vmatpush.msrb.mxu0 %v2258_v17 }
 0xa54   : > { %v2058_v54 = vmul.f32 %v3177_v11, %v2057_v46 }
 0xa55   : > { %2286 = vmatpush.msrb.mxu0 %v2257_v6 }
 0xa56   : > { %v3179_v22 = vpop.eup %3178  ;;  %v2059_v28 = vadd.f32 %v3177_v11, %v2058_v54  ;;  %v3081_v54 = vld [vmem:[%s3839_s24 + $0x19] ss:$0 sm:$0xff] }
 0xa57   : > { %v3181_v45 = vpop.eup %3180  ;;  %v4320_v57 = vadd.f32 1.0, %v3179_v22 }
 0xa58   : > { %v2063_v49 = vsel %vm2062_vm15, %v3177_v11, %v2059_v28  ;;  %v2071_v62 = vmul.f32 %v3181_v45, %v2053_v52  ;;  %vm2076_vm2 = vweird.f32 %v3181_v45  ;;  %v2119_v52 = vpop.permute.xlu1 %2118 }
 0xa59   : > { %3182 = vrcp.f32 %v4320_v57  ;;  %v2068_v8 = vsel %vm2065_vm0, %v2067_v4, %v2063_v49  ;;  %vm2077_vm4 = vmor %vm2075_vm3, %vm2076_vm2  ;;  %v2096_v42 = vand.u32 2147483648, %v4320_v57  ;;  %v2094_v51 = vand.u32 2147483647, %v4320_v57 }
 0xa5a   : > { %v2072_v5 = vsub.f32 1.0, %v2071_v62  ;;  %v2100_v29 = vmul.f32 %v2068_v8, %v2009_v12  ;;  %vm2090_vm7 = vweird.f32 %v4320_v57 }
 0xa5b   : > { %v2097_v16 = vor.u32 1.1754944e-38, %v2096_v42  ;;  %vm2095_vm9 = vcmp.eq.f32.partialorder %v2094_v51, 8.507059e+37 }
 0xa5c   : > { %v2073_v14 = vmul.f32 %v3181_v45, %v2072_v5  ;;  %v2121_v41 = vmul.f32 %v2109_v20, %v2100_v29  ;;  %v3084_v29 = vld [vmem:[%s3839_s24 + $0xe] ss:$0 sm:$0xff] }
 0xa5e   : > { %v2074_v10 = vadd.f32 %v3181_v45, %v2073_v14  ;;  %v2124_v9 = vrot.slane %v2121_v41, 7  ;;  %v2153_v28 = vrot.slane %v2121_v41, 1  ;;  %v2147_v49 = vmul.f32 %v3081_v54, %v2121_v41 }
 0xa5f   : > { %v3183_v31 = vpop.eup %3182 }
 0xa60   : > { %v2078_v1 = vsel %vm2077_vm4, %v3181_v45, %v2074_v10  ;;  %v2086_v36 = vmul.f32 %v3183_v31, %v4320_v57  ;;  %vm2091_vm5 = vweird.f32 %v3183_v31  ;;  %v2256_v45 = vld [vmem:[%s3811_s2 + $0xc8] sm:$0xff]  ;;  %v3083_v57 = vld [vmem:[%s3839_s24 + $0x1a] ss:$0 sm:$0xff] }
 0xa61   : > { %v2083_v34 = vsel %vm2080_vm1, %v2082_v32, %v2078_v1  ;;  %vm2092_vm8 = vmor %vm2090_vm7, %vm2091_vm5  ;;  %2287 = vmatpush.msrb.mxu0 %v2256_v45 }
 0xa62   : > { %v2101_v37 = vmul.f32 %v2083_v34, %v2012_v38  ;;  %v2087_v43 = vsub.f32 1.0, %v2086_v36  ;;  %v3085_v36 = vld [vmem:[%s3839_s24 + $0xf] ss:$0 sm:$0xff] }
 0xa63   : > { %2288 = vmatpush.msrb.mxu0 %v2255_v53 }
 0xa64   : > { %v2122_v47 = vmul.f32 %v2114_v2, %v2101_v37  ;;  %v2088_v48 = vmul.f32 %v3183_v31, %v2087_v43  ;;  %v3086_v2 = vld [vmem:[%s3839_s24 + $0x10] ss:$0 sm:$0xff] }
 0xa65   : > { %2289 = vmatpush.msrb.mxu0 %v2254_v25 }
 0xa66   : > { %v2125_v27 = vrot.slane %v2122_v47, 7  ;;  %v2089_v21 = vadd.f32 %v3183_v31, %v2088_v48  ;;  %v2154_v13 = vrot.slane %v2122_v47, 1  ;;  %v2148_v56 = vmul.f32 %v3081_v54, %v2122_v47 }
 0xa68   : > { %v2131_v24 = vsel %vm2129_vm6, %v2124_v9, %v2125_v27  ;;  %v2093_v11 = vsel %vm2092_vm8, %v3183_v31, %v2089_v21  ;;  %v2158_v4 = vsel %vm2156_vm10, %v2153_v28, %v2154_v13 }
 0xa69   : > { %v2098_v63 = vsel %vm2095_vm9, %v2097_v16, %v2093_v11  ;;  %v2138_v26 = vmul.f32 %v3082_v15, %v2131_v24  ;;  %v2164_v10 = vmul.f32 %v3083_v57, %v2158_v4 }
 0xa6a   : > { %v2102_v46 = vmul.f32 %v2098_v63, %v2015_v61 }
 0xa6b   : > { %v2151_v62 = vadd.f32 %v2148_v56, %v2138_v26 }
 0xa6c   : > { %v2123_v22 = vmul.f32 %v2119_v52, %v2102_v46 }
 0xa6e   : > { %v2126_v58 = vrot.slane %v2123_v22, 7  ;;  %v2155_v59 = vrot.slane %v2123_v22, 1  ;;  %v2149_v14 = vmul.f32 %v3081_v54, %v2123_v22 }
 0xa70   : > { %v2130_v5 = vsel %vm2129_vm6, %v2125_v27, %v2126_v58  ;;  %v2132_v30 = vsel %vm2129_vm6, %v2126_v58, %v2124_v9  ;;  %v2157_v8 = vsel %vm2156_vm10, %v2154_v13, %v2155_v59  ;;  %v2159_v33 = vsel %vm2156_vm10, %v2155_v59, %v2153_v28 }
 0xa71   : > { %v2137_v50 = vmul.f32 %v3082_v15, %v2132_v30  ;;  %v2139_v12 = vmul.f32 %v3082_v15, %v2130_v5  ;;  %v2165_v23 = vmul.f32 %v3083_v57, %v2157_v8  ;;  %v2166_v32 = vmul.f32 %v3083_v57, %v2159_v33 }
 0xa73   : > { %v2150_v31 = vadd.f32 %v2147_v49, %v2137_v50  ;;  %v2152_v20 = vadd.f32 %v2149_v14, %v2139_v12  ;;  %v2168_v44 = vadd.f32 %v2165_v23, %v2151_v62 }
 0xa75   : > { %v2167_v38 = vadd.f32 %v2164_v10, %v2150_v31  ;;  %v2169_v1 = vadd.f32 %v2166_v32, %v2152_v20  ;;  %v2175_v34 = vadd.f32 %v3084_v29, %v2168_v44  ;;  %v3087_v32 = vld [vmem:[%s3839_s24 + $0x11] ss:$0 sm:$0xff] }
 0xa77   : > { %v2174_v39 = vadd.f32 %v3084_v29, %v2167_v38  ;;  %v2178_v40 = vmul.f32 0.999995, %v2175_v34  ;;  %v2176_v41 = vadd.f32 %v3084_v29, %v2169_v1 }
 0xa79   : > { %v2177_v37 = vmul.f32 0.999995, %v2174_v39  ;;  %v2185_v43 = vmul.f32 %v3085_v36, %v2178_v40  ;;  %v2179_v42 = vmul.f32 0.999995, %v2176_v41 }
 0xa7b   : > { %v2184_v7 = vmul.f32 %v3085_v36, %v2177_v37  ;;  %v2192_v47 = vadd.f32 %v3086_v2, %v2185_v43  ;;  %v2186_v48 = vmul.f32 %v3085_v36, %v2179_v42  ;;  %v2395_v37 = vld [vmem:[%s3811_s2 + $0x478] sm:$0xff]  ;;  %v2394_v43 = vld [vmem:[%s3811_s2 + $0x430] sm:$0xff] }
 0xa7c   : > { %2400 = vmatpush.msrb.mxu3 %v2395_v37 }
 0xa7d   : > { %v2191_v51 = vadd.f32 %v3086_v2, %v2184_v7  ;;  %v2866_v19 = vmul.f32 -1.442695, %v2192_v47  ;;  %v2193_v0 = vadd.f32 %v3086_v2, %v2186_v48 }
 0xa7e   : > { %2401 = vmatpush.msrb.mxu3 %v2394_v43 }
 0xa7f   : > { %v2865_v9 = vmul.f32 -1.442695, %v2191_v51  ;;  %3184 = vpow2.f32 %v2866_v19  ;;  %v2867_v27 = vmul.f32 -1.442695, %v2193_v0 }
 0xa81   : > { %3186 = vpow2.f32 %v2865_v9 }
 0xa82   : > { %3188 = vpow2.f32 %v2867_v27 }
 0xa85   : > { %v3185_v21 = vpop.eup %3184 }
 0xa86   : > { %v2204_v15 = vadd.f32 1.0, %v3185_v21 }
 0xa87   : > { %v3187_v16 = vpop.eup %3186 }
 0xa88   : > { %v3189_v18 = vpop.eup %3188  ;;  %v2203_v61 = vadd.f32 1.0, %v3187_v16  ;;  %3190 = vrcp.f32 %v2204_v15  ;;  %v2232_v4 = vand.u32 2147483648, %v2204_v15  ;;  %vm2226_vm0 = vweird.f32 %v2204_v15 }
 0xa89   : > { %v2205_v24 = vadd.f32 1.0, %v3189_v18  ;;  %v2230_v5 = vand.u32 2147483647, %v2204_v15  ;;  %v2393_v18 = vld [vmem:[%s3811_s2 + $0x3e8] sm:$0xff] }
 0xa8a   : > { %3192 = vrcp.f32 %v2203_v61  ;;  %v2215_v13 = vand.u32 2147483647, %v2203_v61  ;;  %v2217_v6 = vand.u32 2147483648, %v2203_v61  ;;  %vm2211_vm12 = vweird.f32 %v2203_v61  ;;  %2402 = vmatpush.msrb.mxu3 %v2393_v18 }
 0xa8b   : > { %3194 = vrcp.f32 %v2205_v24  ;;  %v2233_v33 = vor.u32 1.1754944e-38, %v2232_v4  ;;  %vm2231_vm3 = vcmp.eq.f32.partialorder %v2230_v5, 8.507059e+37  ;;  %v2247_v14 = vand.u32 2147483648, %v2205_v24  ;;  %v2500_v5 = vld [vmem:[%s3837_s22 + $0xe8] sm:$0xff] }
 0xa8c   : > { %vm2216_vm14 = vcmp.eq.f32.partialorder %v2215_v13, 8.507059e+37  ;;  %v2218_v57 = vor.u32 1.1754944e-38, %v2217_v6  ;;  %vm2241_vm1 = vweird.f32 %v2205_v24  ;;  %v2245_v25 = vand.u32 2147483647, %v2205_v24  ;;  %v2383_v13 = vld [vmem:[%s3811_s2 + $0x118] sm:$0xff]  ;;  %v2382_v6 = vld [vmem:[%s3811_s2 + $0xd0] sm:$0xff] }
 0xa8d   : > { %v2248_v10 = vor.u32 1.1754944e-38, %v2247_v14  ;;  %v2498_v14 = vld [vmem:[%s3837_s22 + $0xc8] sm:$0xff] }
 0xa8e   : > { %v3191_v11 = vpop.eup %3190  ;;  %vm2246_vm6 = vcmp.eq.f32.partialorder %v2245_v25, 8.507059e+37 }
 0xa8f   : > { %v2222_v52 = vmul.f32 %v3191_v11, %v2204_v15  ;;  %vm2227_vm15 = vweird.f32 %v3191_v11 }
 0xa90   : > { %v3193_v63 = vpop.eup %3192  ;;  %vm2228_vm2 = vmor %vm2226_vm0, %vm2227_vm15 }
 0xa91   : > { %v2207_v17 = vmul.f32 %v3193_v63, %v2203_v61  ;;  %v2223_v46 = vsub.f32 1.0, %v2222_v52  ;;  %v3195_v54 = vpop.eup %3194  ;;  %vm2212_vm11 = vweird.f32 %v3193_v63  ;;  %v2392_v61 = vld [vmem:[%s3811_s2 + $0x3a0] sm:$0xff]  ;;  %v2389_v52 = vld [vmem:[%s3811_s2 + $0x2c8] sm:$0xff] }
 0xa92   : > { %v2237_v56 = vmul.f32 %v3195_v54, %v2205_v24  ;;  %vm2213_vm13 = vmor %vm2211_vm12, %vm2212_vm11  ;;  %vm2242_vm4 = vweird.f32 %v3195_v54  ;;  %2403 = vmatpush.msrb.mxu3 %v2392_v61  ;;  %v2391_v24 = vld [vmem:[%s3811_s2 + $0x358] sm:$0xff] }
 0xa93   : > { %v2208_v26 = vsub.f32 1.0, %v2207_v17  ;;  %v2224_v28 = vmul.f32 %v3191_v11, %v2223_v46  ;;  %vm2243_vm5 = vmor %vm2241_vm1, %vm2242_vm4  ;;  %v2387_v17 = vld [vmem:[%s3811_s2 + $0x238] sm:$0xff]  ;;  %v2386_v46 = vld [vmem:[%s3811_s2 + $0x1f0] sm:$0xff] }
 0xa94   : > { %v2238_v49 = vsub.f32 1.0, %v2237_v56  ;;  %2404 = vmatpush.msrb.mxu3 %v2391_v24 }
 0xa95   : > { %v2209_v22 = vmul.f32 %v3193_v63, %v2208_v26  ;;  %v2225_v59 = vadd.f32 %v3191_v11, %v2224_v28  ;;  %v2384_v26 = vld [vmem:[%s3811_s2 + $0x160] sm:$0xff] }
 0xa96   : > { %v2239_v8 = vmul.f32 %v3195_v54, %v2238_v49  ;;  %v2380_v28 = vld [vmem:[%s3811_s2 + $0x40] sm:$0xff] }
 0xa97   : > { %v2210_v45 = vadd.f32 %v3193_v63, %v2209_v22  ;;  %v2229_v30 = vsel %vm2228_vm2, %v3191_v11, %v2225_v59  ;;  %v2390_v11 = vld [vmem:[%s3811_s2 + $0x310] sm:$0xff]  ;;  %v2381_v22 = vld [vmem:[%s3811_s2 + $0x88] sm:$0xff] }
 0xa98   : > { %v2234_v50 = vsel %vm2231_vm3, %v2233_v33, %v2229_v30  ;;  %v2240_v12 = vadd.f32 %v3195_v54, %v2239_v8  ;;  %2405 = vmatpush.msrb.mxu3 %v2390_v11  ;;  %v2499_v8 = vld [vmem:[%s3837_s22 + $0xd8] sm:$0xff] }
 0xa99   : > { %v2214_v58 = vsel %vm2213_vm13, %v3193_v63, %v2210_v45  ;;  %v2252_v23 = vmul.f32 %v2234_v50, %v2192_v47  ;;  %v2388_v63 = vld [vmem:[%s3811_s2 + $0x280] sm:$0xff] }
 0xa9a   : > { %v2219_v62 = vsel %vm2216_vm14, %v2218_v57, %v2214_v58  ;;  %v2244_v29 = vsel %vm2243_vm5, %v3195_v54, %v2240_v12  ;;  %2406 = vmatpush.msrb.mxu3 %v2389_v52  ;;  %v2385_v54 = vld [vmem:[%s3811_s2 + $0x1a8] sm:$0xff] }
 0xa9b   : > { %v2251_v53 = vmul.f32 %v2219_v62, %v2191_v51  ;;  %v2249_v31 = vsel %vm2246_vm6, %v2248_v10, %v2244_v29  ;;  %v2497_v10 = vld [vmem:[%s3837_s22 + $0xb8] sm:$0xff] }
 0xa9c   : > { %v2253_v20 = vmul.f32 %v2249_v31, %v2193_v0  ;;  %2407 = vmatpush.msrb.mxu3 %v2388_v63  ;;  %v2492_v63 = vld [vmem:[%s3837_s22 + $0x68] sm:$0xff] }
 0xa9d   : > { %2290 = vmatmul.f32.vlgmr.msrb.gmra.mxu0 %v2251_v53  ;;  %v2501_v53 = vld [vmem:[%s3837_s22 + $0xf8] sm:$0xff] }
 0xa9e   : > { %2408 = vmatpush.msrb.mxu3 %v2387_v17  ;;  %2506 = vmatpush.msra.mxu1 %v2501_v53  ;;  %v2491_v17 = vld [vmem:[%s3837_s22 + $0x58] sm:$0xff] }
 0xaa0   : > { %2409 = vmatpush.msrb.mxu3 %v2386_v46  ;;  %2507 = vmatpush.msra.mxu1 %v2500_v5  ;;  %v2490_v46 = vld [vmem:[%s3837_s22 + $0x48] sm:$0xff] }
 0xaa2   : > { %2410 = vmatpush.msrb.mxu3 %v2385_v54  ;;  %2508 = vmatpush.msra.mxu1 %v2499_v8  ;;  %v2489_v54 = vld [vmem:[%s3837_s22 + $0x38] sm:$0xff] }
 0xaa4   : > { %2411 = vmatpush.msrb.mxu3 %v2384_v26  ;;  %2509 = vmatpush.msra.mxu1 %v2498_v14  ;;  %v3090_v26 = vld [vmem:[%s3839_s24 + $0x14] ss:$0 sm:$0xff] }
 0xaa5   : > { %2293 = vmatmul.f32.gmra.mxu0 %v2252_v23 }
 0xaa6   : > { %2412 = vmatpush.msrb.mxu3 %v2383_v13  ;;  %2510 = vmatpush.msra.mxu1 %v2497_v10  ;;  %v2488_v13 = vld [vmem:[%s3837_s22 + $0x28] sm:$0xff] }
 0xaa8   : > { %2413 = vmatpush.msrb.mxu3 %v2382_v6  ;;  %v2487_v6 = vld [vmem:[%s3837_s22 + $0x18] sm:$0xff] }
 0xaaa   : > { %2414 = vmatpush.msrb.mxu3 %v2381_v22  ;;  %v2486_v22 = vld [vmem:[%s3837_s22 + $0x8] sm:$0xff] }
 0xaac   : > { %2415 = vmatpush.msrb.mxu3 %v2380_v28 }
 0xaad   : > { %2296 = vmatmul.f32.gmra.mxu0 %v2253_v20 }
 0xb1a   : > { %v2291_v44 = vpop.f32.mrf.mxu0 }
 0xb1b   : > { %v2292_v38 = vadd.f32 %v3087_v32, %v2291_v44  ;;  %v2496_v44 = vld [vmem:[%s3837_s22 + $0xa8] sm:$0xff] }
 0xb1c   : > { %2511 = vmatpush.msra.mxu1 %v2496_v44 }
 0xb1d   : > { %v4356_v1 = vadd.f32 %v2292_v38, %v4242_v55 }
 0xb1f   : > { %2305 = vadd.xlane.f32.xlu2 %v4356_v1 }
 0xb22   : > { %v2294_v36 = vpop.f32.mrf.mxu0 }
 0xb23   : > { %v2295_v34 = vadd.f32 %v3087_v32, %v2294_v36 }
 0xb25   : > { %v4360_v39 = vadd.f32 %v2295_v34, %v4246_v60 }
 0xb27   : > { %2307 = vadd.xlane.f32.xlu1 %v4360_v39 }
 0xb2a   : > { %v2297_v2 = vpop.f32.mrf.mxu0 }
 0xb2b   : > { %v2298_v40 = vadd.f32 %v3087_v32, %v2297_v2  ;;  %v3088_v32 = vld [vmem:[%s3839_s24 + $0x12] ss:$0 sm:$0xff]  ;;  %v3089_v2 = vld [vmem:[%s3839_s24 + $0x13] ss:$0 sm:$0xff] }
 0xb2d   : > { %v4364_v41 = vadd.f32 %v2298_v40, %v4250_v35  ;;  %v2495_v40 = vld [vmem:[%s3837_s22 + $0x98] sm:$0xff] }
 0xb2e   : > { %2512 = vmatpush.msra.mxu1 %v2495_v40 }
 0xb2f   : > { %2309 = vadd.xlane.f32.xlu0 %v4364_v41 }
 0xb92   : > { %v2306_v55 = vpop.xlane.xlu2 %2305 }
 0xb93   : > { %v2311_v42 = vmul.f32 0.03125, %v2306_v55  ;;  %v2494_v55 = vld [vmem:[%s3837_s22 + $0x88] sm:$0xff] }
 0xb94   : > { %2513 = vmatpush.msra.mxu1 %v2494_v55 }
 0xb95   : > { %v2314_v7 = vsub.f32 %v4356_v1, %v2311_v42 }
 0xb97   : > { %v4371_v60 = vmul.f32 %v3820_v3, %v2314_v7 }
 0xb99   : > { %v2320_v47 = vmul.f32 %v4371_v60, %v4371_v60 }
 0xb9a   : > { %v2308_v35 = vpop.xlane.xlu1 %2307 }
 0xb9b   : > { %v2312_v48 = vmul.f32 0.03125, %v2308_v35  ;;  %2323 = vadd.xlane.f32.xlu2 %v2320_v47  ;;  %v2493_v35 = vld [vmem:[%s3837_s22 + $0x78] sm:$0xff] }
 0xb9c   : > { %2514 = vmatpush.msra.mxu1 %v2493_v35 }
 0xb9d   : > { %v2315_v51 = vsub.f32 %v4360_v39, %v2312_v48 }
 0xb9e   : > { %2515 = vmatpush.msra.mxu1 %v2492_v63 }
 0xb9f   : > { %v4377_v19 = vmul.f32 %v3820_v3, %v2315_v51 }
 0xba0   : > { %2516 = vmatpush.msra.mxu1 %v2491_v17 }
 0xba1   : > { %v2321_v0 = vmul.f32 %v4377_v19, %v4377_v19 }
 0xba2   : > { %v2310_v9 = vpop.xlane.xlu0 %2309  ;;  %2517 = vmatpush.msra.mxu1 %v2490_v46 }
 0xba3   : > { %v2313_v27 = vmul.f32 0.03125, %v2310_v9  ;;  %2325 = vadd.xlane.f32.xlu1 %v2321_v0 }
 0xba4   : > { %2518 = vmatpush.msra.mxu1 %v2489_v54 }
 0xba5   : > { %v2316_v21 = vsub.f32 %v4364_v41, %v2313_v27 }
 0xba6   : > { %2519 = vmatpush.msra.mxu1 %v2488_v13 }
 0xba7   : > { %v4383_v15 = vmul.f32 %v3820_v3, %v2316_v21 }
 0xba8   : > { %2520 = vmatpush.msra.mxu1 %v2487_v6 }
 0xba9   : > { %v2322_v16 = vmul.f32 %v4383_v15, %v4383_v15 }
 0xbaa   : > { %2521 = vmatpush.msra.mxu1 %v2486_v22 }
 0xbab   : > { %2327 = vadd.xlane.f32.xlu2 %v2322_v16 }
 0xc0e   : > { %v2324_v56 = vpop.xlane.xlu2 %2323 }
 0xc0f   : > { %v2329_v45 = vmul.f32 0.03125, %v2324_v56 }
 0xc11   : > { %v2332_v57 = vadd.f32 1e-05, %v2329_v45 }
 0xc13   : > { %3196 = vrsqrt.f32 %v2332_v57  ;;  %vm2341_vm8 = vweird.f32 %v2332_v57 }
 0xc16   : > { %v2326_v58 = vpop.xlane.xlu1 %2325 }
 0xc17   : > { %v2330_v59 = vmul.f32 0.03125, %v2326_v58 }
 0xc19   : > { %v3197_v49 = vpop.eup %3196  ;;  %v2333_v62 = vadd.f32 1e-05, %v2330_v59 }
 0xc1a   : > { %v2336_v4 = vmul.f32 %v3197_v49, %v2332_v57  ;;  %vm2342_vm7 = vweird.f32 %v3197_v49 }
 0xc1b   : > { %3198 = vrsqrt.f32 %v2333_v62  ;;  %vm2343_vm9 = vmor %vm2341_vm8, %vm2342_vm7  ;;  %vm2351_vm11 = vweird.f32 %v2333_v62 }
 0xc1c   : > { %v2337_v30 = vmul.f32 %v3197_v49, %v2336_v4 }
 0xc1e   : > { %v2338_v33 = vmul.f32 0.5, %v2337_v30  ;;  %v2328_v50 = vpop.xlane.xlu2 %2327 }
 0xc1f   : > { %v2331_v12 = vmul.f32 0.03125, %v2328_v50 }
 0xc20   : > { %v2339_v23 = vsub.f32 1.5, %v2338_v33 }
 0xc21   : > { %v3199_v25 = vpop.eup %3198  ;;  %v2334_v29 = vadd.f32 1e-05, %v2331_v12 }
 0xc22   : > { %v2340_v31 = vmul.f32 %v3197_v49, %v2339_v23  ;;  %v2346_v20 = vmul.f32 %v3199_v25, %v2333_v62  ;;  %vm2352_vm10 = vweird.f32 %v3199_v25 }
 0xc23   : > { %3200 = vrsqrt.f32 %v2334_v29  ;;  %vm2353_vm12 = vmor %vm2351_vm11, %vm2352_vm10  ;;  %vm2361_vm14 = vweird.f32 %v2334_v29 }
 0xc24   : > { %v2344_v38 = vsel %vm2343_vm9, %v3197_v49, %v2340_v31  ;;  %v2347_v36 = vmul.f32 %v3199_v25, %v2346_v20 }
 0xc25   : > { %v2365_v34 = vmul.f32 %v2344_v38, %v4371_v60 }
 0xc26   : > { %v2348_v37 = vmul.f32 0.5, %v2347_v36 }
 0xc27   : > { %v2371_v43 = vmul.f32 %v3088_v32, %v2365_v34 }
 0xc28   : > { %v2349_v42 = vsub.f32 1.5, %v2348_v37 }
 0xc29   : > { %v3201_v7 = vpop.eup %3200  ;;  %v2377_v47 = vadd.f32 %v3089_v2, %v2371_v43 }
 0xc2a   : > { %v2350_v48 = vmul.f32 %v3199_v25, %v2349_v42  ;;  %v2356_v51 = vmul.f32 %v3201_v7, %v2334_v29  ;;  %vm2362_vm13 = vweird.f32 %v3201_v7 }
 0xc2b   : > { %2416 = vmatmul.f32.vlgmr.msrb.gmra.mxu3 %v2377_v47  ;;  %vm2363_vm15 = vmor %vm2361_vm14, %vm2362_vm13 }
 0xc2c   : > { %v2357_v0 = vmul.f32 %v3201_v7, %v2356_v51  ;;  %v2354_v60 = vsel %vm2353_vm12, %v3199_v25, %v2350_v48 }
 0xc2d   : > { %v2366_v9 = vmul.f32 %v2354_v60, %v4377_v19 }
 0xc2e   : > { %v2358_v27 = vmul.f32 0.5, %v2357_v0 }
 0xc2f   : > { %v2372_v21 = vmul.f32 %v3088_v32, %v2366_v9 }
 0xc30   : > { %v2359_v16 = vsub.f32 1.5, %v2358_v27 }
 0xc31   : > { %v2378_v18 = vadd.f32 %v3089_v2, %v2372_v21 }
 0xc32   : > { %v2360_v61 = vmul.f32 %v3201_v7, %v2359_v16 }
 0xc33   : > { %2419 = vmatmul.f32.gmra.mxu3 %v2378_v18 }
 0xc34   : > { %v2364_v24 = vsel %vm2363_vm15, %v3201_v7, %v2360_v61 }
 0xc35   : > { %v2367_v11 = vmul.f32 %v2364_v24, %v4383_v15  ;;  %v3091_v24 = vld [vmem:[%s3839_s24 + $0x15] ss:$0 sm:$0xff] }
 0xc37   : > { %v2373_v19 = vmul.f32 %v3088_v32, %v2367_v11 }
 0xc39   : > { %v2379_v52 = vadd.f32 %v3089_v2, %v2373_v19 }
 0xc3b   : > { %2422 = vmatmul.f32.gmra.mxu3 %v2379_v52 }
 0xcae   : > { %v2417_v28 = vpop.f32.mrf.mxu3 }
 0xcaf   : > { %v2418_v15 = vadd.f32 %v3090_v26, %v2417_v28 }
 0xcb1   : > { %v2868_v56 = vmul.f32 -1.442695, %v2418_v15 }
 0xcb3   : > { %3202 = vpow2.f32 %v2868_v56 }
 0xcb6   : > { %v2420_v45 = vpop.f32.mrf.mxu3 }
 0xcb7   : > { %v2421_v57 = vadd.f32 %v3090_v26, %v2420_v45 }
 0xcb9   : > { %v3203_v58 = vpop.eup %3202  ;;  %v2869_v59 = vmul.f32 -1.442695, %v2421_v57 }
 0xcba   : > { %v2435_v49 = vadd.f32 1.0, %v3203_v58 }
 0xcbb   : > { %3204 = vpow2.f32 %v2869_v59 }
 0xcbc   : > { %3206 = vrcp.f32 %v2435_v49  ;;  %v2449_v12 = vand.u32 2147483648, %v2435_v49  ;;  %v2447_v23 = vand.u32 2147483647, %v2435_v49  ;;  %vm2443_vm2 = vweird.f32 %v2435_v49 }
 0xcbe   : > { %v2423_v62 = vpop.f32.mrf.mxu3  ;;  %v2450_v31 = vor.u32 1.1754944e-38, %v2449_v12  ;;  %vm2448_vm4 = vcmp.eq.f32.partialorder %v2447_v23, 8.507059e+37 }
 0xcbf   : > { %v2424_v4 = vadd.f32 %v3090_v26, %v2423_v62 }
 0xcc1   : > { %v3205_v53 = vpop.eup %3204  ;;  %v2870_v5 = vmul.f32 -1.442695, %v2424_v4 }
 0xcc2   : > { %v3207_v30 = vpop.eup %3206  ;;  %v2436_v8 = vadd.f32 1.0, %v3205_v53 }
 0xcc3   : > { %v2439_v33 = vmul.f32 %v3207_v30, %v2435_v49  ;;  %3208 = vpow2.f32 %v2870_v5  ;;  %vm2444_vm0 = vweird.f32 %v3207_v30 }
 0xcc4   : > { %3210 = vrcp.f32 %v2436_v8  ;;  %vm2445_vm3 = vmor %vm2443_vm2, %vm2444_vm0  ;;  %v2464_v2 = vand.u32 2147483648, %v2436_v8  ;;  %v2462_v37 = vand.u32 2147483647, %v2436_v8  ;;  %vm2458_vm5 = vweird.f32 %v2436_v8 }
 0xcc5   : > { %v2440_v50 = vsub.f32 1.0, %v2439_v33 }
 0xcc6   : > { %v2465_v42 = vor.u32 1.1754944e-38, %v2464_v2  ;;  %vm2463_vm7 = vcmp.eq.f32.partialorder %v2462_v37, 8.507059e+37  ;;  %v3092_v2 = vld [vmem:[%s3839_s24 + $0x16] ss:$0 sm:$0xff] }
 0xcc7   : > { %v2441_v14 = vmul.f32 %v3207_v30, %v2440_v50 }
 0xcc9   : > { %v3209_v25 = vpop.eup %3208  ;;  %v2442_v29 = vadd.f32 %v3207_v30, %v2441_v14 }
 0xcca   : > { %v3211_v10 = vpop.eup %3210  ;;  %v2437_v20 = vadd.f32 1.0, %v3209_v25 }
 0xccb   : > { %v2446_v32 = vsel %vm2445_vm3, %v3207_v30, %v2442_v29  ;;  %v2454_v44 = vmul.f32 %v3211_v10, %v2436_v8  ;;  %vm2459_vm1 = vweird.f32 %v3211_v10 }
 0xccc   : > { %v2451_v38 = vsel %vm2448_vm4, %v2450_v31, %v2446_v32  ;;  %3212 = vrcp.f32 %v2437_v20  ;;  %vm2460_vm6 = vmor %vm2458_vm5, %vm2459_vm1  ;;  %v2479_v0 = vand.u32 2147483648, %v2437_v20  ;;  %v2477_v9 = vand.u32 2147483647, %v2437_v20 }
 0xccd   : > { %v2483_v36 = vmul.f32 %v2451_v38, %v2418_v15  ;;  %v2455_v34 = vsub.f32 1.0, %v2454_v44  ;;  %vm2473_vm9 = vweird.f32 %v2437_v20 }
 0xcce   : > { %v2480_v21 = vor.u32 1.1754944e-38, %v2479_v0  ;;  %vm2478_vm11 = vcmp.eq.f32.partialorder %v2477_v9, 8.507059e+37 }
 0xccf   : > { %2522 = vmatmul.f32.vlgmr.msra.gmra.mxu1 %v2483_v36  ;;  %v2456_v40 = vmul.f32 %v3211_v10, %v2455_v34 }
 0xcd1   : > { %v2457_v43 = vadd.f32 %v3211_v10, %v2456_v40 }
 0xcd2   : > { %v3213_v55 = vpop.eup %3212 }
 0xcd3   : > { %v2461_v7 = vsel %vm2460_vm6, %v3211_v10, %v2457_v43  ;;  %v2469_v47 = vmul.f32 %v3213_v55, %v2437_v20  ;;  %vm2474_vm8 = vweird.f32 %v3213_v55  ;;  %v3093_v43 = vld [vmem:[%s3839_s24 + $0x17] ss:$0 sm:$0xff] }
 0xcd4   : > { %v2466_v35 = vsel %vm2463_vm7, %v2465_v42, %v2461_v7  ;;  %vm2475_vm10 = vmor %vm2473_vm9, %vm2474_vm8 }
 0xcd5   : > { %v2484_v48 = vmul.f32 %v2466_v35, %v2421_v57  ;;  %v2470_v51 = vsub.f32 1.0, %v2469_v47 }
 0xcd7   : > { %2525 = vmatmul.f32.gmra.mxu1 %v2484_v48  ;;  %v2471_v60 = vmul.f32 %v3213_v55, %v2470_v51 }
 0xcd9   : > { %v2472_v27 = vadd.f32 %v3213_v55, %v2471_v60 }
 0xcdb   : > { %v2476_v16 = vsel %vm2475_vm10, %v3213_v55, %v2472_v27 }
 0xcdc   : > { %v2481_v18 = vsel %vm2478_vm11, %v2480_v21, %v2476_v16 }
 0xcdd   : > { %v2485_v61 = vmul.f32 %v2481_v18, %v2424_v4 }
 0xcdf   : > { %2528 = vmatmul.f32.gmra.mxu1 %v2485_v61 }
 0xd4c   : > { %v2523_v11 = vpop.f32.mrf.mxu1 }
 0xd4d   : > { %v2524_v19 = vadd.f32 %v3091_v24, %v2523_v11 }
 0xd4f   : > { %v2532_v52 = vmul.f32 0.5, %v2524_v19 }
 0xd51   : > { %v2535_v63 = vadd.f32 %v2532_v52, %v4356_v1 }
 0xd53   : > { %2540 = vadd.xlane.f32.xlu1 %v2535_v63 }
 0xd54   : > { %v2526_v17 = vpop.f32.mrf.mxu1 }
 0xd55   : > { %v2527_v46 = vadd.f32 %v3091_v24, %v2526_v17 }
 0xd57   : > { %v2533_v54 = vmul.f32 0.5, %v2527_v46 }
 0xd59   : > { %v2536_v26 = vadd.f32 %v2533_v54, %v4360_v39 }
 0xd5b   : > { %2542 = vadd.xlane.f32.xlu2 %v2536_v26 }
 0xd5c   : > { %v2529_v13 = vpop.f32.mrf.mxu1 }
 0xd5d   : > { %v2530_v6 = vadd.f32 %v3091_v24, %v2529_v13 }
 0xd5f   : > { %v2534_v22 = vmul.f32 0.5, %v2530_v6 }
 0xd61   : > { %v2537_v28 = vadd.f32 %v2534_v22, %v4364_v41 }
 0xd63   : > { %2544 = vadd.xlane.f32.xlu0 %v2537_v28 }
 0xdc6   : > { %v2541_v15 = vpop.xlane.xlu1 %2540 }
 0xdc7   : > { %v2546_v56 = vmul.f32 0.03125, %v2541_v15 }
 0xdc9   : > { %v2549_v45 = vsub.f32 %v2535_v63, %v2546_v56 }
 0xdcb   : > { %v2552_v57 = vmul.f32 %v3820_v3, %v2549_v45 }
 0xdcd   : > { %v2555_v58 = vmul.f32 %v2552_v57, %v2552_v57 }
 0xdce   : > { %v2543_v1 = vpop.xlane.xlu2 %2542 }
 0xdcf   : > { %v2547_v59 = vmul.f32 0.03125, %v2543_v1  ;;  %2558 = vadd.xlane.f32.xlu1 %v2555_v58 }
 0xdd1   : > { %v2550_v49 = vsub.f32 %v2536_v26, %v2547_v59 }
 0xdd3   : > { %v2553_v62 = vmul.f32 %v3820_v3, %v2550_v49 }
 0xdd5   : > { %v2556_v39 = vmul.f32 %v2553_v62, %v2553_v62 }
 0xdd6   : > { %v2545_v4 = vpop.xlane.xlu0 %2544 }
 0xdd7   : > { %v2548_v53 = vmul.f32 0.03125, %v2545_v4  ;;  %2560 = vadd.xlane.f32.xlu2 %v2556_v39 }
 0xdd9   : > { %v2551_v5 = vsub.f32 %v2537_v28, %v2548_v53 }
 0xddb   : > { %v2554_v41 = vmul.f32 %v3820_v3, %v2551_v5 }
 0xddd   : > { %v2557_v30 = vmul.f32 %v2554_v41, %v2554_v41 }
 0xddf   : > { %2562 = vadd.xlane.f32.xlu0 %v2557_v30 }
 0xe42   : > { %v2559_v8 = vpop.xlane.xlu1 %2558 }
 0xe43   : > { %v2564_v33 = vmul.f32 0.03125, %v2559_v8 }
 0xe45   : > { %v2567_v50 = vadd.f32 1e-05, %v2564_v33 }
 0xe47   : > { %3214 = vrsqrt.f32 %v2567_v50  ;;  %vm2576_vm13 = vweird.f32 %v2567_v50 }
 0xe4a   : > { %v2561_v12 = vpop.xlane.xlu2 %2560 }
 0xe4b   : > { %v2565_v14 = vmul.f32 0.03125, %v2561_v12 }
 0xe4d   : > { %v3215_v23 = vpop.eup %3214  ;;  %v2568_v25 = vadd.f32 1e-05, %v2565_v14 }
 0xe4e   : > { %v2571_v29 = vmul.f32 %v3215_v23, %v2567_v50  ;;  %vm2577_vm12 = vweird.f32 %v3215_v23 }
 0xe4f   : > { %3216 = vrsqrt.f32 %v2568_v25  ;;  %vm2578_vm14 = vmor %vm2576_vm13, %vm2577_vm12  ;;  %vm2586_vm0 = vweird.f32 %v2568_v25 }
 0xe50   : > { %v2572_v10 = vmul.f32 %v3215_v23, %v2571_v29 }
 0xe52   : > { %v2573_v31 = vmul.f32 0.5, %v2572_v10  ;;  %v2563_v20 = vpop.xlane.xlu0 %2562 }
 0xe53   : > { %v2566_v32 = vmul.f32 0.03125, %v2563_v20 }
 0xe54   : > { %v2574_v44 = vsub.f32 1.5, %v2573_v31 }
 0xe55   : > { %v3217_v3 = vpop.eup %3216  ;;  %v2569_v38 = vadd.f32 1e-05, %v2566_v32 }
 0xe56   : > { %v2575_v36 = vmul.f32 %v3215_v23, %v2574_v44  ;;  %v2581_v34 = vmul.f32 %v3217_v3, %v2568_v25  ;;  %vm2587_vm15 = vweird.f32 %v3217_v3 }
 0xe57   : > { %3218 = vrsqrt.f32 %v2569_v38  ;;  %vm2588_vm2 = vmor %vm2586_vm0, %vm2587_vm15  ;;  %vm2596_vm4 = vweird.f32 %v2569_v38 }
 0xe58   : > { %v2579_v40 = vsel %vm2578_vm14, %v3215_v23, %v2575_v36  ;;  %v2582_v37 = vmul.f32 %v3217_v3, %v2581_v34 }
 0xe59   : > { %v2600_v55 = vmul.f32 %v2579_v40, %v2552_v57 }
 0xe5a   : > { %v2583_v42 = vmul.f32 0.5, %v2582_v37 }
 0xe5b   : > { %v2606_v7 = vmul.f32 %v3092_v2, %v2600_v55 }
 0xe5c   : > { %v2584_v47 = vsub.f32 1.5, %v2583_v42 }
 0xe5d   : > { %v3219_v35 = vpop.eup %3218  ;;  %v2612_v48 = vadd.f32 %v3093_v43, %v2606_v7 }
 0xe5e   : > { %v2585_v51 = vmul.f32 %v3217_v3, %v2584_v47  ;;  %v2591_v0 = vmul.f32 %v3219_v35, %v2569_v38  ;;  %vm2597_vm3 = vweird.f32 %v3219_v35 }
 0xe5f   : > { %2615 = vst [vmem:[%s3830_s28] sm:$0xff] %v2612_v48  ;;  %vm2598_vm1 = vmor %vm2596_vm4, %vm2597_vm3 }
 0xe60   : > { %v2589_v60 = vsel %vm2588_vm2, %v3217_v3, %v2585_v51  ;;  %v2592_v9 = vmul.f32 %v3219_v35, %v2591_v0 }
 0xe61   : > { %v2601_v27 = vmul.f32 %v2589_v60, %v2553_v62 }
 0xe62   : > { %v2593_v21 = vmul.f32 0.5, %v2592_v9 }
 0xe63   : > { %v2607_v16 = vmul.f32 %v3092_v2, %v2601_v27 }
 0xe64   : > { %v2594_v18 = vsub.f32 1.5, %v2593_v21 }
 0xe65   : > { %v2613_v61 = vadd.f32 %v3093_v43, %v2607_v16 }
 0xe66   : > { %v2595_v24 = vmul.f32 %v3219_v35, %v2594_v18 }
 0xe67   : > { %2616 = vst [vmem:[%s3830_s28 + $0x8] sm:$0xff] %v2613_v61 }
 0xe68   : > { %v2599_v11 = vsel %vm2598_vm1, %v3219_v35, %v2595_v24 }
 0xe69   : > { %v2602_v19 = vmul.f32 %v2599_v11, %v2554_v41 }
 0xe6b   : > { %v2608_v52 = vmul.f32 %v3092_v2, %v2602_v19 }
 0xe6d   : > { %v2614_v63 = vadd.f32 %v3093_v43, %v2608_v52 }
 0xe6f   : > { %2617 = vst [vmem:[%s3830_s28 + $0x10] sm:$0xff] %v2614_v63 }
 0xe70 PF: > { %s27_s27 = sadd.s32 1, %s3532_s27   ;;  %s4527_s2 = sld [smem:[#allocation16_spill]] }
 0xe71   : > { %p24_p10 = scmp.ge.s32.totalorder %s27_s27, 6   ;;  %s4528_s19 = sld [smem:[#allocation23_spill]] }
 0xe72   : > { %s4529_s4 = sld [smem:[#allocation17_spill]]  ;;  %s4534_s17 = smov %s3496_s18 }
 0xe73   : > { %s4530_s22 = sld [smem:[#allocation24_spill]]  ;;  %s4536_s20 = smov %s3508_s21 }
 0xe74   : > { %s4531_s24 = sld [smem:[#allocation20_spill]]  ;;  %s4538_s23 = smov %s3524_s25 }
 0xe75   : > { %s4532_s10 = sld [smem:[#allocation21_spill]] }
 0xe76   : > { %s4533_s26 = sld [smem:[#allocation22_spill]]  ;;  %s4535_s18 = smov %s4527_s2 }
 0xe77   :  { %26 = sbr.rel (!%p24_p10) target bundleno = 19 (0x13), region = 164 }
 0xe78   : > { %s4537_s21 = smov %s4529_s4 }
 0xe7b   : > { %s4539_s25 = smov %s4532_s10 }
 0xe7c   :  { %2655 = vsyncpa [#allocation3], 1 }
 0xe7d   :  { %2657 = vsyncpa [#allocation3 + $0x1], 1 }
 0xe7e   :  { %2658 = vsyncpa [#allocation5], 1 }
 0xe7f   :  { %2659 = vsyncpa [#allocation8], 1 }

</bundles_post_ra>
